<compile_context>
chip_gen: v7x
topology: tpu7x:2x2x1
jax: 0.10.0
libtpu: 0.0.40
codegen_flags: <defaults>
</compile_context>

<pallas_src>
import math
import functools

import jax
import jax.numpy as jnp
from jax.experimental import pallas as pl
from jax.experimental.pallas import tpu as pltpu

LOG_STD_MAX = 2.0
LOG_STD_MIN = -20.0
_HALF_LOG_2PI = 0.5 * math.log(2.0 * math.pi)
_LOG2 = math.log(2.0)


def _round_up(n, m):
    return (n + m - 1) // m * m


def _actor_kernel(x_ref, noise_ref, w1_ref, w2_ref, wh_ref, bias_ref, out_ref,
                  *, act_limit, action_dim, p, h1, h2):
    """One batch tile. Padded feature columns carry zero weights/bias/noise, so
    they contribute a compile-time constant to logp and zero everywhere else."""
    x = x_ref[...]                                               # (bb, S) f32, unpadded S

    # Concatenated biases: [b1 | b2 | b_mu | b_ls], lane-aligned slices.
    b1 = bias_ref[:, :h1]                                        # (1, H1)
    b2 = bias_ref[:, h1:h1 + h2]                                 # (1, H2)
    bh = bias_ref[:, h1 + h2:]                                   # (1, 2P)

    # MLP trunk (tanh on every layer), f32 matmuls with f32 accumulation.
    h = jnp.tanh(jnp.dot(x, w1_ref[...], preferred_element_type=jnp.float32) + b1)
    h = jnp.tanh(jnp.dot(h, w2_ref[...], preferred_element_type=jnp.float32) + b2)

    # Fused heads: one (bb, 2P) matmul, then lane-aligned slices.
    head = jnp.dot(h, wh_ref[...], preferred_element_type=jnp.float32) + bh
    mu = head[:, :p]                                             # (bb, P)
    log_std = jnp.clip(head[:, p:], LOG_STD_MIN, LOG_STD_MAX)
    std = jnp.exp(log_std)

    noise = noise_ref[...]                                       # (bb, P), padded lanes = 0
    pi = mu + std * noise                                        # rsample

    # Normal(mu, std).log_prob(pi): z = (pi - mu)/std == noise exactly.
    logp_elem = -0.5 * noise * noise - log_std - _HALF_LOG_2PI
    # Tanh-squash correction (numerically stable softplus form; see NOTE above).
    corr = 2.0 * (_LOG2 - pi - jax.nn.softplus(-2.0 * pi))

    # Mask-free reduction: each padded column contributes exactly -_HALF_LOG_2PI
    # (logp_elem) and 0 (corr); add the constant back after summing all P lanes.
    logp = (jnp.sum(logp_elem - corr, axis=-1, keepdims=True)
            + (p - action_dim) * _HALF_LOG_2PI)                  # (bb, 1)

    act = act_limit * jnp.tanh(pi)                               # padded cols: pi==0 -> 0

    # Pack lane-dense output slab: columns [0:A] = action, column A = logp.
    col = jax.lax.broadcasted_iota(jnp.int32, pi.shape, dimension=1)
    out_ref[...] = jnp.where(col == action_dim, logp, act)


def pack_actor_params(params):
    """One-time packing of the actor params (pad to lane width, fuse heads,
    concatenate biases). Cache the result and reuse it across calls."""
    w1 = jnp.asarray(params["w1"], jnp.float32)
    S, H1 = w1.shape
    H2 = params["w2"].shape[1]
    A = params["w_mu"].shape[1]

    H1p = _round_up(H1, 128)
    H2p = _round_up(H2, 128)
    P = _round_up(A + 1, 128)        # +1 spare column so logp packs into the slab

    def pad2(a, shape):
        a = jnp.asarray(a, jnp.float32).reshape((-1, a.shape[-1]))
        return jnp.zeros(shape, jnp.float32).at[:a.shape[0], :a.shape[1]].set(a)

    packed = {
        # x's feature dim stays unpadded, so w1 keeps S rows.
        "w1": pad2(params["w1"], (S, H1p)),
        "w2": pad2(params["w2"], (H1p, H2p)),
        # Fused head weights [w_mu | w_ls], each half padded to P lanes.
        "wh": jnp.concatenate([pad2(params["w_mu"], (H2p, P)),
                               pad2(params["w_ls"], (H2p, P))], axis=1),
        # All biases concatenated into one lane-dense row: [b1 | b2 | b_mu | b_ls].
        "bias": jnp.concatenate([pad2(params["b1"], (1, H1p)),
                                 pad2(params["b2"], (1, H2p)),
                                 pad2(params["b_mu"], (1, P)),
                                 pad2(params["b_ls"], (1, P))], axis=1),
        "state_dim": S, "action_dim": A, "h1": H1p, "h2": H2p, "p": P,
    }
    return packed


def squashed_gaussian_actor(x, noise, packed, act_limit, *, block_b=None):
    """x: (B, state_dim) f32; noise: (B, action_dim) f32 standard-normal samples.
    packed: output of pack_actor_params (reused across calls)."""
    B, S = x.shape
    A = packed["action_dim"]
    H1p, H2p, P = packed["h1"], packed["h2"], packed["p"]
    assert S == packed["state_dim"]
    assert noise.shape == (B, A)

    # Minimize grid steps (overhead-bound at these sizes): a single 256-row block
    # for B<=256; 256-row "parallel" tiles (MXU-filling, dual-TC shardable) beyond.
    if block_b is None:
        block_b = min(_round_up(B, 128), 256)
    B_pad = _round_up(B, block_b)

    x = x.astype(jnp.float32)
    if B_pad != B:
        x = jnp.zeros((B_pad, S), jnp.float32).at[:B].set(x)
    # Only remaining per-call prep: zero-pad the fresh noise out to P lanes
    # (padded lanes must be exactly 0 for the mask-free logp and packed output).
    noisep = jnp.zeros((B_pad, P), jnp.float32).at[:B, :A].set(noise.astype(jnp.float32))

    kernel = functools.partial(_actor_kernel, act_limit=float(act_limit),
                               action_dim=A, p=P, h1=H1p, h2=H2p)

    batch_spec = lambda shape: pl.BlockSpec(shape, lambda i: (i, 0))
    const_spec = lambda shape: pl.BlockSpec(shape, lambda i: (0, 0))
    # NOTE: if HIDDEN scales up (v7x 64 MiB VMEM), add pipeline_mode=pl.Buffered(1)
    # to the const weight specs and/or tile the K dim on an "arbitrary" grid axis.

    out = pl.pallas_call(
        kernel,
        out_shape=jax.ShapeDtypeStruct((B_pad, P), jnp.float32),
        grid=(B_pad // block_b,),
        in_specs=[
            batch_spec((block_b, S)),                  # x (feature dim unpadded)
            batch_spec((block_b, P)),                  # noise
            const_spec((S, H1p)),                      # w1
            const_spec((H1p, H2p)),                    # w2
            const_spec((H2p, 2 * P)),                  # [w_mu | w_ls]
            const_spec((1, H1p + H2p + 2 * P)),        # [b1 | b2 | b_mu | b_ls]
        ],
        out_specs=batch_spec((block_b, P)),
        compiler_params=pltpu.CompilerParams(
            dimension_semantics=("parallel",)),
    )(x, noisep, packed["w1"], packed["w2"], packed["wh"], packed["bias"])

    action = out[:B, :A]
    logp = out[:B, A]
    return action, logp


def _reference(x, noise, params, act_limit):
    """Pure-JAX f32 reference mirroring the PyTorch forward."""
    def mm(a, w):
        return jnp.dot(a, jnp.asarray(w, jnp.float32),
                       precision=jax.lax.Precision.HIGHEST)
    h = jnp.tanh(mm(x, params["w1"]) + params["b1"])
    h = jnp.tanh(mm(h, params["w2"]) + params["b2"])
    mu = mm(h, params["w_mu"]) + params["b_mu"]
    log_std = jnp.clip(mm(h, params["w_ls"]) + params["b_ls"], LOG_STD_MIN, LOG_STD_MAX)
    std = jnp.exp(log_std)
    pi = mu + std * noise
    z = (pi - mu) / std
    logp = jnp.sum(-0.5 * z * z - log_std - _HALF_LOG_2PI, axis=-1)
    logp -= jnp.sum(2.0 * (_LOG2 - pi - jax.nn.softplus(-2.0 * pi)), axis=-1)
    return act_limit * jnp.tanh(pi), logp


def _init_params(key, state_dim, hidden, action_dim):
    """Deterministic uniform(-1/sqrt(fan_in), 1/sqrt(fan_in)) init (PyTorch-Linear-like)."""
    sizes = [state_dim] + list(hidden)
    keys = jax.random.split(key, 8)
    p = {}

    def lin(kw, kb, fan_in, fan_out):
        bound = 1.0 / math.sqrt(fan_in)
        w = jax.random.uniform(kw, (fan_in, fan_out), jnp.float32, -bound, bound)
        b = jax.random.uniform(kb, (1, fan_out), jnp.float32, -bound, bound)
        return w, b

    p["w1"], p["b1"] = lin(keys[0], keys[1], sizes[0], sizes[1])
    p["w2"], p["b2"] = lin(keys[2], keys[3], sizes[1], sizes[2])
    p["w_mu"], p["b_mu"] = lin(keys[4], keys[5], sizes[2], action_dim)
    p["w_ls"], p["b_ls"] = lin(keys[6], keys[7], sizes[2], action_dim)
    return p


if __name__ == "__main__":
    B, STATE, ACTION = 256, 16, 8
    HIDDEN = (32, 32)
    ACT_LIMIT = 2.0

    key = jax.random.PRNGKey(0)
    k_params, k_x, k_noise = jax.random.split(key, 3)

    params = _init_params(k_params, STATE, HIDDEN, ACTION)
    x = jax.random.normal(k_x, (B, STATE), jnp.float32)
    noise = jax.random.normal(k_noise, (B, ACTION), jnp.float32)  # N(0,1) for rsample

    # Pack/pad/cast the weights ONCE; reuse across every actor call.
    packed = jax.tree_util.tree_map(
        lambda a: jax.block_until_ready(a) if isinstance(a, jax.Array) else a,
        pack_actor_params(params))

    action, logp = squashed_gaussian_actor(x, noise, packed, ACT_LIMIT)
    action = jax.block_until_ready(action)
    logp = jax.block_until_ready(logp)

    ref_action, ref_logp = _reference(x, noise, params, ACT_LIMIT)
    assert action.shape == (B, ACTION) and logp.shape == (B,)
    assert jnp.allclose(action, ref_action, atol=2e-2, rtol=2e-2)
    assert jnp.allclose(logp, ref_logp, atol=2e-2, rtol=2e-2)

    print("KERNEL_OK")
</pallas_src>

<mosaic_0001>
module attributes {stable_mosaic.version = 11 : i64} {
  func.func @_actor_kernel(%arg0: i32, %arg1: memref<256x16xf32, #tpu.memory_space<vmem>>, %arg2: memref<256x128xf32, #tpu.memory_space<vmem>>, %arg3: memref<16x128xf32, #tpu.memory_space<vmem>>, %arg4: memref<128x128xf32, #tpu.memory_space<vmem>>, %arg5: memref<128x256xf32, #tpu.memory_space<vmem>>, %arg6: memref<1x512xf32, #tpu.memory_space<vmem>>, %arg7: memref<256x128xf32, #tpu.memory_space<vmem>>) attributes {dimension_semantics = [#tpu.dimension_semantics<parallel>], iteration_bounds = array<i64: 1>, scalar_prefetch = 0 : i64, scratch_operands = 0 : i64, tpu.core_type = #tpu.core_type<tc>, window_params = [{transform_indices = @transform_0, window_bounds = array<i64: 256, 16>}, {transform_indices = @transform_1, window_bounds = array<i64: 256, 128>}, {pipeline_mode = #tpu.pipeline_mode<synchronous>, transform_indices = @transform_2, window_bounds = array<i64: 16, 128>}, {pipeline_mode = #tpu.pipeline_mode<synchronous>, transform_indices = @transform_3, window_bounds = array<i64: 128, 128>}, {pipeline_mode = #tpu.pipeline_mode<synchronous>, transform_indices = @transform_4, window_bounds = array<i64: 128, 256>}, {pipeline_mode = #tpu.pipeline_mode<synchronous>, transform_indices = @transform_5, window_bounds = array<i64: 1, 512>}, {transform_indices = @transform_6, window_bounds = array<i64: 256, 128>}]} {
    %c0 = arith.constant 0 : index
    %c0_0 = arith.constant 0 : index
    %0 = vector.load %arg1[%c0, %c0_0] : memref<256x16xf32, #tpu.memory_space<vmem>>, vector<256x16xf32>
    %c0_1 = arith.constant 0 : index
    %c0_2 = arith.constant 0 : index
    %1 = vector.load %arg6[%c0_1, %c0_2] : memref<1x512xf32, #tpu.memory_space<vmem>>, vector<1x128xf32>
    %c0_3 = arith.constant 0 : index
    %c128 = arith.constant 128 : index
    %2 = vector.load %arg6[%c0_3, %c128] : memref<1x512xf32, #tpu.memory_space<vmem>>, vector<1x128xf32>
    %c0_4 = arith.constant 0 : index
    %c256 = arith.constant 256 : index
    %3 = vector.load %arg6[%c0_4, %c256] : memref<1x512xf32, #tpu.memory_space<vmem>>, vector<1x256xf32>
    %c0_5 = arith.constant 0 : index
    %c0_6 = arith.constant 0 : index
    %4 = vector.load %arg3[%c0_5, %c0_6] : memref<16x128xf32, #tpu.memory_space<vmem>>, vector<16x128xf32>
    %cst = arith.constant dense<0.000000e+00> : vector<256x128xf32>
    %5 = tpu.matmul %0, %4, %cst {dimension_numbers = #tpu.dot_dimension_numbers<[1], [0], [0], [1], [0, 0, 1, 1], [], []>} : vector<256x16xf32>, vector<16x128xf32>, vector<256x128xf32> -> vector<256x128xf32>
    %6 = vector.broadcast %1 : vector<1x128xf32> to vector<256x128xf32>
    %7 = arith.addf %5, %6 : vector<256x128xf32>
    %8 = math.tanh %7 : vector<256x128xf32>
    %c0_7 = arith.constant 0 : index
    %c0_8 = arith.constant 0 : index
    %9 = vector.load %arg4[%c0_7, %c0_8] : memref<128x128xf32, #tpu.memory_space<vmem>>, vector<128x128xf32>
    %cst_9 = arith.constant dense<0.000000e+00> : vector<256x128xf32>
    %10 = tpu.matmul %8, %9, %cst_9 {dimension_numbers = #tpu.dot_dimension_numbers<[1], [0], [0], [1], [0, 0, 1, 1], [], []>} : vector<256x128xf32>, vector<128x128xf32>, vector<256x128xf32> -> vector<256x128xf32>
    %11 = vector.broadcast %2 : vector<1x128xf32> to vector<256x128xf32>
    %12 = arith.addf %10, %11 : vector<256x128xf32>
    %13 = math.tanh %12 : vector<256x128xf32>
    %c0_10 = arith.constant 0 : index
    %c0_11 = arith.constant 0 : index
    %14 = vector.load %arg5[%c0_10, %c0_11] : memref<128x256xf32, #tpu.memory_space<vmem>>, vector<128x256xf32>
    %cst_12 = arith.constant dense<0.000000e+00> : vector<256x256xf32>
    %15 = tpu.matmul %13, %14, %cst_12 {dimension_numbers = #tpu.dot_dimension_numbers<[1], [0], [0], [1], [0, 0, 1, 1], [], []>} : vector<256x128xf32>, vector<128x256xf32>, vector<256x256xf32> -> vector<256x256xf32>
    %16 = vector.broadcast %3 : vector<1x256xf32> to vector<256x256xf32>
    %17 = arith.addf %15, %16 : vector<256x256xf32>
    %18 = vector.extract_strided_slice %17 {offsets = [0, 0], sizes = [256, 128], strides = [1, 1]} : vector<256x256xf32> to vector<256x128xf32>
    %19 = vector.extract_strided_slice %17 {offsets = [0, 128], sizes = [256, 128], strides = [1, 1]} : vector<256x256xf32> to vector<256x128xf32>
    %cst_13 = arith.constant -2.000000e+01 : f32
    %cst_14 = arith.constant 2.000000e+00 : f32
    %20 = vector.broadcast %cst_13 : f32 to vector<256x128xf32>
    %21 = arith.maximumf %20, %19 : vector<256x128xf32>
    %22 = vector.broadcast %cst_14 : f32 to vector<256x128xf32>
    %23 = arith.minimumf %22, %21 : vector<256x128xf32>
    %24 = math.exp %23 : vector<256x128xf32>
    %c0_15 = arith.constant 0 : index
    %c0_16 = arith.constant 0 : index
    %25 = vector.load %arg2[%c0_15, %c0_16] : memref<256x128xf32, #tpu.memory_space<vmem>>, vector<256x128xf32>
    %26 = arith.mulf %24, %25 : vector<256x128xf32>
    %27 = arith.addf %18, %26 : vector<256x128xf32>
    %cst_17 = arith.constant -5.000000e-01 : f32
    %28 = vector.broadcast %cst_17 : f32 to vector<256x128xf32>
    %29 = arith.mulf %28, %25 : vector<256x128xf32>
    %30 = arith.mulf %29, %25 : vector<256x128xf32>
    %31 = arith.subf %30, %23 : vector<256x128xf32>
    %cst_18 = arith.constant 0.918938517 : f32
    %32 = vector.broadcast %cst_18 : f32 to vector<256x128xf32>
    %33 = arith.subf %31, %32 : vector<256x128xf32>
    %cst_19 = arith.constant 0.693147182 : f32
    %34 = vector.broadcast %cst_19 : f32 to vector<256x128xf32>
    %35 = arith.subf %34, %27 : vector<256x128xf32>
    %cst_20 = arith.constant -2.000000e+00 : f32
    %36 = vector.broadcast %cst_20 : f32 to vector<256x128xf32>
    %37 = arith.mulf %36, %27 : vector<256x128xf32>
    %cst_21 = arith.constant 0.000000e+00 : f32
    %38 = vector.broadcast %cst_21 : f32 to vector<256x128xf32>
    %39 = arith.maximumf %37, %38 : vector<256x128xf32>
    %40 = vector.broadcast %cst_21 : f32 to vector<256x128xf32>
    %41 = arith.subf %37, %40 : vector<256x128xf32>
    %42 = arith.cmpf one, %41, %41 : vector<256x128xf32>
    %43 = vector.broadcast %cst_21 : f32 to vector<256x128xf32>
    %44 = arith.addf %37, %43 : vector<256x128xf32>
    %45 = math.absf %41 : vector<256x128xf32>
    %cst_22 = arith.constant 0.000000e+00 : f32
    %46 = vector.broadcast %cst_22 : f32 to vector<256x128xf32>
    %47 = arith.subf %46, %45 : vector<256x128xf32>
    %48 = math.exp %47 : vector<256x128xf32>
    %49 = math.log1p %48 : vector<256x128xf32>
    %50 = arith.addf %39, %49 : vector<256x128xf32>
    %51 = arith.select %42, %44, %50 : vector<256x128xi1>, vector<256x128xf32>
    %52 = arith.subf %35, %51 : vector<256x128xf32>
    %cst_23 = arith.constant 2.000000e+00 : f32
    %53 = vector.broadcast %cst_23 : f32 to vector<256x128xf32>
    %54 = arith.mulf %53, %52 : vector<256x128xf32>
    %55 = arith.subf %33, %54 : vector<256x128xf32>
    %cst_24 = arith.constant dense<0.000000e+00> : vector<256xf32>
    %56 = vector.multi_reduction <add>, %55, %cst_24 [1] : vector<256x128xf32> to vector<256xf32>
    %57 = vector.shape_cast %56 : vector<256xf32> to vector<256x1xf32>
    %cst_25 = arith.constant 110.272621 : f32
    %58 = vector.broadcast %cst_25 : f32 to vector<256x1xf32>
    %59 = arith.addf %57, %58 : vector<256x1xf32>
    %60 = math.tanh %27 : vector<256x128xf32>
    %cst_26 = arith.constant 2.000000e+00 : f32
    %61 = vector.broadcast %cst_26 : f32 to vector<256x128xf32>
    %62 = arith.mulf %61, %60 : vector<256x128xf32>
    %63 = tpu.iota {dimensions = array<i32: 1>} : vector<256x128xi32>
    %c8_i32 = arith.constant 8 : i32
    %64 = vector.broadcast %c8_i32 : i32 to vector<256x128xi32>
    %65 = arith.cmpi eq, %63, %64 : vector<256x128xi32>
    %66 = vector.shape_cast %59 : vector<256x1xf32> to vector<256x1xf32>
    %67 = vector.broadcast %66 : vector<256x1xf32> to vector<256x128xf32>
    %68 = arith.select %65, %67, %62 : vector<256x128xi1>, vector<256x128xf32>
    %c0_27 = arith.constant 0 : index
    %c0_28 = arith.constant 0 : index
    %69 = vector.load %arg7[%c0_27, %c0_28] : memref<256x128xf32, #tpu.memory_space<vmem>>, vector<256x128xf32>
    tpu.vector_store %arg7[%c0_27, %c0_28], %68 {strides = array<i32>} : memref<256x128xf32, #tpu.memory_space<vmem>>, vector<256x128xf32>,
    return
  }
  func.func @transform_0(%arg0: i32) -> (i32, i32) {
    %c0_i32 = arith.constant 0 : i32
    %c0_i32_0 = arith.constant 0 : i32
    return %arg0, %c0_i32 : i32, i32
  }
  func.func @transform_1(%arg0: i32) -> (i32, i32) {
    %c0_i32 = arith.constant 0 : i32
    %c0_i32_0 = arith.constant 0 : i32
    return %arg0, %c0_i32 : i32, i32
  }
  func.func @transform_2(%arg0: i32) -> (i32, i32) {
    %c0_i32 = arith.constant 0 : i32
    %c0_i32_0 = arith.constant 0 : i32
    %c0_i32_1 = arith.constant 0 : i32
    return %c0_i32, %c0_i32_0 : i32, i32
  }
  func.func @transform_3(%arg0: i32) -> (i32, i32) {
    %c0_i32 = arith.constant 0 : i32
    %c0_i32_0 = arith.constant 0 : i32
    %c0_i32_1 = arith.constant 0 : i32
    return %c0_i32, %c0_i32_0 : i32, i32
  }
  func.func @transform_4(%arg0: i32) -> (i32, i32) {
    %c0_i32 = arith.constant 0 : i32
    %c0_i32_0 = arith.constant 0 : i32
    %c0_i32_1 = arith.constant 0 : i32
    return %c0_i32, %c0_i32_0 : i32, i32
  }
  func.func @transform_5(%arg0: i32) -> (i32, i32) {
    %c0_i32 = arith.constant 0 : i32
    %c0_i32_0 = arith.constant 0 : i32
    %c0_i32_1 = arith.constant 0 : i32
    return %c0_i32, %c0_i32_0 : i32, i32
  }
  func.func @transform_6(%arg0: i32) -> (i32, i32) {
    %c0_i32 = arith.constant 0 : i32
    %c0_i32_0 = arith.constant 0 : i32
    return %arg0, %c0_i32 : i32, i32
  }
}

</mosaic_0001>

<bundles_post_ra>
// kernel: tpu_custom_call.1
= control target key start
LH: loop header
LB: loop body
LE: loop exit
PB: predicated region body
PF: predicated region fallthrough
CT: control target
= control target key end

     0   :  { %11 = vsyncpa [#allocation3], 0  ;;  %s5308_s0 = inlined_call_operand.vmem [shape: f32[256,16], index: 0, kind: input, shape index: {}]   ;;  %s5309_s1 = inlined_call_operand.vmem [shape: f32[256,128], index: 1, kind: input, shape index: {}]   ;;  %s5310_s2 = inlined_call_operand.vmem [shape: f32[16,128], index: 2, kind: input, shape index: {}]   ;;  %s5311_s3 = inlined_call_operand.hbm [shape: f32[128,128], index: 3, kind: input, shape index: {}]   ;;  %s5312_s4 = inlined_call_operand.hbm [shape: f32[128,256], index: 4, kind: input, shape index: {}]   ;;  %s5313_s5 = inlined_call_operand.vmem [shape: f32[1,512], index: 5, kind: input, shape index: {}]   ;;  %s5314_s6 = inlined_call_operand.hbm [shape: f32[256,128], index: 6, kind: output, shape index: {}]  }
   0x1   :  { %12 = vsyncpa [#allocation6], 0 }
   0x2   :  { %13 = vsyncpa [#allocation4], 0  ;;  %s3192_s21 = smov [#allocation2]   ;;  %s3120_s25 = scalar_lea.hbm %s5311_s3, 2048 }
   0x3   :  { %s25_s22 = sshll.u32 %s3192_s21, 4  ;;  %p3121_p0 = scmp.ne.s32.totalorder %s5311_s3, %s3120_s25  ;;  %s26_s22 = int_to_ptr.vmem [resolvable:$true] %s25_s22 }
   0x4   :  { %p3124_p1 = scmp.lt.u32.totalorder %s3120_s25, %s5311_s3 }
   0x6   :  { %p3126_p2 = pnand %p3124_p1, %p3121_p0 }
   0x8   :  { %3129 = shalt.err (!%p3126_p2)
}
   0x9   :  { %s3130_s30 = scalar_lea.vmem %s26_s22, 2048  ;;  %p3135_p4 = scmp.lt.s32.totalorder %s26_s22, %s26_s22 }
   0xa   :  { %p3131_p3 = scmp.ne.s32.totalorder %s26_s22, %s3130_s30  ;;  %p3136_p5 = scmp.lt.s32.totalorder %s3130_s30, %s3130_s30 }
   0xc   :  { %p3137_p6 = por %p3136_p5, %p3135_p4 }
   0xe   :  { %p3138_p7 = pnand %p3137_p6, %p3131_p3 }
  0x10   :  { %3141 = shalt.err (!%p3138_p7)
}
  0x11   :  { %s3193_s7 = smov 128   ;;  %s3194_s8 = smov 8  }
  0x12   :  { %31 = dma.hbm_to_vmem [thread:$0]  %s5311_s3, 2048, %s26_s22, [#allocation3], %s3193_s7, %s3193_s7, %s3194_s8  }
  0x13   :  { %s3195_s11 = smov [#allocation5]   ;;  %s3142_s15 = scalar_lea.hbm %s5312_s4, 4096 }
  0x14   :  { %s37_s12 = sshll.u32 %s3195_s11, 4  ;;  %p3143_p8 = scmp.ne.s32.totalorder %s5312_s4, %s3142_s15  ;;  %s38_s12 = int_to_ptr.vmem [resolvable:$true] %s37_s12 }
  0x15   :  { %p3146_p9 = scmp.lt.u32.totalorder %s3142_s15, %s5312_s4 }
  0x17   :  { %p3148_p10 = pnand %p3146_p9, %p3143_p8 }
  0x19   :  { %3151 = shalt.err (!%p3148_p10)
}
  0x1a   :  { %s3152_s20 = scalar_lea.vmem %s38_s12, 4096  ;;  %p3157_p12 = scmp.lt.s32.totalorder %s38_s12, %s38_s12 }
  0x1b   :  { %p3153_p11 = scmp.ne.s32.totalorder %s38_s12, %s3152_s20  ;;  %p3158_p13 = scmp.lt.s32.totalorder %s3152_s20, %s3152_s20 }
  0x1d   :  { %p3159_p0 = por %p3158_p13, %p3157_p12 }
  0x1f   :  { %p3160_p1 = pnand %p3159_p0, %p3153_p11 }
  0x21   :  { %3163 = shalt.err (!%p3160_p1)
}
  0x22   :  { %s3196_s3 = smov 256   ;;  %s3197_s21 = smov 16  }
  0x23   :  { %43 = dma.hbm_to_vmem [thread:$0]  %s5312_s4, 4096, %s38_s12, [#allocation6], %s3196_s3, %s3196_s3, %s3197_s21  }
  0x24   :  { %3186 = dma.done.wait [#allocation3], 2048  }
  0x25   :  { %3187 = vsyncadd [#allocation3], 4294965248 }
  0x26   :  { %3188 = dma.done.wait [#allocation6], 4096  }
  0x27   :  { %3189 = vsyncadd [#allocation6], 4294963200  ;;  %vm95_vm0 = vcmask 130048   ;;  %v87_v0 = vld [vmem:[%s5310_s2] sm:$0xff]  ;;  %v88_v1 = vld [vmem:[%s5310_s2 + $0x8] sm:$0xff] }
  0x28   :  { %v52_v2 = vld [vmem:[%s5308_s0] sm:$0xff]  ;;  %v2641_v3 = vpack.c.bf16 %v88_v1, %v87_v0  ;;  %v53_v4 = vld [vmem:[%s5308_s0 + $0x8] sm:$0xff]  ;;  %v54_v5 = vld [vmem:[%s5308_s0 + $0x10] sm:$0xff] }
  0x29   :  { %2513 = vmatprep.mubr.msk.f32.mxu0 %vm95_vm0, %v52_v2  ;;  %v55_v6 = vld [vmem:[%s5308_s0 + $0x18] sm:$0xff]  ;;  %v56_v7 = vld [vmem:[%s5308_s0 + $0x20] sm:$0xff]  ;;  %v450_v9 = vld [vmem:[#allocation2 + $0x8] sm:$0xff] }
  0x2a   :  { %2642 = vmatprep.subr.bf16.mxu0 %v2641_v3  ;;  %v449_v8 = vld [vmem:[#allocation2] sm:$0xff]  ;;  %v57_v10 = vld [vmem:[%s5308_s0 + $0x28] sm:$0xff]  ;;  %v451_v12 = vld [vmem:[#allocation2 + $0x10] sm:$0xff] }
  0x2b   :  { %2644 = vmatpush3.bf16.msra.mxu0 %v2641_v3  ;;  %v2645_v11 = vpack.c.bf16 %v450_v9, %v449_v8  ;;  %v452_v13 = vld [vmem:[#allocation2 + $0x18] sm:$0xff]  ;;  %v58_v14 = vld [vmem:[%s5308_s0 + $0x30] sm:$0xff]  ;;  %v453_v16 = vld [vmem:[#allocation2 + $0x20] sm:$0xff] }
  0x2c   :  { %v2649_v15 = vpack.c.bf16 %v452_v13, %v451_v12  ;;  %v454_v17 = vld [vmem:[#allocation2 + $0x28] sm:$0xff]  ;;  %v59_v18 = vld [vmem:[%s5308_s0 + $0x38] sm:$0xff]  ;;  %v60_v20 = vld [vmem:[%s5308_s0 + $0x40] sm:$0xff] }
  0x2d   :  { %2646 = vmatprep.subr.bf16.mxu1 %v2645_v11  ;;  %v2653_v19 = vpack.c.bf16 %v454_v17, %v453_v16  ;;  %v455_v21 = vld [vmem:[#allocation2 + $0x30] sm:$0xff]  ;;  %v456_v22 = vld [vmem:[#allocation2 + $0x38] sm:$0xff]  ;;  %v61_v23 = vld [vmem:[%s5308_s0 + $0x48] sm:$0xff] }
  0x2e   :  { %2514 = vmatmul.mubr.msk.f32.vlgmr.msra.gmra.mrb[0].mxu0 %vm95_vm0, %v53_v4  ;;  %2648 = vmatpush3.bf16.msra.mxu1 %v2645_v11  ;;  %v2657_v24 = vpack.c.bf16 %v456_v22, %v455_v21  ;;  %v62_v25 = vld [vmem:[%s5308_s0 + $0x50] sm:$0xff]  ;;  %v63_v26 = vld [vmem:[%s5308_s0 + $0x58] sm:$0xff]  ;;  %v64_v27 = vld [vmem:[%s5308_s0 + $0x60] sm:$0xff] }
  0x2f   :  { %2516 = vmatprep.mubr.msk.f32.mxu0 %vm95_vm0, %v54_v5  ;;  %2650 = vmatprep.subr.bf16.mxu1 %v2649_v15  ;;  %v65_v28 = vld [vmem:[%s5308_s0 + $0x68] sm:$0xff]  ;;  %v66_v29 = vld [vmem:[%s5308_s0 + $0x70] sm:$0xff]  ;;  %v67_v30 = vld [vmem:[%s5308_s0 + $0x78] sm:$0xff] }
  0x30   :  { %v68_v31 = vld [vmem:[%s5308_s0 + $0x80] sm:$0xff]  ;;  %v69_v32 = vld [vmem:[%s5308_s0 + $0x88] sm:$0xff]  ;;  %v70_v33 = vld [vmem:[%s5308_s0 + $0x90] sm:$0xff] }
  0x31   :  { %v71_v34 = vld [vmem:[%s5308_s0 + $0x98] sm:$0xff]  ;;  %v72_v35 = vld [vmem:[%s5308_s0 + $0xa0] sm:$0xff]  ;;  %v73_v36 = vld [vmem:[%s5308_s0 + $0xa8] sm:$0xff] }
  0x32   :  { %2517 = vmatmul.mubr.msk.f32.gmra.mrb[2].mxu0 %vm95_vm0, %v55_v6  ;;  %2652 = vmatpush3.bf16.msra.mxu1 %v2649_v15  ;;  %v74_v37 = vld [vmem:[%s5308_s0 + $0xb0] sm:$0xff]  ;;  %v75_v38 = vld [vmem:[%s5308_s0 + $0xb8] sm:$0xff]  ;;  %v76_v39 = vld [vmem:[%s5308_s0 + $0xc0] sm:$0xff] }
  0x33   :  { %2519 = vmatprep.mubr.msk.f32.mxu0 %vm95_vm0, %v56_v7  ;;  %2654 = vmatprep.subr.bf16.mxu1 %v2653_v19  ;;  %v77_v40 = vld [vmem:[%s5308_s0 + $0xc8] sm:$0xff]  ;;  %v78_v41 = vld [vmem:[%s5308_s0 + $0xd0] sm:$0xff]  ;;  %v79_v42 = vld [vmem:[%s5308_s0 + $0xd8] sm:$0xff] }
  0x34   :  { %v80_v43 = vld [vmem:[%s5308_s0 + $0xe0] sm:$0xff]  ;;  %v81_v44 = vld [vmem:[%s5308_s0 + $0xe8] sm:$0xff]  ;;  %v82_v45 = vld [vmem:[%s5308_s0 + $0xf0] sm:$0xff] }
  0x35   :  { %v83_v46 = vld [vmem:[%s5308_s0 + $0xf8] sm:$0xff]  ;;  %v457_v47 = vld [vmem:[#allocation2 + $0x40] sm:$0xff]  ;;  %v458_v48 = vld [vmem:[#allocation2 + $0x48] sm:$0xff] }
  0x36   :  { %2520 = vmatmul.mubr.msk.f32.gmra.mrb[4].mxu0 %vm95_vm0, %v57_v10  ;;  %2656 = vmatpush3.bf16.msra.mxu1 %v2653_v19  ;;  %v2661_v49 = vpack.c.bf16 %v458_v48, %v457_v47  ;;  %v459_v50 = vld [vmem:[#allocation2 + $0x50] sm:$0xff]  ;;  %v460_v51 = vld [vmem:[#allocation2 + $0x58] sm:$0xff]  ;;  %v461_v53 = vld [vmem:[#allocation2 + $0x60] sm:$0xff] }
  0x37   :  { %2522 = vmatprep.mubr.msk.f32.mxu0 %vm95_vm0, %v58_v14  ;;  %2658 = vmatprep.subr.bf16.mxu1 %v2657_v24  ;;  %v2665_v52 = vpack.c.bf16 %v460_v51, %v459_v50  ;;  %v462_v54 = vld [vmem:[#allocation2 + $0x68] sm:$0xff]  ;;  %v463_v56 = vld [vmem:[#allocation2 + $0x70] sm:$0xff]  ;;  %v464_v57 = vld [vmem:[#allocation2 + $0x78] sm:$0xff] }
  0x38   :  { %v2669_v55 = vpack.c.bf16 %v462_v54, %v461_v53  ;;  %v2673_v58 = vpack.c.bf16 %v464_v57, %v463_v56  ;;  %v729_v59 = vld [vmem:[#allocation5 + $0x8] sm:$0xff]  ;;  %v731_v60 = vld [vmem:[#allocation5 + $0x18] sm:$0xff]  ;;  %v728_v61 = vld [vmem:[#allocation5] sm:$0xff] }
  0x39   :  { %v2677_v62 = vpack.c.bf16 %v731_v60, %v729_v59  ;;  %v730_v63 = vld [vmem:[#allocation5 + $0x10] sm:$0xff]  ;;  %v733_v0 = vld [vmem:[#allocation5 + $0x28] sm:$0xff]  ;;  %v735_v1 = vld [vmem:[#allocation5 + $0x38] sm:$0xff] }
  0x3a   :  { %2523 = vmatmul.mubr.msk.f32.gmra.mrb[6].mxu0 %vm95_vm0, %v59_v18  ;;  %2660 = vmatpush3.bf16.msra.mxu1 %v2657_v24  ;;  %v3396_v2 = vpack.c.bf16 %v730_v63, %v728_v61  ;;  %v3398_v3 = vpack.c.bf16 %v735_v1, %v733_v0  ;;  %v732_v4 = vld [vmem:[#allocation5 + $0x20] sm:$0xff]  ;;  %v734_v5 = vld [vmem:[#allocation5 + $0x30] sm:$0xff]  ;;  %v737_v6 = vld [vmem:[#allocation5 + $0x48] sm:$0xff] }
  0x3b   :  { %2525 = vmatprep.mubr.msk.f32.mxu0 %vm95_vm0, %v60_v20  ;;  %2662 = vmatprep.subr.bf16.mxu1 %v2661_v49  ;;  %v739_v7 = vld [vmem:[#allocation5 + $0x58] sm:$0xff]  ;;  %v3401_v8 = vpack.c.bf16 %v734_v5, %v732_v4  ;;  %v736_v10 = vld [vmem:[#allocation5 + $0x40] sm:$0xff]  ;;  %v738_v11 = vld [vmem:[#allocation5 + $0x50] sm:$0xff] }
  0x3c   :  { %2678 = vmatprep.subr.bf16.mxu0 %v2677_v62  ;;  %v3404_v9 = vpack.c.bf16 %v739_v7, %v737_v6  ;;  %v741_v12 = vld [vmem:[#allocation5 + $0x68] sm:$0xff]  ;;  %v743_v13 = vld [vmem:[#allocation5 + $0x78] sm:$0xff]  ;;  %v3407_v14 = vpack.c.bf16 %v738_v11, %v736_v10  ;;  %v740_v16 = vld [vmem:[#allocation5 + $0x60] sm:$0xff] }
  0x3d   :  { %2680 = vmatpush1.bf16.msra.mxu0 %v3396_v2  ;;  %v3410_v15 = vpack.c.bf16 %v743_v13, %v741_v12  ;;  %v742_v17 = vld [vmem:[#allocation5 + $0x70] sm:$0xff]  ;;  %v745_v18 = vld [vmem:[#allocation5 + $0x88] sm:$0xff]  ;;  %v747_v19 = vld [vmem:[#allocation5 + $0x98] sm:$0xff] }
  0x3e   :  { %2526 = vmatmul.mubr.msk.f32.gmra.mrb[8].mxu0 %vm95_vm0, %v61_v23  ;;  %2664 = vmatpush3.bf16.msra.mxu1 %v2661_v49  ;;  %v3413_v20 = vpack.c.bf16 %v742_v17, %v740_v16  ;;  %v3416_v21 = vpack.c.bf16 %v747_v19, %v745_v18  ;;  %v744_v22 = vld [vmem:[#allocation5 + $0x80] sm:$0xff]  ;;  %v746_v23 = vld [vmem:[#allocation5 + $0x90] sm:$0xff]  ;;  %v749_v24 = vld [vmem:[#allocation5 + $0xa8] sm:$0xff] }
  0x3f   :  { %2528 = vmatprep.mubr.msk.f32.mxu0 %vm95_vm0, %v62_v25  ;;  %2666 = vmatprep.subr.bf16.mxu1 %v2665_v52  ;;  %v751_v25 = vld [vmem:[#allocation5 + $0xb8] sm:$0xff] }
  0x40   :  { %2682 = vmatprep.subr.bf16.mxu0 %v3398_v3 }
  0x41   :  { %2684 = vmatpush1.bf16.msra.mxu0 %v3401_v8 }
  0x42   :  { %2529 = vmatmul.mubr.msk.f32.gmra.mrb[10].mxu0 %vm95_vm0, %v63_v26  ;;  %2668 = vmatpush3.bf16.msra.mxu1 %v2665_v52  ;;  %v3419_v26 = vpack.c.bf16 %v746_v23, %v744_v22 }
  0x43   :  { %2531 = vmatprep.mubr.msk.f32.mxu0 %vm95_vm0, %v64_v27  ;;  %2670 = vmatprep.subr.bf16.mxu1 %v2669_v55  ;;  %v3422_v27 = vpack.c.bf16 %v751_v25, %v749_v24 }
  0x44   :  { %2686 = vmatprep.subr.bf16.mxu0 %v3404_v9 }
  0x45   :  { %2688 = vmatpush1.bf16.msra.mxu0 %v3407_v14 }
  0x46   :  { %2532 = vmatmul.mubr.msk.f32.gmra.mrb[12].mxu0 %vm95_vm0, %v65_v28  ;;  %2672 = vmatpush3.bf16.msra.mxu1 %v2669_v55  ;;  %v748_v28 = vld [vmem:[#allocation5 + $0xa0] sm:$0xff] }
  0x47   :  { %2534 = vmatprep.mubr.msk.f32.mxu0 %vm95_vm0, %v66_v29  ;;  %2674 = vmatprep.subr.bf16.mxu1 %v2673_v58  ;;  %v750_v29 = vld [vmem:[#allocation5 + $0xb0] sm:$0xff] }
  0x48   :  { %2690 = vmatprep.subr.bf16.mxu0 %v3410_v15 }
  0x49   :  { %2692 = vmatpush1.bf16.msra.mxu0 %v3413_v20 }
  0x4a   :  { %2535 = vmatmul.mubr.msk.f32.gmra.mrb[14].mxu0 %vm95_vm0, %v67_v30  ;;  %2676 = vmatpush3.bf16.msra.mxu1 %v2673_v58  ;;  %v753_v30 = vld [vmem:[#allocation5 + $0xc8] sm:$0xff] }
  0x4b   :  { %2537 = vmatprep.mubr.msk.f32.mxu0 %vm95_vm0, %v68_v31  ;;  %2709 = vmatprep.subr.bf16.mxu1 %v2677_v62  ;;  %v755_v31 = vld [vmem:[#allocation5 + $0xd8] sm:$0xff] }
  0x4c   :  { %2694 = vmatprep.subr.bf16.mxu0 %v3416_v21 }
  0x4d   :  { %2696 = vmatpush1.bf16.msra.mxu0 %v3419_v26 }
  0x4e   :  { %2538 = vmatmul.mubr.msk.f32.gmra.mrb[16].mxu0 %vm95_vm0, %v69_v32  ;;  %v3425_v32 = vpack.c.bf16 %v750_v29, %v748_v28  ;;  %2698 = vmatprep.subr.bf16.mxu0 %v3422_v27 }
  0x4f   :  { %2540 = vmatprep.mubr.msk.f32.mxu0 %vm95_vm0, %v70_v33  ;;  %v3428_v33 = vpack.c.bf16 %v755_v31, %v753_v30 }
  0x51   :  { %2700 = vmatpush1.bf16.msra.mxu0 %v3425_v32 }
  0x52   :  { %2541 = vmatmul.mubr.msk.f32.gmra.mrb[18].mxu0 %vm95_vm0, %v71_v34  ;;  %v752_v34 = vld [vmem:[#allocation5 + $0xc0] sm:$0xff]  ;;  %2702 = vmatprep.subr.bf16.mxu0 %v3428_v33 }
  0x53   :  { %2543 = vmatprep.mubr.msk.f32.mxu0 %vm95_vm0, %v72_v35  ;;  %v754_v35 = vld [vmem:[#allocation5 + $0xd0] sm:$0xff] }
  0x56   :  { %2544 = vmatmul.mubr.msk.f32.gmra.mrb[20].mxu0 %vm95_vm0, %v73_v36  ;;  %v3431_v36 = vpack.c.bf16 %v754_v35, %v752_v34 }
  0x57   :  { %2546 = vmatprep.mubr.msk.f32.mxu0 %vm95_vm0, %v74_v37  ;;  %v3438_v37 = vld [vmem:[%s5313_s5] ss:$0 sm:$0xff] }
  0x58   :  { %2704 = vmatpush1.bf16.msra.mxu0 %v3431_v36 }
  0x5a   :  { %2547 = vmatmul.mubr.msk.f32.gmra.mrb[22].mxu0 %vm95_vm0, %v75_v38 }
  0x5b   :  { %2549 = vmatprep.mubr.msk.f32.mxu0 %vm95_vm0, %v76_v39 }
  0x5e   :  { %2550 = vmatmul.mubr.msk.f32.gmra.mrb[24].mxu0 %vm95_vm0, %v77_v40 }
  0x5f   :  { %2552 = vmatprep.mubr.msk.f32.mxu0 %vm95_vm0, %v78_v41 }
  0x62   :  { %2553 = vmatmul.mubr.msk.f32.gmra.mrb[26].mxu0 %vm95_vm0, %v79_v42 }
  0x63   :  { %2555 = vmatprep.mubr.msk.f32.mxu0 %vm95_vm0, %v80_v43 }
  0x66   :  { %2556 = vmatmul.mubr.msk.f32.gmra.mrb[28].mxu0 %vm95_vm0, %v81_v44 }
  0x67   :  { %2558 = vmatprep.mubr.msk.f32.mxu0 %vm95_vm0, %v82_v45 }
  0x6a   :  { %2559 = vmatmul.mubr.msk.f32.gmra.mrb[30].mxu0 %vm95_vm0, %v83_v46 }
 0x101   :  { %v2515_v38 = vpop.f32.mrb[0].mxu0 }
 0x102   :  { %v264_v39 = vadd.f32 %v2515_v38, %v3438_v37  ;;  %v258_v40 = vpop.f32.mrb[1].mxu0 }
 0x103   :  { %v259_v41 = vadd.f32 %v3438_v37, %v258_v40 }
 0x105   :  { %2733 = vtanh.f32 %v259_v41  ;;  %v2518_v42 = vpop.f32.mrb[2].mxu0 }
 0x106   :  { %2735 = vtanh.f32 %v264_v39  ;;  %v274_v43 = vadd.f32 %v2518_v42, %v3438_v37  ;;  %v268_v44 = vpop.f32.mrb[3].mxu0 }
 0x107   :  { %v269_v45 = vadd.f32 %v3438_v37, %v268_v44 }
 0x109   :  { %2737 = vtanh.f32 %v269_v45  ;;  %v2521_v46 = vpop.f32.mrb[4].mxu0 }
 0x10a   :  { %2739 = vtanh.f32 %v274_v43  ;;  %v284_v47 = vadd.f32 %v2521_v46, %v3438_v37  ;;  %v278_v48 = vpop.f32.mrb[5].mxu0 }
 0x10b   :  { %v279_v49 = vadd.f32 %v3438_v37, %v278_v48 }
 0x10d   :  { %2741 = vtanh.f32 %v279_v49  ;;  %v2524_v50 = vpop.f32.mrb[6].mxu0 }
 0x10e   :  { %2743 = vtanh.f32 %v284_v47  ;;  %v294_v51 = vadd.f32 %v2524_v50, %v3438_v37  ;;  %v288_v52 = vpop.f32.mrb[7].mxu0 }
 0x10f   :  { %v2734_v53 = vpop.eup %2733  ;;  %v289_v54 = vadd.f32 %v3438_v37, %v288_v52 }
 0x110   :  { %v2736_v55 = vpop.eup %2735  ;;  %2593 = vmatprep.mubr.f32.mxu1 %v2734_v53 }
 0x111   :  { %2745 = vtanh.f32 %v289_v54  ;;  %v2527_v56 = vpop.f32.mrb[8].mxu0  ;;  %2594 = vmatmul.mubr.f32.vlgmr.msra.gmra.mrb[0].mxu1 %v2736_v55 }
 0x112   :  { %2747 = vtanh.f32 %v294_v51  ;;  %v304_v57 = vadd.f32 %v2527_v56, %v3438_v37  ;;  %v298_v58 = vpop.f32.mrb[9].mxu0  ;;  %2717 = vmatpush1.bf16.msra.mxu1 %v3396_v2 }
 0x113   :  { %v2738_v59 = vpop.eup %2737  ;;  %v299_v60 = vadd.f32 %v3438_v37, %v298_v58  ;;  %2710 = vmatprep.subr.bf16.mxu1 %v3398_v3 }
 0x114   :  { %v2740_v61 = vpop.eup %2739  ;;  %2596 = vmatprep.mubr.f32.mxu1 %v2738_v59 }
 0x115   :  { %2749 = vtanh.f32 %v299_v60  ;;  %v2530_v62 = vpop.f32.mrb[10].mxu0  ;;  %2597 = vmatmul.mubr.f32.gmra.mrb[2].mxu1 %v2740_v61 }
 0x116   :  { %2751 = vtanh.f32 %v304_v57  ;;  %v314_v63 = vadd.f32 %v2530_v62, %v3438_v37  ;;  %v308_v0 = vpop.f32.mrb[11].mxu0  ;;  %2718 = vmatpush1.bf16.msra.mxu1 %v3401_v8 }
 0x117   :  { %v2742_v1 = vpop.eup %2741  ;;  %v309_v4 = vadd.f32 %v3438_v37, %v308_v0  ;;  %2711 = vmatprep.subr.bf16.mxu1 %v3404_v9 }
 0x118   :  { %v2744_v2 = vpop.eup %2743  ;;  %2599 = vmatprep.mubr.f32.mxu1 %v2742_v1 }
 0x119   :  { %2753 = vtanh.f32 %v309_v4  ;;  %v2533_v3 = vpop.f32.mrb[12].mxu0  ;;  %2600 = vmatmul.mubr.f32.gmra.mrb[4].mxu1 %v2744_v2 }
 0x11a   :  { %2755 = vtanh.f32 %v314_v63  ;;  %v324_v5 = vadd.f32 %v2533_v3, %v3438_v37  ;;  %v318_v6 = vpop.f32.mrb[13].mxu0  ;;  %2719 = vmatpush1.bf16.msra.mxu1 %v3407_v14 }
 0x11b   :  { %v2746_v7 = vpop.eup %2745  ;;  %v319_v10 = vadd.f32 %v3438_v37, %v318_v6  ;;  %2712 = vmatprep.subr.bf16.mxu1 %v3410_v15 }
 0x11c   :  { %v2748_v8 = vpop.eup %2747  ;;  %2602 = vmatprep.mubr.f32.mxu1 %v2746_v7  ;;  %v757_v7 = vld [vmem:[#allocation5 + $0xe8] sm:$0xff] }
 0x11d   :  { %2757 = vtanh.f32 %v319_v10  ;;  %v2536_v9 = vpop.f32.mrb[14].mxu0  ;;  %2603 = vmatmul.mubr.f32.gmra.mrb[6].mxu1 %v2748_v8  ;;  %v759_v10 = vld [vmem:[#allocation5 + $0xf8] sm:$0xff]  ;;  %v756_v8 = vld [vmem:[#allocation5 + $0xe0] sm:$0xff] }
 0x11e   :  { %2759 = vtanh.f32 %v324_v5  ;;  %v334_v11 = vadd.f32 %v2536_v9, %v3438_v37  ;;  %v328_v12 = vpop.f32.mrb[15].mxu0  ;;  %2720 = vmatpush1.bf16.msra.mxu1 %v3413_v20  ;;  %v758_v9 = vld [vmem:[#allocation5 + $0xf0] sm:$0xff] }
 0x11f   :  { %v2750_v13 = vpop.eup %2749  ;;  %v329_v16 = vadd.f32 %v3438_v37, %v328_v12  ;;  %2713 = vmatprep.subr.bf16.mxu1 %v3416_v21  ;;  %v3198_v12 = vmov 0.0  }
 0x120   :  { %v2752_v14 = vpop.eup %2751  ;;  %2605 = vmatprep.mubr.f32.mxu1 %v2750_v13  ;;  %835 = vmatprep.mubr.f32.mxu0 %v3198_v12  ;;  %v3490_v13 = vld [vmem:[%s5313_s5 + $0x1] ss:$0 sm:$0xff] }
 0x121   :  { %2761 = vtanh.f32 %v329_v16  ;;  %v2539_v15 = vpop.f32.mrb[16].mxu0  ;;  %2606 = vmatmul.mubr.f32.gmra.mrb[8].mxu1 %v2752_v14 }
 0x122   :  { %2763 = vtanh.f32 %v334_v11  ;;  %v344_v17 = vadd.f32 %v2539_v15, %v3438_v37  ;;  %v338_v18 = vpop.f32.mrb[17].mxu0  ;;  %2721 = vmatpush1.bf16.msra.mxu1 %v3419_v26  ;;  %v2707_v11 = vpack.c.bf16 %v758_v9, %v756_v8 }
 0x123   :  { %v2754_v19 = vpop.eup %2753  ;;  %v339_v22 = vadd.f32 %v3438_v37, %v338_v18  ;;  %2714 = vmatprep.subr.bf16.mxu1 %v3422_v27 }
 0x124   :  { %v2756_v20 = vpop.eup %2755  ;;  %2608 = vmatprep.mubr.f32.mxu1 %v2754_v19 }
 0x125   :  { %2765 = vtanh.f32 %v339_v22  ;;  %v2542_v21 = vpop.f32.mrb[18].mxu0  ;;  %2609 = vmatmul.mubr.f32.gmra.mrb[10].mxu1 %v2756_v20 }
 0x126   :  { %2767 = vtanh.f32 %v344_v17  ;;  %v354_v23 = vadd.f32 %v2542_v21, %v3438_v37  ;;  %v348_v24 = vpop.f32.mrb[19].mxu0  ;;  %2722 = vmatpush1.bf16.msra.mxu1 %v3425_v32 }
 0x127   :  { %v2758_v25 = vpop.eup %2757  ;;  %v349_v28 = vadd.f32 %v3438_v37, %v348_v24  ;;  %2715 = vmatprep.subr.bf16.mxu1 %v3428_v33 }
 0x128   :  { %v2760_v26 = vpop.eup %2759  ;;  %2611 = vmatprep.mubr.f32.mxu1 %v2758_v25 }
 0x129   :  { %2769 = vtanh.f32 %v349_v28  ;;  %v2545_v27 = vpop.f32.mrb[20].mxu0  ;;  %2612 = vmatmul.mubr.f32.gmra.mrb[12].mxu1 %v2760_v26 }
 0x12a   :  { %2771 = vtanh.f32 %v354_v23  ;;  %v364_v29 = vadd.f32 %v2545_v27, %v3438_v37  ;;  %v358_v30 = vpop.f32.mrb[21].mxu0  ;;  %2723 = vmatpush1.bf16.msra.mxu1 %v3431_v36 }
 0x12b   :  { %v2762_v31 = vpop.eup %2761  ;;  %v359_v34 = vadd.f32 %v3438_v37, %v358_v30 }
 0x12c   :  { %v2764_v32 = vpop.eup %2763  ;;  %2614 = vmatprep.mubr.f32.mxu1 %v2762_v31 }
 0x12d   :  { %2773 = vtanh.f32 %v359_v34  ;;  %2615 = vmatmul.mubr.f32.gmra.mrb[14].mxu1 %v2764_v32  ;;  %v2548_v35 = vpop.f32.mrb[22].mxu0 }
 0x12e   :  { %2775 = vtanh.f32 %v364_v29  ;;  %v374_v33 = vadd.f32 %v2548_v35, %v3438_v37  ;;  %v368_v38 = vpop.f32.mrb[23].mxu0 }
 0x12f   :  { %v2766_v39 = vpop.eup %2765  ;;  %v369_v40 = vadd.f32 %v3438_v37, %v368_v38 }
 0x130   :  { %v2768_v41 = vpop.eup %2767  ;;  %2777 = vtanh.f32 %v374_v33  ;;  %2617 = vmatprep.mubr.f32.mxu1 %v2766_v39 }
 0x131   :  { %2779 = vtanh.f32 %v369_v40  ;;  %2618 = vmatmul.mubr.f32.gmra.mrb[16].mxu1 %v2768_v41  ;;  %v2551_v36 = vpop.f32.mrb[24].mxu0 }
 0x132   :  { %v384_v42 = vadd.f32 %v2551_v36, %v3438_v37  ;;  %v378_v43 = vpop.f32.mrb[25].mxu0 }
 0x133   :  { %v2770_v44 = vpop.eup %2769  ;;  %v379_v45 = vadd.f32 %v3438_v37, %v378_v43 }
 0x134   :  { %v2772_v46 = vpop.eup %2771  ;;  %2620 = vmatprep.mubr.f32.mxu1 %v2770_v44  ;;  %2781 = vtanh.f32 %v384_v42 }
 0x135   :  { %2621 = vmatmul.mubr.f32.gmra.mrb[18].mxu1 %v2772_v46  ;;  %2783 = vtanh.f32 %v379_v45  ;;  %v2554_v47 = vpop.f32.mrb[26].mxu0 }
 0x136   :  { %v394_v48 = vadd.f32 %v2554_v47, %v3438_v37  ;;  %v388_v49 = vpop.f32.mrb[27].mxu0 }
 0x137   :  { %v2774_v50 = vpop.eup %2773  ;;  %v389_v51 = vadd.f32 %v3438_v37, %v388_v49 }
 0x138   :  { %v2776_v52 = vpop.eup %2775  ;;  %2623 = vmatprep.mubr.f32.mxu1 %v2774_v50  ;;  %2785 = vtanh.f32 %v394_v48 }
 0x139   :  { %2624 = vmatmul.mubr.f32.gmra.mrb[20].mxu1 %v2776_v52  ;;  %2787 = vtanh.f32 %v389_v51  ;;  %v2557_v53 = vpop.f32.mrb[28].mxu0 }
 0x13a   :  { %v2778_v54 = vpop.eup %2777  ;;  %v404_v55 = vadd.f32 %v2557_v53, %v3438_v37  ;;  %v398_v56 = vpop.f32.mrb[29].mxu0 }
 0x13b   :  { %v2780_v57 = vpop.eup %2779  ;;  %v399_v58 = vadd.f32 %v3438_v37, %v398_v56 }
 0x13c   :  { %2626 = vmatprep.mubr.f32.mxu1 %v2780_v57  ;;  %2789 = vtanh.f32 %v404_v55 }
 0x13d   :  { %2627 = vmatmul.mubr.f32.gmra.mrb[22].mxu1 %v2778_v54  ;;  %2791 = vtanh.f32 %v399_v58  ;;  %v2560_v59 = vpop.f32.mrb[30].mxu0 }
 0x13e   :  { %v2782_v60 = vpop.eup %2781  ;;  %v414_v61 = vadd.f32 %v2560_v59, %v3438_v37  ;;  %v408_v62 = vpop.f32.mrb[31].mxu0 }
 0x13f   :  { %v2784_v63 = vpop.eup %2783  ;;  %v409_v0 = vadd.f32 %v3438_v37, %v408_v62  ;;  %v2705_v37 = vpack.c.bf16 %v759_v10, %v757_v7 }
 0x140   :  { %2629 = vmatprep.mubr.f32.mxu1 %v2784_v63  ;;  %2793 = vtanh.f32 %v414_v61 }
 0x141   :  { %2630 = vmatmul.mubr.f32.gmra.mrb[24].mxu1 %v2782_v60  ;;  %2795 = vtanh.f32 %v409_v0  ;;  %2706 = vmatprep.subr.bf16.mxu0 %v2705_v37 }
 0x142   :  { %v2786_v1 = vpop.eup %2785  ;;  %2716 = vmatprep.subr.bf16.mxu1 %v2705_v37  ;;  %2708 = vmatpush1.bf16.msra.mxu0 %v2707_v11 }
 0x143   :  { %v2788_v4 = vpop.eup %2787  ;;  %2724 = vmatpush1.bf16.msra.mxu1 %v2707_v11 }
 0x144   :  { %2632 = vmatprep.mubr.f32.mxu1 %v2788_v4 }
 0x145   :  { %2633 = vmatmul.mubr.f32.gmra.mrb[26].mxu1 %v2786_v1 }
 0x146   :  { %v2790_v2 = vpop.eup %2789 }
 0x147   :  { %v2792_v3 = vpop.eup %2791 }
 0x148   :  { %2635 = vmatprep.mubr.f32.mxu1 %v2792_v3 }
 0x149   :  { %2636 = vmatmul.mubr.f32.gmra.mrb[28].mxu1 %v2790_v2 }
 0x14a   :  { %v2794_v5 = vpop.eup %2793 }
 0x14b   :  { %v2796_v6 = vpop.eup %2795 }
 0x14c   :  { %2638 = vmatprep.mubr.f32.mxu1 %v2796_v6 }
 0x14d   :  { %2639 = vmatmul.mubr.f32.gmra.mrb[30].mxu1 %v2794_v5 }
 0x14e   :  { %955 = vmatprep.mubr.f32.mxu1 %v3198_v12 }
 0x1e4   :  { %v2595_v16 = vpop.f32.mrb[0].mxu1 }
 0x1e5   :  { %v537_v14 = vpop.f32.mrb[1].mxu1  ;;  %v543_v17 = vadd.f32 %v2595_v16, %v3490_v13 }
 0x1e6   :  { %v538_v15 = vadd.f32 %v3490_v13, %v537_v14 }
 0x1e8   :  { %2797 = vtanh.f32 %v538_v15  ;;  %v2598_v18 = vpop.f32.mrb[2].mxu1 }
 0x1e9   :  { %v547_v19 = vpop.f32.mrb[3].mxu1  ;;  %2799 = vtanh.f32 %v543_v17  ;;  %v553_v23 = vadd.f32 %v2598_v18, %v3490_v13 }
 0x1ea   :  { %v548_v22 = vadd.f32 %v3490_v13, %v547_v19 }
 0x1ec   :  { %v2601_v20 = vpop.f32.mrb[4].mxu1  ;;  %2801 = vtanh.f32 %v548_v22 }
 0x1ed   :  { %v557_v21 = vpop.f32.mrb[5].mxu1  ;;  %2803 = vtanh.f32 %v553_v23  ;;  %v563_v31 = vadd.f32 %v2601_v20, %v3490_v13 }
 0x1ee   :  { %v558_v26 = vadd.f32 %v3490_v13, %v557_v21 }
 0x1f0   :  { %v2604_v24 = vpop.f32.mrb[6].mxu1  ;;  %2805 = vtanh.f32 %v558_v26 }
 0x1f1   :  { %v567_v25 = vpop.f32.mrb[7].mxu1  ;;  %2807 = vtanh.f32 %v563_v31  ;;  %v573_v41 = vadd.f32 %v2604_v24, %v3490_v13 }
 0x1f2   :  { %v2798_v28 = vpop.eup %2797  ;;  %v568_v33 = vadd.f32 %v3490_v13, %v567_v25 }
 0x1f3   :  { %836 = vmatmul.mubr.f32.vlgmr.msra.gmra.mrb[32].mxu0 %v2798_v28  ;;  %v2800_v30 = vpop.eup %2799 }
 0x1f4   :  { %v2607_v27 = vpop.f32.mrb[8].mxu1  ;;  %841 = vmatprep.mubr.f32.mxu0 %v3198_v12  ;;  %2809 = vtanh.f32 %v568_v33 }
 0x1f5   :  { %v577_v29 = vpop.f32.mrb[9].mxu1  ;;  %2811 = vtanh.f32 %v573_v41  ;;  %v583_v50 = vadd.f32 %v2607_v27, %v3490_v13 }
 0x1f6   :  { %v2802_v35 = vpop.eup %2801  ;;  %v578_v44 = vadd.f32 %v3490_v13, %v577_v29 }
 0x1f7   :  { %842 = vmatmul.mubr.f32.gmra.mrb[34].mxu0 %v2800_v30  ;;  %v2804_v40 = vpop.eup %2803 }
 0x1f8   :  { %v2610_v34 = vpop.f32.mrb[10].mxu1  ;;  %847 = vmatprep.mubr.f32.mxu0 %v3198_v12  ;;  %2813 = vtanh.f32 %v578_v44 }
 0x1f9   :  { %v587_v32 = vpop.f32.mrb[11].mxu1  ;;  %2815 = vtanh.f32 %v583_v50  ;;  %v593_v61 = vadd.f32 %v2610_v34, %v3490_v13 }
 0x1fa   :  { %v2806_v43 = vpop.eup %2805  ;;  %v588_v56 = vadd.f32 %v3490_v13, %v587_v32 }
 0x1fb   :  { %848 = vmatmul.mubr.f32.gmra.mrb[36].mxu0 %v2802_v35  ;;  %v2808_v48 = vpop.eup %2807 }
 0x1fc   :  { %v2613_v38 = vpop.f32.mrb[12].mxu1  ;;  %853 = vmatprep.mubr.f32.mxu0 %v3198_v12  ;;  %2817 = vtanh.f32 %v588_v56 }
 0x1fd   :  { %v597_v39 = vpop.f32.mrb[13].mxu1  ;;  %v603_v7 = vadd.f32 %v2613_v38, %v3490_v13 }
 0x1fe   :  { %v2810_v54 = vpop.eup %2809  ;;  %v598_v4 = vadd.f32 %v3490_v13, %v597_v39 }
 0x1ff   :  { %854 = vmatmul.mubr.f32.gmra.mrb[38].mxu0 %v2804_v40  ;;  %v2812_v59 = vpop.eup %2811 }
 0x200   :  { %v3503_v36 = vpop.f32.mrb[14].mxu1  ;;  %859 = vmatprep.mubr.f32.mxu0 %v3198_v12 }
 0x201   :  { %v607_v42 = vpop.f32.mrb[15].mxu1  ;;  %v613_v24 = vadd.f32 %v3503_v36, %v3490_v13 }
 0x202   :  { %v2814_v1 = vpop.eup %2813  ;;  %v608_v15 = vadd.f32 %v3490_v13, %v607_v42 }
 0x203   :  { %860 = vmatmul.mubr.f32.gmra.mrb[40].mxu0 %v2806_v43  ;;  %v2816_v6 = vpop.eup %2815 }
 0x204   :  { %v2619_v45 = vpop.f32.mrb[16].mxu1  ;;  %865 = vmatprep.mubr.f32.mxu0 %v3198_v12 }
 0x205   :  { %v3509_v46 = vadd.f32 %v2619_v45, %v3490_v13  ;;  %v617_v47 = vpop.f32.mrb[17].mxu1 }
 0x206   :  { %v3512_v49 = vadd.f32 %v3490_v13, %v617_v47  ;;  %v2818_v37 = vpop.eup %2817 }
 0x207   :  { %866 = vmatmul.mubr.f32.gmra.mrb[42].mxu0 %v2808_v48  ;;  %v5315_v48 = vlaneseq }
 0x208   :  { %v2622_v51 = vpop.f32.mrb[18].mxu1  ;;  %871 = vmatprep.mubr.f32.mxu0 %v3198_v12 }
 0x209   :  { %v3517_v52 = vadd.f32 %v2622_v51, %v3490_v13  ;;  %v627_v53 = vpop.f32.mrb[19].mxu1  ;;  %v86_v51 = vld [vmem:[%s5313_s5 + $0x2] sm:$0x3] }
 0x20a   :  { %v3520_v55 = vadd.f32 %v3490_v13, %v627_v53 }
 0x20b   :  { %872 = vmatmul.mubr.f32.gmra.mrb[44].mxu0 %v2810_v54 }
 0x20c   :  { %v2625_v57 = vpop.f32.mrb[20].mxu1  ;;  %877 = vmatprep.mubr.f32.mxu0 %v3198_v12 }
 0x20d   :  { %v637_v58 = vpop.f32.mrb[21].mxu1  ;;  %v643_v62 = vadd.f32 %v2625_v57, %v3490_v13 }
 0x20e   :  { %v638_v60 = vadd.f32 %v3490_v13, %v637_v58 }
 0x20f   :  { %878 = vmatmul.mubr.f32.gmra.mrb[46].mxu0 %v2812_v59 }
 0x210   :  { %2819 = vtanh.f32 %v638_v60  ;;  %v2628_v63 = vpop.f32.mrb[22].mxu1  ;;  %883 = vmatprep.mubr.f32.mxu0 %v3198_v12  ;;  %v3586_v60 = vld [vmem:[%s5309_s1 + $0x8] sm:$0xff] }
 0x211   :  { %v647_v0 = vpop.f32.mrb[23].mxu1  ;;  %2821 = vtanh.f32 %v593_v61  ;;  %v653_v10 = vadd.f32 %v2628_v63, %v3490_v13  ;;  %v3591_v61 = vld [vmem:[%s5309_s1] sm:$0xff] }
 0x212   :  { %2823 = vtanh.f32 %v643_v62  ;;  %v648_v2 = vadd.f32 %v3490_v13, %v647_v0 }
 0x213   :  { %884 = vmatmul.mubr.f32.gmra.mrb[48].mxu0 %v2814_v1  ;;  %2825 = vtanh.f32 %v598_v4  ;;  %v3599_v1 = vld [vmem:[%s5309_s1 + $0x18] sm:$0xff]  ;;  %v3604_v4 = vld [vmem:[%s5309_s1 + $0x20] sm:$0xff] }
 0x214   :  { %889 = vmatprep.mubr.f32.mxu0 %v3198_v12  ;;  %v2631_v3 = vpop.f32.mrb[24].mxu1  ;;  %2827 = vtanh.f32 %v648_v2 }
 0x215   :  { %v657_v5 = vpop.f32.mrb[25].mxu1  ;;  %2829 = vtanh.f32 %v603_v7  ;;  %v663_v25 = vadd.f32 %v2631_v3, %v3490_v13 }
 0x216   :  { %2831 = vtanh.f32 %v653_v10  ;;  %v658_v17 = vadd.f32 %v3490_v13, %v657_v5  ;;  %v3613_v10 = vld [vmem:[%s5309_s1 + $0x28] sm:$0xff] }
 0x217   :  { %890 = vmatmul.mubr.f32.gmra.mrb[50].mxu0 %v2816_v6  ;;  %2833 = vtanh.f32 %v608_v15  ;;  %v1253_v6 = vmul.f32 -0.5, %v3586_v60 }
 0x218   :  { %895 = vmatprep.mubr.f32.mxu0 %v3198_v12  ;;  %v2634_v8 = vpop.f32.mrb[26].mxu1  ;;  %2835 = vtanh.f32 %v658_v17  ;;  %v3629_v17 = vld [vmem:[%s5309_s1 + $0x38] sm:$0xff] }
 0x219   :  { %v673_v9 = vadd.f32 %v2634_v8, %v3490_v13  ;;  %v667_v11 = vpop.f32.mrb[27].mxu1  ;;  %2837 = vtanh.f32 %v613_v24  ;;  %v1255_v8 = vmul.f32 -0.5, %v3599_v1  ;;  %5393 = vst [vmem:[#allocation11_spill] sm:$0xff] %v3629_v17 }
 0x21a   :  { %v2820_v16 = vpop.eup %2819  ;;  %v668_v14 = vadd.f32 %v3490_v13, %v667_v11  ;;  %2839 = vtanh.f32 %v663_v25  ;;  %v1252_v11 = vmul.f32 -0.5, %v3591_v61  ;;  %v3648_v25 = vld [vmem:[%s5309_s1 + $0x48] sm:$0xff] }
 0x21b   :  { %896 = vmatmul.mubr.f32.gmra.mrb[52].mxu0 %v2818_v37  ;;  %956 = vmatmul.mubr.f32.vlgmr.msra.gmra.mrb[32].mxu1 %v2820_v16  ;;  %v2822_v19 = vpop.eup %2821  ;;  %2841 = vtanh.f32 %v3512_v49  ;;  %v762_v49 = vshrl.u32 %v5315_v48, 7  ;;  %v1256_v37 = vmul.f32 -0.5, %v3604_v4  ;;  %5395 = vst [vmem:[#allocation13_spill] sm:$0xff] %v3648_v25 }
 0x21c   :  { %901 = vmatprep.mubr.f32.mxu0 %v3198_v12  ;;  %961 = vmatprep.mubr.f32.mxu1 %v3198_v12  ;;  %v2637_v18 = vpop.f32.mrb[28].mxu1  ;;  %v2824_v21 = vpop.eup %2823  ;;  %2843 = vtanh.f32 %v668_v14 }
 0x21d   :  { %v683_v22 = vadd.f32 %v2637_v18, %v3490_v13  ;;  %v677_v20 = vpop.f32.mrb[29].mxu1  ;;  %v2826_v26 = vpop.eup %2825  ;;  %2845 = vtanh.f32 %v3509_v46  ;;  %v767_v50 = vsub.s32 1, %v762_v49  ;;  %v763_v2 = vsub.s32 0, %v762_v49  ;;  %v3634_v18 = vld [vmem:[%s5309_s1 + $0x40] sm:$0xff] }
 0x21e   :  { %v678_v23 = vadd.f32 %v3490_v13, %v677_v20  ;;  %v2828_v30 = vpop.eup %2827  ;;  %2847 = vtanh.f32 %v673_v9  ;;  %v3620_v9 = vld [vmem:[%s5309_s1 + $0x30] sm:$0xff]  ;;  %5394 = vst [vmem:[#allocation12_spill] sm:$0xff] %v3634_v18  ;;  %v1257_v20 = vmul.f32 -0.5, %v3613_v10 }
 0x21f   :  { %902 = vmatmul.mubr.f32.gmra.mrb[54].mxu0 %v2822_v19  ;;  %962 = vmatmul.mubr.f32.gmra.mrb[34].mxu1 %v2824_v21  ;;  %v2830_v34 = vpop.eup %2829  ;;  %2849 = vtanh.f32 %v3520_v55  ;;  %v3636_v19 = vrot.slane %v86_v51, %v763_v2  ;;  %v3640_v21 = vmul.f32 %v1253_v6, %v3586_v60  ;;  %v3728_v6 = vld [vmem:[%s5309_s1 + $0x68] sm:$0xff] }
 0x220   :  { %907 = vmatprep.mubr.f32.mxu0 %v3198_v12  ;;  %967 = vmatprep.mubr.f32.mxu1 %v3198_v12  ;;  %v2640_v28 = vpop.f32.mrb[30].mxu1  ;;  %v2832_v32 = vpop.eup %2831  ;;  %2851 = vtanh.f32 %v678_v23  ;;  %5404 = vst [vmem:[#allocation22_spill] sm:$0xff] %v3728_v6 }
 0x221   :  { %v693_v27 = vadd.f32 %v2640_v28, %v3490_v13  ;;  %v687_v29 = vpop.f32.mrb[31].mxu1  ;;  %2853 = vtanh.f32 %v3517_v52  ;;  %v3573_v52 = vrot.slane %v86_v51, %v767_v50  ;;  %v3653_v28 = vld [vmem:[%s5309_s1 + $0x50] sm:$0xff] }
 0x222   :  { %v688_v31 = vadd.f32 %v3490_v13, %v687_v29  ;;  %v2834_v13 = vpop.eup %2833  ;;  %2855 = vtanh.f32 %v683_v22  ;;  %5396 = vst [vmem:[#allocation14_spill] sm:$0xff] %v3653_v28  ;;  %v1259_v29 = vmul.f32 -0.5, %v3629_v17 }
 0x223   :  { %908 = vmatmul.mubr.f32.gmra.mrb[56].mxu0 %v2826_v26  ;;  %968 = vmatmul.mubr.f32.gmra.mrb[36].mxu1 %v2828_v30  ;;  %v2836_v35 = vpop.eup %2835  ;;  %v3658_v26 = vld [vmem:[%s5309_s1 + $0xa0] sm:$0xff]  ;;  %v1260_v30 = vmul.f32 -0.5, %v3634_v18 }
 0x224   :  { %913 = vmatprep.mubr.f32.mxu0 %v3198_v12  ;;  %973 = vmatprep.mubr.f32.mxu1 %v3198_v12  ;;  %v2838_v33 = vpop.eup %2837  ;;  %2857 = vtanh.f32 %v688_v31  ;;  %5397 = vst [vmem:[#allocation15_spill] sm:$0xff] %v3658_v26  ;;  %v3664_v31 = vmul.f32 %v1252_v11, %v3591_v61  ;;  %v3709_v51 = vmul.f32 %v1259_v29, %v3629_v17 }
 0x225   :  { %v2840_v38 = vpop.eup %2839  ;;  %2859 = vtanh.f32 %v693_v27  ;;  %v1258_v27 = vmul.f32 -0.5, %v3620_v9  ;;  %v3722_v2 = vmul.f32 %v1260_v30, %v3634_v18  ;;  %v3765_v30 = vld [vmem:[%s5309_s1 + $0xc0] sm:$0xff] }
 0x226   :  { %v2842_v39 = vpop.eup %2841  ;;  %5401 = vst [vmem:[#allocation19_spill] sm:$0xff] %v3709_v51  ;;  %5409 = vst [vmem:[#allocation27_spill] sm:$0xff] %v3765_v30 }
 0x227   :  { %914 = vmatmul.mubr.f32.gmra.mrb[58].mxu0 %v2830_v34  ;;  %974 = vmatmul.mubr.f32.gmra.mrb[38].mxu1 %v2832_v32  ;;  %v2844_v40 = vpop.eup %2843  ;;  %v3669_v34 = vld [vmem:[%s5309_s1 + $0x10] sm:$0xff]  ;;  %v3706_v50 = vmul.f32 %v1258_v27, %v3620_v9  ;;  %5403 = vst [vmem:[#allocation21_spill] sm:$0xff] %v3722_v2 }
 0x228   :  { %919 = vmatprep.mubr.f32.mxu0 %v3198_v12  ;;  %979 = vmatprep.mubr.f32.mxu1 %v3198_v12  ;;  %v2846_v41 = vpop.eup %2845  ;;  %v1254_v49 = vmul.f32 -0.5, %v3669_v34 }
 0x229   :  { %v2848_v36 = vpop.eup %2847 }
 0x22a   :  { %v2850_v42 = vpop.eup %2849 }
 0x22b   :  { %920 = vmatmul.mubr.f32.gmra.mrb[60].mxu0 %v2834_v13  ;;  %980 = vmatmul.mubr.f32.gmra.mrb[40].mxu1 %v2836_v35  ;;  %v2852_v43 = vpop.eup %2851  ;;  %v3673_v35 = vmul.f32 %v1255_v8, %v3599_v1 }
 0x22c   :  { %925 = vmatprep.mubr.f32.mxu0 %v3198_v12  ;;  %985 = vmatprep.mubr.f32.mxu1 %v3198_v12  ;;  %v2854_v44 = vpop.eup %2853 }
 0x22d   :  { %v2856_v45 = vpop.eup %2855 }
 0x22e   :  { %v2858_v46 = vpop.eup %2857 }
 0x22f   :  { %926 = vmatmul.mubr.f32.gmra.mrb[62].mxu0 %v2838_v33  ;;  %986 = vmatmul.mubr.f32.gmra.mrb[42].mxu1 %v2840_v38  ;;  %v2860_v47 = vpop.eup %2859  ;;  %v3678_v38 = vmul.f32 %v1256_v37, %v3604_v4 }
 0x230   :  { %931 = vmatprep.mubr.f32.mxu0 %v3198_v12  ;;  %991 = vmatprep.mubr.f32.mxu1 %v3198_v12 }
 0x233   :  { %932 = vmatmul.mubr.f32.gmra.mrb[64].mxu0 %v2842_v39  ;;  %992 = vmatmul.mubr.f32.gmra.mrb[44].mxu1 %v2844_v40  ;;  %v3683_v39 = vld [vmem:[%s5309_s1 + $0x58] sm:$0xff]  ;;  %v3688_v40 = vld [vmem:[%s5309_s1 + $0xa8] sm:$0xff] }
 0x234   :  { %937 = vmatprep.mubr.f32.mxu0 %v3198_v12  ;;  %997 = vmatprep.mubr.f32.mxu1 %v3198_v12  ;;  %5398 = vst [vmem:[#allocation16_spill] sm:$0xff] %v3683_v39  ;;  %5399 = vst [vmem:[#allocation17_spill] sm:$0xff] %v3688_v40 }
 0x237   :  { %938 = vmatmul.mubr.f32.gmra.mrb[66].mxu0 %v2846_v41  ;;  %998 = vmatmul.mubr.f32.gmra.mrb[46].mxu1 %v2848_v36  ;;  %v3691_v36 = vmul.f32 %v1257_v20, %v3613_v10 }
 0x238   :  { %943 = vmatprep.mubr.f32.mxu0 %v3198_v12  ;;  %1003 = vmatprep.mubr.f32.mxu1 %v3198_v12 }
 0x23b   :  { %944 = vmatmul.mubr.f32.gmra.mrb[68].mxu0 %v2850_v42  ;;  %1004 = vmatmul.mubr.f32.gmra.mrb[48].mxu1 %v2852_v43  ;;  %v1261_v42 = vmul.f32 -0.5, %v3648_v25  ;;  %v1262_v43 = vmul.f32 -0.5, %v3653_v28 }
 0x23c   :  { %949 = vmatprep.mubr.f32.mxu0 %v3198_v12  ;;  %1009 = vmatprep.mubr.f32.mxu1 %v3198_v12 }
 0x23d   :  { %v3733_v37 = vmul.f32 %v1261_v42, %v3648_v25  ;;  %v3736_v11 = vmul.f32 %v1262_v43, %v3653_v28 }
 0x23f   :  { %950 = vmatmul.mubr.f32.gmra.mrb[70].mxu0 %v2854_v44  ;;  %1010 = vmatmul.mubr.f32.gmra.mrb[50].mxu1 %v2856_v45  ;;  %v1272_v44 = vmul.f32 -0.5, %v3658_v26  ;;  %v3699_v45 = vld [vmem:[%s5309_s1 + $0x60] sm:$0xff]  ;;  %5405 = vst [vmem:[#allocation23_spill] sm:$0xff] %v3733_v37  ;;  %5406 = vst [vmem:[#allocation24_spill] sm:$0xff] %v3736_v11 }
 0x240   :  { %1015 = vmatprep.mubr.f32.mxu1 %v3198_v12  ;;  %5400 = vst [vmem:[#allocation18_spill] sm:$0xff] %v3699_v45  ;;  %v5466_v37 = vld [vmem:[#allocation11_spill] sm:$0xff] }
 0x241   :  { %v3747_v20 = vmul.f32 %v1272_v44, %v3658_v26 }
 0x243   :  { %1016 = vmatmul.mubr.f32.gmra.mrb[52].mxu1 %v2858_v46  ;;  %5407 = vst [vmem:[#allocation25_spill] sm:$0xff] %v3747_v20 }
 0x244   :  { %1021 = vmatprep.mubr.f32.mxu1 %v3198_v12 }
 0x247   :  { %1022 = vmatmul.mubr.f32.gmra.mrb[54].mxu1 %v2860_v47 }
 0x2c6   :  { %v3575_v53 = vpop.f32.mrb[32].mxu0 }
 0x2c7   :  { %v839_v54 = vpop.f32.mrb[33].mxu0 }
 0x2c8   :  { %v840_v55 = vadd.f32 %v839_v54, %v3573_v52  ;;  %v1263_v54 = vmul.f32 -0.5, %v3683_v39 }
 0x2ca   :  { %v1028_v56 = vmax.f32 %v840_v55, -20.0  ;;  %v3578_v57 = vpop.f32.mrb[34].mxu0  ;;  %v1273_v55 = vmul.f32 -0.5, %v3688_v40  ;;  %v3758_v27 = vmul.f32 %v1263_v54, %v3683_v39  ;;  %v3787_v54 = vld [vmem:[%s5309_s1 + $0xc8] sm:$0xff]  ;;  %v3819_v39 = vld [vmem:[%s5309_s1 + $0xd8] sm:$0xff] }
 0x2cb   :  { %v845_v12 = vpop.f32.mrb[35].mxu0  ;;  %5414 = vst [vmem:[#allocation32_spill] sm:$0xff] %v3787_v54  ;;  %5418 = vst [vmem:[#allocation36_spill] sm:$0xff] %v3819_v39 }
 0x2cc   :  { %v3580_v58 = vmin.f32 %v1028_v56, 2.0  ;;  %v846_v59 = vadd.f32 %v845_v12, %v3573_v52  ;;  %v3716_v56 = vld [vmem:[%s5309_s1 + $0xb0] sm:$0xff]  ;;  %5408 = vst [vmem:[#allocation26_spill] sm:$0xff] %v3758_v27  ;;  %v3778_v44 = vmul.f32 %v1273_v55, %v3688_v40 }
 0x2cd   :  { %5402 = vst [vmem:[#allocation20_spill] sm:$0xff] %v3716_v56  ;;  %v1274_v29 = vmul.f32 -0.5, %v3716_v56 }
 0x2ce   :  { %v1092_v62 = vmul.f32 1.442695, %v3580_v58  ;;  %v1029_v63 = vmax.f32 %v846_v59, -20.0  ;;  %v3594_v0 = vpop.f32.mrb[36].mxu0  ;;  %5412 = vst [vmem:[#allocation30_spill] sm:$0xff] %v3778_v44 }
 0x2cf   :  { %v851_v3 = vpop.f32.mrb[37].mxu0 }
 0x2d0   :  { %2861 = vpow2.f32 %v1092_v62  ;;  %v3606_v5 = vmin.f32 %v1029_v63, 2.0  ;;  %v852_v7 = vadd.f32 %v851_v3, %v3573_v52  ;;  %v1264_v3 = vmul.f32 -0.5, %v3699_v45 }
 0x2d2   :  { %v1094_v16 = vmul.f32 1.442695, %v3606_v5  ;;  %v1030_v14 = vmax.f32 %v852_v7, -20.0  ;;  %v3624_v15 = vpop.f32.mrb[38].mxu0  ;;  %v838_v7 = vadd.f32 %v3575_v53, %v3636_v19  ;;  %v3752_v53 = vld [vmem:[%s5309_s1 + $0x70] sm:$0xff] }
 0x2d3   :  { %v857_v22 = vpop.f32.mrb[39].mxu0 }
 0x2d4   :  { %2863 = vpow2.f32 %v1094_v16  ;;  %v3642_v23 = vmin.f32 %v1030_v14, 2.0  ;;  %v858_v24 = vadd.f32 %v857_v22, %v3573_v52  ;;  %v3741_v16 = vld [vmem:[%s5309_s1 + $0xb8] sm:$0xff] }
 0x2d6   :  { %v1096_v32 = vmul.f32 1.442695, %v3642_v23  ;;  %v1031_v13 = vmax.f32 %v858_v24, -20.0  ;;  %v3675_v33 = vpop.f32.mrb[40].mxu0  ;;  %v3755_v24 = vmul.f32 %v1254_v49, %v3669_v34  ;;  %v1275_v49 = vmul.f32 -0.5, %v3741_v16 }
 0x2d7   :  { %v863_v41 = vpop.f32.mrb[41].mxu0 }
 0x2d8   :  { %2865 = vpow2.f32 %v1096_v32  ;;  %v3701_v46 = vmin.f32 %v1031_v13, 2.0  ;;  %v864_v47 = vadd.f32 %v863_v41, %v3573_v52  ;;  %v3770_v32 = vld [vmem:[%s5309_s1 + $0x78] sm:$0xff]  ;;  %v3836_v17 = vmul.f32 %v1275_v49, %v3741_v16 }
 0x2d9   :  { %5410 = vst [vmem:[#allocation28_spill] sm:$0xff] %v3770_v32 }
 0x2da   :  { %v2862_v12 = vpop.eup %2861  ;;  %v1098_v59 = vmul.f32 1.442695, %v3701_v46  ;;  %v1032_v62 = vmax.f32 %v864_v47, -20.0  ;;  %v3719_v63 = vpop.f32.mrb[42].mxu0  ;;  %v3781_v47 = vmul.f32 %v1264_v3, %v3699_v45  ;;  %v1266_v3 = vmul.f32 -0.5, %v3752_v53  ;;  %5422 = vst [vmem:[#allocation40_spill] sm:$0xff] %v3836_v17 }
 0x2db   :  { %v869_v8 = vpop.f32.mrb[43].mxu0  ;;  %v1188_v14 = vmul.f32 %v2862_v12, %v3591_v61  ;;  %v1265_v61 = vmul.f32 -0.5, %v3728_v6  ;;  %v3792_v12 = vld [vmem:[%s5309_s1 + $0x80] sm:$0xff]  ;;  %v1277_v45 = vmul.f32 -0.5, %v3787_v54  ;;  %v5497_v17 = vld [vmem:[#allocation16_spill] sm:$0xff] }
 0x2dc   :  { %2867 = vpow2.f32 %v1098_v59  ;;  %v3744_v22 = vmin.f32 %v1032_v62, 2.0  ;;  %5413 = vst [vmem:[#allocation31_spill] sm:$0xff] %v3781_v47  ;;  %5415 = vst [vmem:[#allocation33_spill] sm:$0xff] %v3792_v12  ;;  %v844_v59 = vadd.f32 %v3578_v57, %v3636_v19  ;;  %v870_v57 = vadd.f32 %v869_v8, %v3573_v52 }
 0x2dd   :  { %v3772_v13 = vadd.f32 %v1188_v14, %v838_v7  ;;  %v3801_v7 = vld [vmem:[%s5309_s1 + $0xd0] sm:$0xff]  ;;  %v3806_v14 = vld [vmem:[%s5309_s1 + $0x88] sm:$0xff]  ;;  %v1268_v40 = vmul.f32 -0.5, %v3792_v12  ;;  %v3827_v8 = vmul.f32 %v1274_v29, %v3716_v56  ;;  %v3830_v47 = vmul.f32 %v1265_v61, %v3728_v6 }
 0x2de   :  { %v2864_v41 = vpop.eup %2863  ;;  %v1100_v42 = vmul.f32 1.442695, %v3744_v22  ;;  %v3775_v43 = vpop.f32.mrb[44].mxu0  ;;  %5416 = vst [vmem:[#allocation34_spill] sm:$0xff] %v3801_v7  ;;  %5417 = vst [vmem:[#allocation35_spill] sm:$0xff] %v3806_v14  ;;  %v1278_v44 = vmul.f32 -0.5, %v3801_v7  ;;  %v850_v29 = vadd.f32 %v3594_v0, %v3636_v19  ;;  %v3852_v49 = vmul.f32 %v1277_v45, %v3787_v54 }
 0x2df   :  { %5411 = vst [vmem:[#allocation29_spill] sm:$0xff] %v3772_v13  ;;  %v1189_v55 = vmul.f32 %v2864_v41, %v3586_v60  ;;  %v875_v62 = vpop.f32.mrb[45].mxu0  ;;  %v3809_v48 = vmul.f32 -2.0, %v3772_v13  ;;  %v1276_v60 = vmul.f32 -0.5, %v3765_v30  ;;  %v1267_v41 = vmul.f32 -0.5, %v3770_v32  ;;  %5420 = vst [vmem:[#allocation38_spill] sm:$0xff] %v3827_v8 }
 0x2e0   :  { %2869 = vpow2.f32 %v1100_v42  ;;  %5421 = vst [vmem:[#allocation39_spill] sm:$0xff] %v3830_v47  ;;  %v1269_v27 = vmul.f32 -0.5, %v3806_v14  ;;  %v876_v18 = vadd.f32 %v875_v62, %v3573_v52  ;;  %v1033_v56 = vmax.f32 %v870_v57, -20.0  ;;  %5426 = vst [vmem:[#allocation44_spill] sm:$0xff] %v3852_v49  ;;  %v3860_v0 = vld [vmem:[%s5309_s1 + $0x90] sm:$0xff] }
 0x2e1   :  { %v1540_v26 = vand.u32 2147483647, %v3809_v48  ;;  %v3822_v28 = vadd.f32 %v1189_v55, %v844_v59  ;;  %v3839_v59 = vmul.f32 %v1266_v3, %v3752_v53  ;;  %v1279_v61 = vmul.f32 -0.5, %v3819_v39  ;;  %5428 = vst [vmem:[#allocation46_spill] sm:$0xff] %v3860_v0 }
 0x2e2   :  { %v2866_v42 = vpop.eup %2865  ;;  %v3824_v25 = vpop.f32.mrb[46].mxu0  ;;  %v3846_v47 = vmul.f32 %v1276_v60, %v3765_v30  ;;  %v3849_v62 = vmul.f32 %v1267_v41, %v3770_v32  ;;  %v3855_v3 = vmul.f32 %v1268_v40, %v3792_v12  ;;  %v3870_v60 = vmul.f32 %v1278_v44, %v3801_v7  ;;  %v1175_v44 = vld [vmem:[%s5309_s1 + $0x98] sm:$0xff] }
 0x2e3   :  { %5419 = vst [vmem:[#allocation37_spill] sm:$0xff] %v3822_v28  ;;  %v881_v20 = vpop.f32.mrb[47].mxu0  ;;  %5423 = vst [vmem:[#allocation41_spill] sm:$0xff] %v3839_v59  ;;  %v1572_v55 = vsub.f32 0.0, %v1540_v26  ;;  %v1190_v6 = vmul.f32 %v2866_v42, %v3669_v34  ;;  %v3865_v26 = vld [vmem:[%s5309_s1 + $0xe0] sm:$0xff]  ;;  %v3873_v45 = vmul.f32 %v1269_v27, %v3806_v14  ;;  %v856_v42 = vadd.f32 %v3624_v15, %v3636_v19 }
 0x2e4   :  { %5424 = vst [vmem:[#allocation42_spill] sm:$0xff] %v3846_v47  ;;  %5425 = vst [vmem:[#allocation43_spill] sm:$0xff] %v3849_v62  ;;  %v1034_v54 = vmax.f32 %v876_v18, -20.0  ;;  %v882_v32 = vadd.f32 %v881_v20, %v3573_v52  ;;  %v3884_v7 = vmin.f32 %v1033_v56, 2.0  ;;  %v3887_v27 = vmul.f32 %v1279_v61, %v3819_v39 }
 0x2e5   :  { %5427 = vst [vmem:[#allocation45_spill] sm:$0xff] %v3855_v3  ;;  %5429 = vst [vmem:[#allocation47_spill] sm:$0xff] %v3865_v26  ;;  %v1604_v40 = vmul.f32 1.442695, %v1572_v55  ;;  %v3875_v41 = vadd.f32 %v1190_v6, %v850_v29  ;;  %v1270_v6 = vmul.f32 -0.5, %v3860_v0  ;;  %v1280_v55 = vmul.f32 -0.5, %v3865_v26 }
 0x2e6   :  { %v2868_v34 = vpop.eup %2867  ;;  %v3867_v57 = vpop.f32.mrb[48].mxu0  ;;  %5430 = vst [vmem:[#allocation48_spill] sm:$0xff] %v3870_v60  ;;  %5431 = vst [vmem:[#allocation49_spill] sm:$0xff] %v3873_v45  ;;  %v5434_v15 = vlaneseq  ;;  %v3897_v20 = vmul.f32 -2.0, %v3822_v28  ;;  %v1317_v61 = vsub.f32 %v3640_v21, %v3606_v5  ;;  %v1271_v14 = vmul.f32 -0.5, %v1175_v44 }
 0x2e7   :  { %5432 = vst [vmem:[#allocation50_spill] sm:$0xff] %v3875_v41  ;;  %v1191_v12 = vmul.f32 %v2868_v34, %v3599_v1  ;;  %v887_v30 = vpop.f32.mrb[49].mxu0  ;;  %5433 = vst [vmem:[#allocation51_spill] sm:$0xff] %v3887_v27  ;;  %v1316_v1 = vsub.f32 %v3664_v31, %v3580_v58  ;;  %2871 = vpow2.f32 %v1604_v40  ;;  %v862_v58 = vadd.f32 %v3675_v33, %v3636_v19  ;;  %v5534_v27 = vld [vmem:[#allocation34_spill] sm:$0xff] }
 0x2e8   :  { %v3894_v18 = vand.u32 127, %v5434_v15  ;;  %v888_v34 = vadd.f32 %v887_v30, %v3573_v52  ;;  %v3909_v15 = vmin.f32 %v1034_v54, 2.0  ;;  %v1319_v5 = vsub.f32 %v3673_v35, %v3701_v46 }
 0x2e9   :  { %v3899_v29 = vadd.f32 %v1191_v12, %v856_v42  ;;  %v1185_v42 = vld [vmem:[%s5309_s1 + $0xe8] sm:$0xff]  ;;  %v1102_v21 = vmul.f32 1.442695, %v3884_v7  ;;  %v3918_v30 = vmul.f32 %v1270_v6, %v3860_v0  ;;  %v1318_v33 = vsub.f32 %v3755_v24, %v3642_v23 }
 0x2ea   :  { %5435 = vst [vmem:[#allocation52_spill] sm:$0xff] %v3894_v18  ;;  %v2870_v56 = vpop.eup %2869  ;;  %v3904_v39 = vpop.f32.mrb[50].mxu0  ;;  %v1035_v18 = vmax.f32 %v882_v32, -20.0  ;;  %v3925_v32 = vadd.f32 -0.9189385, %v1316_v1  ;;  %v3928_v54 = vmul.f32 %v1280_v55, %v3865_v26  ;;  %v1320_v46 = vsub.f32 %v3678_v38, %v3744_v22 }
 0x2eb   :  { %5436 = vst [vmem:[#allocation53_spill] sm:$0xff] %v3899_v29  ;;  %v1192_v31 = vmul.f32 %v2870_v56, %v3604_v4  ;;  %v893_v12 = vpop.f32.mrb[51].mxu0  ;;  %5437 = vst [vmem:[#allocation54_spill] sm:$0xff] %v3918_v30  ;;  %v1186_v4 = vld [vmem:[%s5309_s1 + $0xf0] sm:$0xff]  ;;  %v1541_v40 = vand.u32 2147483647, %v3897_v20  ;;  %2873 = vpow2.f32 %v1102_v21  ;;  %vm1476_vm2 = vcmp.ne.f32.partialorder %v3809_v48, %v3809_v48 }
 0x2ec   :  { %5438 = vst [vmem:[#allocation55_spill] sm:$0xff] %v3928_v54  ;;  %v1036_v6 = vmax.f32 %v888_v34, -20.0  ;;  %v3939_v24 = vadd.f32 -0.9189385, %v1317_v61  ;;  %v3941_v0 = vmul.f32 -0.5, %v1185_v42  ;;  %v3944_v55 = vmin.f32 %v1035_v18, 2.0 }
 0x2ed   :  { %v3931_v35 = vadd.f32 %v1192_v31, %v862_v58  ;;  %v1104_v1 = vmul.f32 1.442695, %v3909_v15  ;;  %v3946_v58 = vmul.f32 %v1271_v14, %v1175_v44  ;;  %v3948_v31 = vmul.f32 -0.5, %v1186_v4  ;;  %v5522_v30 = vld [vmem:[#allocation32_spill] sm:$0xff] }
 0x2ee   :  { %v3935_v56 = vpop.f32.mrb[52].mxu0  ;;  %v3937_v23 = vpop.f32.mrb[32].mxu1  ;;  %5440 = vst [vmem:[#allocation57_spill] sm:$0xff] %v3939_v24  ;;  %5441 = vst [vmem:[#allocation58_spill] sm:$0xff] %v3941_v0  ;;  %v894_v38 = vadd.f32 %v893_v12, %v3573_v52  ;;  %v3951_v22 = vadd.f32 -0.9189385, %v1318_v33  ;;  %v3962_v14 = vadd.f32 %v3719_v63, %v3636_v19  ;;  %v3966_v44 = vadd.f32 %v3775_v43, %v3636_v19 }
 0x2ef   :  { %5439 = vst [vmem:[#allocation56_spill] sm:$0xff] %v3931_v35  ;;  %5442 = vst [vmem:[#allocation59_spill] sm:$0xff] %v3944_v55  ;;  %v899_v54 = vpop.f32.mrb[53].mxu0  ;;  %v959_v26 = vpop.f32.mrb[33].mxu1  ;;  %v3953_v34 = vadd.f32 -0.9189385, %v1319_v5  ;;  %2875 = vpow2.f32 %v1104_v1  ;;  %v1321_v43 = vsub.f32 %v3691_v36, %v3884_v7  ;;  %v3990_v42 = vadd.f32 %v3824_v25, %v3636_v19 }
 0x2f0   :  { %5443 = vst [vmem:[#allocation60_spill] sm:$0xff] %v3946_v58  ;;  %5444 = vst [vmem:[#allocation61_spill] sm:$0xff] %v3948_v31  ;;  %v900_v61 = vadd.f32 %v899_v54, %v3573_v52  ;;  %v1573_v0 = vsub.f32 0.0, %v1541_v40  ;;  %v3958_v18 = vmul.f32 -2.0, %v3875_v41  ;;  %v3968_v12 = vmin.f32 %v1036_v6, 2.0 }
 0x2f1   :  { %5445 = vst [vmem:[#allocation62_spill] sm:$0xff] %v3951_v22  ;;  %5446 = vst [vmem:[#allocation63_spill] sm:$0xff] %v3953_v34  ;;  %v3974_v33 = vadd.f32 -0.9189385, %v1320_v46  ;;  %v1106_v4 = vmul.f32 1.442695, %v3944_v55  ;;  %v960_v54 = vadd.f32 %v959_v26, %v3573_v52  ;;  %v3979_v31 = vpop.eup %2871  ;;  %v1322_v6 = vsub.f32 %v3706_v50, %v3909_v15 }
 0x2f2   :  { %5447 = vst [vmem:[#allocation64_spill] sm:$0xff] %v3966_v44  ;;  %5448 = vst [vmem:[#allocation65_spill] sm:$0xff] %v3968_v12  ;;  %v3970_v5 = vpop.f32.mrb[54].mxu0  ;;  %v3972_v21 = vpop.f32.mrb[34].mxu1  ;;  %v1037_v34 = vmax.f32 %v894_v38, -20.0  ;;  %v1038_v1 = vmax.f32 %v900_v61, -20.0  ;;  %v3994_v22 = vadd.f32 %v3867_v57, %v3636_v19  ;;  %v4017_v15 = vadd.f32 %v3904_v39, %v3636_v19 }
 0x2f3   :  { %5449 = vst [vmem:[#allocation66_spill] sm:$0xff] %v3974_v33  ;;  %v905_v40 = vpop.f32.mrb[55].mxu0  ;;  %v965_v63 = vpop.f32.mrb[35].mxu1  ;;  %v1606_v58 = vmul.f32 1.442695, %v1573_v0  ;;  %5450 = vst [vmem:[#allocation67_spill] sm:$0xff] %v3990_v42  ;;  %2877 = vpow2.f32 %v1106_v4  ;;  %v4045_v39 = vadd.f32 %v3937_v23, %v3636_v19  ;;  %v4071_v2 = vadd.f32 %v3972_v21, %v3636_v19 }
 0x2f4   :  { %v1542_v26 = vand.u32 2147483647, %v3958_v18  ;;  %5451 = vst [vmem:[#allocation68_spill] sm:$0xff] %v3994_v22  ;;  %v1108_v36 = vmul.f32 1.442695, %v3968_v12  ;;  %v1048_v0 = vmax.f32 %v960_v54, -20.0  ;;  %v906_v38 = vadd.f32 %v905_v40, %v3573_v52 }
 0x2f5   :  { %v1668_v25 = vadd.f32 1.0, %v3979_v31  ;;  %v4006_v33 = vmin.f32 %v1037_v34, 2.0  ;;  %v4008_v22 = vadd.f32 -0.9189385, %v1321_v43  ;;  %v4010_v42 = vadd.f32 -0.9189385, %v1322_v6  ;;  %v2874_v40 = vpop.eup %2873 }
 0x2f6   :  { %v3997_v50 = vpop.f32.mrb[56].mxu0  ;;  %v3999_v7 = vpop.f32.mrb[36].mxu1  ;;  %v4012_v44 = vmin.f32 %v1038_v1, 2.0  ;;  %v966_v4 = vadd.f32 %v965_v63, %v3573_v52  ;;  %2879 = vpow2.f32 %v1606_v58  ;;  %v1574_v54 = vsub.f32 0.0, %v1542_v26  ;;  %5456 = vst [vmem:[#allocation73_spill] sm:$0xff] %v4017_v15  ;;  %5459 = vst [vmem:[#allocation76_spill] sm:$0xff] %v4045_v39 }
 0x2f7   :  { %v911_v61 = vpop.f32.mrb[57].mxu0  ;;  %v971_v46 = vpop.f32.mrb[37].mxu1  ;;  %5452 = vst [vmem:[#allocation69_spill] sm:$0xff] %v4006_v33  ;;  %5453 = vst [vmem:[#allocation70_spill] sm:$0xff] %v4008_v22  ;;  %2881 = vpow2.f32 %v1108_v36  ;;  %v4025_v6 = vmul.f32 -2.0, %v3899_v29  ;;  %v4027_v1 = vmin.f32 %v1048_v0, 2.0  ;;  %v4036_v51 = vmul.f32 %v2874_v40, %v3613_v10 }
 0x2f8   :  { %5454 = vst [vmem:[#allocation71_spill] sm:$0xff] %v4010_v42  ;;  %5455 = vst [vmem:[#allocation72_spill] sm:$0xff] %v4012_v44  ;;  %v912_v57 = vadd.f32 %v911_v61, %v3573_v52  ;;  %v1039_v63 = vmax.f32 %v906_v38, -20.0  ;;  %2883 = vlog2.f32 %v1668_v25  ;;  %v1110_v61 = vmul.f32 1.442695, %v4006_v33 }
 0x2f9   :  { %5457 = vst [vmem:[#allocation74_spill] sm:$0xff] %v4027_v1  ;;  %v972_v42 = vadd.f32 %v971_v46, %v3573_v52  ;;  %v2876_v55 = vpop.eup %2875  ;;  %v1112_v0 = vmul.f32 1.442695, %v4012_v44  ;;  %v1049_v38 = vmax.f32 %v966_v4, -20.0  ;;  %v1608_v15 = vmul.f32 1.442695, %v1574_v54 }
 0x2fa   :  { %v4020_v34 = vpop.f32.mrb[58].mxu0  ;;  %v4022_v43 = vpop.f32.mrb[38].mxu1  ;;  %v4041_v25 = vadd.f32 %v3935_v56, %v3636_v19  ;;  %v1040_v36 = vmax.f32 %v912_v57, -20.0  ;;  %v1132_v4 = vmul.f32 1.442695, %v4027_v1  ;;  %v4055_v54 = vmin.f32 %v1039_v63, 2.0 }
 0x2fb   :  { %v917_v58 = vpop.f32.mrb[59].mxu0  ;;  %v977_v26 = vpop.f32.mrb[39].mxu1  ;;  %v4059_v23 = vmul.f32 %v2876_v55, %v3620_v9  ;;  %2885 = vpow2.f32 %v1110_v61  ;;  %v1050_v57 = vmax.f32 %v972_v42, -20.0  ;;  %v4064_v40 = vadd.f32 %v3970_v5, %v3636_v19  ;;  %5464 = vst [vmem:[#allocation81_spill] sm:$0xff] %v4071_v2  ;;  %v5472_v1 = vld [vmem:[#allocation12_spill] sm:$0xff] }
 0x2fc   :  { %5458 = vst [vmem:[#allocation75_spill] sm:$0xff] %v4041_v25  ;;  %5460 = vst [vmem:[#allocation77_spill] sm:$0xff] %v4055_v54  ;;  %v918_v29 = vadd.f32 %v917_v58, %v3573_v52  ;;  %2887 = vpow2.f32 %v1112_v0  ;;  %v4066_v10 = vmin.f32 %v1049_v38, 2.0  ;;  %v978_v63 = vadd.f32 %v977_v26, %v3573_v52 }
 0x2fd   :  { %5461 = vst [vmem:[#allocation78_spill] sm:$0xff] %v4059_v23  ;;  %v2878_v39 = vpop.eup %2877  ;;  %5462 = vst [vmem:[#allocation79_spill] sm:$0xff] %v4064_v40  ;;  %v4073_v9 = vmin.f32 %v1040_v36, 2.0  ;;  %v1671_v58 = vmul.f32 -0.5, %v3979_v31  ;;  %v1674_v61 = vand.u32 2147483647, %v3979_v31  ;;  %2889 = vpow2.f32 %v1132_v4 }
 0x2fe   :  { %v4047_v46 = vpop.f32.mrb[60].mxu0  ;;  %v4049_v22 = vpop.f32.mrb[40].mxu1  ;;  %5463 = vst [vmem:[#allocation80_spill] sm:$0xff] %v4066_v10  ;;  %v1114_v26 = vmul.f32 1.442695, %v4055_v54  ;;  %v4088_v2 = vmul.f32 %v2878_v39, %v5466_v37  ;;  %v4092_v41 = vmin.f32 %v1050_v57, 2.0  ;;  %v4097_v4 = vadd.f32 %v3997_v50, %v3636_v19 }
 0x2ff   :  { %v923_v56 = vpop.f32.mrb[61].mxu0  ;;  %v983_v12 = vpop.f32.mrb[41].mxu1  ;;  %5465 = vst [vmem:[#allocation82_spill] sm:$0xff] %v4073_v9  ;;  %v1041_v23 = vmax.f32 %v918_v29, -20.0  ;;  %v1134_v0 = vmul.f32 1.442695, %v4066_v10  ;;  %v4102_v37 = vadd.f32 %v3999_v7, %v3636_v19  ;;  %2891 = vpow2.f32 %v1608_v15 }
 0x300   :  { %v4081_v5 = vpop.eup %2879  ;;  %v924_v21 = vadd.f32 %v923_v56, %v3573_v52  ;;  %5467 = vst [vmem:[#allocation11_spill] sm:$0xff] %v4088_v2  ;;  %5469 = vst [vmem:[#allocation83_spill] sm:$0xff] %v4092_v41  ;;  %v1051_v56 = vmax.f32 %v978_v63, -20.0  ;;  %v984_v44 = vadd.f32 %v983_v12, %v3573_v52  ;;  %v1116_v39 = vmul.f32 1.442695, %v4073_v9 }
 0x301   :  { %v2882_v33 = vpop.eup %2881  ;;  %5470 = vst [vmem:[#allocation84_spill] sm:$0xff] %v4097_v4  ;;  %5471 = vst [vmem:[#allocation85_spill] sm:$0xff] %v4102_v37  ;;  %v1672_v29 = vadd.f32 1.0, %v1671_v58  ;;  %2893 = vpow2.f32 %v1114_v26  ;;  %vm4112_vm1 = vcmp.lt.f32.partialorder %v1674_v61, 0.0004427343  ;;  %v4117_v37 = vmin.f32 %v1041_v23, 2.0 }
 0x302   :  { %v4075_v55 = vpop.f32.mrb[62].mxu0  ;;  %v4077_v42 = vpop.f32.mrb[42].mxu1  ;;  %v4110_v40 = vmul.f32 %v2882_v33, %v5472_v1  ;;  %v1042_v50 = vmax.f32 %v924_v21, -20.0  ;;  %v1136_v7 = vmul.f32 1.442695, %v4092_v41  ;;  %2895 = vpow2.f32 %v1134_v0 }
 0x303   :  { %v929_v36 = vpop.f32.mrb[63].mxu0  ;;  %v989_v38 = vpop.f32.mrb[43].mxu1  ;;  %5475 = vst [vmem:[#allocation12_spill] sm:$0xff] %v4117_v37  ;;  %v4122_v33 = vmin.f32 %v1051_v56, 2.0  ;;  %v1052_v1 = vmax.f32 %v984_v44, -20.0  ;;  %2897 = vpow2.f32 %v1116_v39  ;;  %v4130_v23 = vadd.f32 %v4020_v34, %v3636_v19 }
 0x304   :  { %v2884_v24 = vpop.eup %2883  ;;  %v930_v4 = vadd.f32 %v929_v36, %v3573_v52  ;;  %v1673_v0 = vmul.f32 %v3979_v31, %v1672_v29  ;;  %v4141_v54 = vadd.f32 %v4022_v43, %v3636_v19  ;;  %v4143_v21 = vmin.f32 %v1042_v50, 2.0 }
 0x305   :  { %v1670_v2 = vmul.f32 0.6931472, %v2884_v24  ;;  %5477 = vst [vmem:[#allocation86_spill] sm:$0xff] %v4122_v33  ;;  %v2886_v61 = vpop.eup %2885  ;;  %5479 = vst [vmem:[#allocation87_spill] sm:$0xff] %v4130_v23  ;;  %v990_v39 = vadd.f32 %v989_v38, %v3573_v52  ;;  %2899 = vpow2.f32 %v1136_v7  ;;  %v1118_v26 = vmul.f32 1.442695, %v4117_v37 }
 0x306   :  { %v4105_v25 = vpop.f32.mrb[64].mxu0  ;;  %v4107_v57 = vpop.f32.mrb[44].mxu1  ;;  %5481 = vst [vmem:[#allocation88_spill] sm:$0xff] %v4141_v54  ;;  %5482 = vst [vmem:[#allocation89_spill] sm:$0xff] %v4143_v21  ;;  %v1043_v15 = vmax.f32 %v930_v4, -20.0  ;;  %v5483_v23 = vld [vmem:[#allocation13_spill] sm:$0xff]  ;;  %v4162_v4 = vadd.f32 %v4047_v46, %v3636_v19  ;;  %vm1477_vm3 = vcmp.ne.f32.partialorder %v3897_v20, %v3897_v20  ;;  %vm1478_vm5 = vcmp.ne.f32.partialorder %v3958_v18, %v3958_v18 }
 0x307   :  { %v935_v63 = vpop.f32.mrb[65].mxu0  ;;  %v995_v11 = vpop.f32.mrb[45].mxu1  ;;  %v1676_v31 = vsel %vm4112_vm1, %v1673_v0, %v1670_v2  ;;  %v4150_v58 = vmul.f32 %v2886_v61, %v5483_v23  ;;  %v1138_v50 = vmul.f32 1.442695, %v4122_v33  ;;  %v4155_v9 = vmin.f32 %v1052_v1, 2.0  ;;  %v5485_v38 = vld [vmem:[#allocation14_spill] sm:$0xff] }
 0x308   :  { %v2888_v56 = vpop.eup %2887  ;;  %5487 = vst [vmem:[#allocation90_spill] sm:$0xff] %v4162_v4  ;;  %v4166_v2 = vadd.f32 %v4049_v22, %v3636_v19  ;;  %v1677_v61 = vadd.f32 1.0, %v4081_v5  ;;  %v5489_v1 = vld [vmem:[#allocation39_spill] sm:$0xff]  ;;  %v1120_v0 = vmul.f32 1.442695, %v4143_v21  ;;  %2901 = vpow2.f32 %v1118_v26 }
 0x309   :  { %v2890_v29 = vpop.eup %2889  ;;  %5484 = vst [vmem:[#allocation13_spill] sm:$0xff] %v4155_v9  ;;  %v4158_v44 = vmul.f32 %v2888_v56, %v5485_v38  ;;  %v1053_v56 = vmax.f32 %v990_v39, -20.0  ;;  %v5490_v38 = vmax.f32 %v3809_v48, 0.0  ;;  %v5491_v22 = vld [vmem:[#allocation15_spill] sm:$0xff]  ;;  %v4183_v4 = vmin.f32 %v1043_v15, 2.0 }
 0x30a   :  { %v4132_v24 = vpop.f32.mrb[66].mxu0  ;;  %v4134_v36 = vpop.f32.mrb[46].mxu1  ;;  %5488 = vst [vmem:[#allocation91_spill] sm:$0xff] %v4166_v2  ;;  %v4181_v2 = vmul.f32 %v2890_v29, %v5491_v22  ;;  %v936_v54 = vadd.f32 %v935_v63, %v3573_v52  ;;  %2903 = vpow2.f32 %v1138_v50  ;;  %v1140_v23 = vmul.f32 1.442695, %v4155_v9 }
 0x30b   :  { %v941_v34 = vpop.f32.mrb[67].mxu0  ;;  %v1001_v10 = vpop.f32.mrb[47].mxu1  ;;  %5486 = vst [vmem:[#allocation14_spill] sm:$0xff] %v4158_v44  ;;  %v1956_v46 = vadd.f32 %v1676_v31, %v5490_v38  ;;  %5492 = vst [vmem:[#allocation39_spill] sm:$0xff] %v4183_v4  ;;  %v996_v31 = vadd.f32 %v995_v11, %v3573_v52  ;;  %v4194_v29 = vadd.f32 %v4075_v55, %v3636_v19  ;;  %2905 = vpow2.f32 %v1120_v0 }
 0x30c   :  { %v4178_v8 = vpop.eup %2891  ;;  %v4198_v15 = vadd.f32 %v4077_v42, %v3636_v19  ;;  %v4208_v22 = vmin.f32 %v1053_v56, 2.0  ;;  %v4212_v55 = vadd.f32 %v4105_v25, %v3636_v19  ;;  %v942_v42 = vadd.f32 %v941_v34, %v3573_v52 }
 0x30d   :  { %v2894_v44 = vpop.eup %2893  ;;  %v1988_v63 = vsel %vm1476_vm2, %v3809_v48, %v1956_v46  ;;  %v1122_v48 = vmul.f32 1.442695, %v4183_v4  ;;  %v1044_v46 = vmax.f32 %v936_v54, -20.0  ;;  %v5496_v59 = vsub.f32 0.6931472, %v3772_v13 }
 0x30e   :  { %v4168_v12 = vpop.f32.mrb[68].mxu0  ;;  %v4170_v7 = vpop.f32.mrb[48].mxu1  ;;  %5493 = vst [vmem:[#allocation15_spill] sm:$0xff] %v4198_v15  ;;  %5494 = vst [vmem:[#allocation92_spill] sm:$0xff] %v4208_v22  ;;  %2907 = vlog2.f32 %v1677_v61  ;;  %v4224_v0 = vadd.f32 %v4107_v57, %v3636_v19  ;;  %v1054_v25 = vmax.f32 %v996_v31, -20.0  ;;  %v1002_v34 = vadd.f32 %v1001_v10, %v3573_v52  ;;  %v5498_v15 = vld [vmem:[#allocation17_spill] sm:$0xff] }
 0x30f   :  { %v947_v43 = vpop.f32.mrb[69].mxu0  ;;  %v1007_v41 = vpop.f32.mrb[49].mxu1  ;;  %5495 = vst [vmem:[#allocation93_spill] sm:$0xff] %v4212_v55  ;;  %v2020_v33 = vsub.f32 %v5496_v59, %v1988_v63  ;;  %2909 = vpow2.f32 %v1140_v23  ;;  %v4228_v55 = vmul.f32 %v2894_v44, %v5497_v17  ;;  %v5499_v23 = vld [vmem:[#allocation18_spill] sm:$0xff]  ;;  %v1142_v57 = vmul.f32 1.442695, %v4208_v22 }
 0x310   :  { %v2896_v11 = vpop.eup %2895  ;;  %v1045_v31 = vmax.f32 %v942_v42, -20.0  ;;  %v1680_v10 = vmul.f32 -0.5, %v4081_v5  ;;  %2911 = vpow2.f32 %v1122_v48  ;;  %v4246_v44 = vmin.f32 %v1044_v46, 2.0 }
 0x311   :  { %v2898_v21 = vpop.eup %2897  ;;  %v4231_v37 = vmul.f32 %v2896_v11, %v5498_v15  ;;  %v2052_v59 = vmul.f32 2.0, %v2020_v33  ;;  %v5501_v15 = vld [vmem:[#allocation20_spill] sm:$0xff]  ;;  %v4256_v42 = vadd.f32 %v4132_v24, %v3636_v19  ;;  %v4262_v46 = vadd.f32 %v4134_v36, %v3636_v19 }
 0x312   :  { %v4204_v26 = vpop.f32.mrb[70].mxu0  ;;  %v4206_v50 = vpop.f32.mrb[50].mxu1  ;;  %v4238_v63 = vmul.f32 %v2898_v21, %v5499_v23  ;;  %5500 = vst [vmem:[#allocation16_spill] sm:$0xff] %v4246_v44  ;;  %v4252_v21 = vmin.f32 %v1054_v25, 2.0  ;;  %v1055_v23 = vmax.f32 %v1002_v34, -20.0  ;;  %2913 = vpow2.f32 %v1142_v57 }
 0x313   :  { %v4215_v38 = vpop.f32.mrb[71].mxu0  ;;  %v4217_v39 = vpop.f32.mrb[51].mxu1  ;;  %v2084_v33 = vsub.f32 %v3925_v32, %v2052_v59  ;;  %5503 = vst [vmem:[#allocation18_spill] sm:$0xff] %v4262_v46  ;;  %v948_v32 = vadd.f32 %v947_v43, %v3573_v52  ;;  %v4268_v24 = vmin.f32 %v1045_v31, 2.0  ;;  %v1681_v34 = vadd.f32 1.0, %v1680_v10 }
 0x314   :  { %v2900_v56 = vpop.eup %2899  ;;  %5502 = vst [vmem:[#allocation17_spill] sm:$0xff] %v4252_v21  ;;  %v1124_v36 = vmul.f32 1.442695, %v4246_v44  ;;  %v4278_v43 = vadd.f32 %v4168_v12, %v3636_v19  ;;  %v1683_v57 = vand.u32 2147483647, %v4081_v5  ;;  %v4289_v22 = vmin.f32 %v1055_v23, 2.0 }
 0x315   :  { %v4250_v11 = vmul.f32 %v2900_v56, %v5501_v15  ;;  %v2902_v54 = vpop.eup %2901  ;;  %2116 = vadd.xlane.f32.xlu0 %v2084_v33  ;;  %v1008_v56 = vadd.f32 %v1007_v41, %v3573_v52  ;;  %5504 = vst [vmem:[#allocation20_spill] sm:$0xff] %v4268_v24  ;;  %v1686_v15 = vadd.f32 1.0, %v4178_v8  ;;  %v4282_v41 = vadd.f32 %v4170_v7, %v3636_v19  ;;  %v5507_v33 = vld [vmem:[#allocation22_spill] sm:$0xff]  ;;  %v5510_v12 = vld [vmem:[#allocation27_spill] sm:$0xff] }
 0x316   :  { %v4235_v61 = vpop.f32.mrb[52].mxu1  ;;  %v2904_v59 = vpop.eup %2903  ;;  %5505 = vst [vmem:[#allocation94_spill] sm:$0xff] %v4278_v43  ;;  %v4286_v17 = vmul.f32 %v2902_v54, %v5507_v33  ;;  %v1144_v10 = vmul.f32 1.442695, %v4252_v21  ;;  %5508 = vst [vmem:[#allocation22_spill] sm:$0xff] %v4289_v22  ;;  %v1046_v7 = vmax.f32 %v948_v32, -20.0  ;;  %v1682_v54 = vmul.f32 %v4081_v5, %v1681_v34 }
 0x317   :  { %v4242_v13 = vpop.f32.mrb[53].mxu1  ;;  %5506 = vst [vmem:[#allocation95_spill] sm:$0xff] %v4282_v41  ;;  %v2906_v31 = vpop.eup %2905  ;;  %2915 = vlog2.f32 %v1686_v15  ;;  %v4292_v9 = vmul.f32 %v2904_v59, %v3741_v16  ;;  %v1056_v41 = vmax.f32 %v1008_v56, -20.0  ;;  %v1126_v43 = vmul.f32 1.442695, %v4268_v24  ;;  %v5551_v24 = vld [vmem:[#allocation59_spill] sm:$0xff] }
 0x318   :  { %v2908_v49 = vpop.eup %2907  ;;  %v5509_v33 = vand.u32 2147483647, %v4025_v6  ;;  %2917 = vpow2.f32 %v1124_v36  ;;  %vm1684_vm4 = vcmp.lt.f32.partialorder %v1683_v57, 0.0004427343  ;;  %v1689_v16 = vmul.f32 -0.5, %v4178_v8 }
 0x319   :  { %v2910_v47 = vpop.eup %2909  ;;  %v1679_v4 = vmul.f32 0.6931472, %v2908_v49  ;;  %v4304_v59 = vmul.f32 %v2906_v31, %v3752_v53  ;;  %2919 = vpow2.f32 %v1144_v10  ;;  %v1146_v32 = vmul.f32 1.442695, %v4289_v22 }
 0x31a   :  { %v4266_v25 = vpop.f32.mrb[54].mxu1  ;;  %v1575_v23 = vsub.f32 0.0, %v5509_v33  ;;  %v2912_v49 = vpop.eup %2911  ;;  %v4308_v5 = vmul.f32 %v2910_v47, %v5510_v12  ;;  %v4312_v36 = vmin.f32 %v1046_v7, 2.0  ;;  %v5512_v57 = vmax.f32 %v3897_v20, 0.0 }
 0x31b   :  { %v4273_v48 = vpop.f32.mrb[55].mxu1  ;;  %v1685_v56 = vsel %vm1684_vm4, %v1682_v54, %v1679_v4  ;;  %2921 = vpow2.f32 %v1126_v43  ;;  %v4318_v31 = vmin.f32 %v1056_v41, 2.0  ;;  %v4326_v4 = vadd.f32 %v4204_v26, %v3636_v19  ;;  %v5515_v54 = vld [vmem:[#allocation28_spill] sm:$0xff] }
 0x31c   :  { %5511 = vst [vmem:[#allocation27_spill] sm:$0xff] %v4312_v36  ;;  %v1957_v33 = vadd.f32 %v1685_v56, %v5512_v57  ;;  %v1610_v10 = vmul.f32 1.442695, %v1575_v23  ;;  %v1690_v12 = vadd.f32 1.0, %v1689_v16  ;;  %v1692_v43 = vand.u32 2147483647, %v4178_v8  ;;  %v2914_v7 = vpop.eup %2913 }
 0x31d   :  { %5513 = vst [vmem:[#allocation96_spill] sm:$0xff] %v4318_v31  ;;  %5514 = vst [vmem:[#allocation97_spill] sm:$0xff] %v4326_v4  ;;  %v4332_v41 = vmul.f32 %v2912_v49, %v5515_v54  ;;  %2923 = vpow2.f32 %v1146_v32  ;;  %v5516_v23 = vsub.f32 0.6931472, %v3822_v28  ;;  %v1128_v26 = vmul.f32 1.442695, %v4312_v36 }
 0x31e   :  { %v1989_v47 = vsel %vm1477_vm3, %v3897_v20, %v1957_v33  ;;  %v4337_v20 = vmul.f32 -2.0, %v3931_v35  ;;  %v954_v57 = vadd.f32 %v4215_v38, %v3573_v52  ;;  %2925 = vpow2.f32 %v1610_v10  ;;  %v5517_v10 = vld [vmem:[#allocation57_spill] sm:$0xff]  ;;  %v5518_v32 = vld [vmem:[#allocation64_spill] sm:$0xff] }
 0x31f   :  { %v2021_v56 = vsub.f32 %v5516_v23, %v1989_v47  ;;  %v4344_v16 = vadd.f32 %v4036_v51, %v3962_v14  ;;  %v1014_v47 = vadd.f32 %v4217_v39, %v3573_v52  ;;  %v1691_v53 = vmul.f32 %v4178_v8, %v1690_v12  ;;  %v5520_v8 = vld [vmem:[#allocation67_spill] sm:$0xff] }
 0x320   :  { %v1544_v54 = vand.u32 2147483647, %v4337_v20  ;;  %vm1693_vm6 = vcmp.lt.f32.partialorder %v1692_v43, 0.0004427343  ;;  %v1020_v38 = vadd.f32 %v4242_v13, %v3573_v52  ;;  %v1148_v28 = vmul.f32 1.442695, %v4318_v31 }
 0x321   :  { %v2916_v33 = vpop.eup %2915  ;;  %v2053_v49 = vmul.f32 2.0, %v2021_v56  ;;  %v4356_v15 = vmul.f32 -2.0, %v4344_v16  ;;  %v5519_v56 = vld [vmem:[#allocation78_spill] sm:$0xff]  ;;  %v5521_v12 = vld [vmem:[#allocation11_spill] sm:$0xff]  ;;  %2927 = vpow2.f32 %v1128_v26  ;;  %vm1479_vm7 = vcmp.ne.f32.partialorder %v4025_v6, %v4025_v6 }
 0x322   :  { %v1688_v23 = vmul.f32 0.6931472, %v2916_v33  ;;  %v1576_v14 = vsub.f32 0.0, %v1544_v54  ;;  %v4360_v34 = vadd.f32 %v5519_v56, %v5518_v32  ;;  %v2918_v39 = vpop.eup %2917  ;;  %v1047_v33 = vmax.f32 %v954_v57, -20.0  ;;  %v5533_v31 = vld [vmem:[#allocation62_spill] sm:$0xff] }
 0x323   :  { %v2085_v51 = vsub.f32 %v5517_v10, %v2053_v49  ;;  %v4365_v43 = vadd.f32 %v5521_v12, %v5520_v8  ;;  %v2920_v13 = vpop.eup %2919  ;;  %v4368_v49 = vmul.f32 %v2914_v7, %v5522_v30  ;;  %v1057_v54 = vmax.f32 %v1014_v47, -20.0  ;;  %v5524_v47 = vld [vmem:[#allocation68_spill] sm:$0xff] }
 0x324   :  { %v1694_v36 = vsel %vm1693_vm6, %v1691_v53, %v1688_v23  ;;  %v5523_v10 = vmax.f32 %v3958_v18, 0.0  ;;  %v1612_v32 = vmul.f32 1.442695, %v1576_v14  ;;  %v1026_v56 = vadd.f32 %v4273_v48, %v3573_v52  ;;  %v5526_v52 = vld [vmem:[#allocation50_spill] sm:$0xff] }
 0x325   :  { %2118 = vadd.xlane.f32.xlu0 %v2085_v51  ;;  %v1545_v53 = vand.u32 2147483647, %v4356_v15  ;;  %v4376_v57 = vmul.f32 -2.0, %v4360_v34  ;;  %v2922_v23 = vpop.eup %2921  ;;  %v1058_v7 = vmax.f32 %v1020_v38, -20.0  ;;  %v4386_v26 = vmin.f32 %v1047_v33, 2.0 }
 0x326   :  { %v1958_v22 = vadd.f32 %v1694_v36, %v5523_v10  ;;  %2929 = vpow2.f32 %v1612_v32  ;;  %v4384_v36 = vadd.f32 %v4110_v40, %v5524_v47  ;;  %v5527_v48 = vsub.f32 0.6931472, %v5526_v52 }
 0x327   :  { %5525 = vst [vmem:[#allocation28_spill] sm:$0xff] %v4386_v26  ;;  %v1577_v14 = vsub.f32 0.0, %v1545_v53  ;;  %v4391_v8 = vmul.f32 -2.0, %v4365_v43  ;;  %v2924_v12 = vpop.eup %2923  ;;  %2931 = vpow2.f32 %v1148_v28  ;;  %v1546_v40 = vand.u32 2147483647, %v4376_v57 }
 0x328   :  { %v1990_v30 = vsel %vm1478_vm5, %v3958_v18, %v1958_v22  ;;  %v4395_v18 = vadd.f32 %v4206_v50, %v3636_v19  ;;  %v4397_v22 = vmin.f32 %v1057_v54, 2.0  ;;  %v4400_v38 = vpop.eup %2925  ;;  %v4404_v10 = vadd.f32 %v4235_v61, %v3636_v19 }
 0x329   :  { %v2022_v51 = vsub.f32 %v5527_v48, %v1990_v30  ;;  %v1059_v32 = vmax.f32 %v1026_v56, -20.0  ;;  %v1614_v53 = vmul.f32 1.442695, %v1577_v14  ;;  %v5531_v30 = vld [vmem:[#allocation33_spill] sm:$0xff]  ;;  %v4409_v28 = vmin.f32 %v1058_v7, 2.0 }
 0x32a   :  { %5528 = vst [vmem:[#allocation57_spill] sm:$0xff] %v4395_v18  ;;  %5529 = vst [vmem:[#allocation64_spill] sm:$0xff] %v4397_v22  ;;  %v4407_v47 = vmul.f32 %v2918_v39, %v5531_v30  ;;  %v1695_v50 = vadd.f32 1.0, %v4400_v38  ;;  %v1578_v54 = vsub.f32 0.0, %v1546_v40  ;;  %v1130_v48 = vmul.f32 1.442695, %v4386_v26 }
 0x32b   :  { %v2054_v33 = vmul.f32 2.0, %v2022_v51  ;;  %5530 = vst [vmem:[#allocation78_spill] sm:$0xff] %v4404_v10  ;;  %5532 = vst [vmem:[#allocation67_spill] sm:$0xff] %v4409_v28  ;;  %2933 = vpow2.f32 %v1614_v53  ;;  %v1547_v51 = vand.u32 2147483647, %v4391_v8  ;;  %v4416_v61 = vmul.f32 %v2920_v13, %v5534_v27  ;;  %v5536_v30 = vld [vmem:[#allocation73_spill] sm:$0xff] }
 0x32c   :  { %v1150_v56 = vmul.f32 1.442695, %v4397_v22  ;;  %2935 = vlog2.f32 %v1695_v50  ;;  %v1616_v39 = vmul.f32 1.442695, %v1578_v54  ;;  %v4419_v7 = vmin.f32 %v1059_v32, 2.0 }
 0x32d   :  { %v2086_v52 = vsub.f32 %v5533_v31, %v2054_v33  ;;  %v1579_v14 = vsub.f32 0.0, %v1547_v51  ;;  %v4422_v40 = vmul.f32 -2.0, %v4384_v36  ;;  %v4426_v31 = vadd.f32 %v4150_v58, %v5536_v30  ;;  %v5539_v58 = vld [vmem:[#allocation35_spill] sm:$0xff]  ;;  %v5545_v33 = vld [vmem:[#allocation46_spill] sm:$0xff] }
 0x32e   :  { %5535 = vst [vmem:[#allocation11_spill] sm:$0xff] %v4419_v7  ;;  %v1152_v27 = vmul.f32 1.442695, %v4409_v28  ;;  %v4433_v13 = vadd.f32 %v4266_v25, %v3636_v19  ;;  %2937 = vpow2.f32 %v1616_v39  ;;  %v1698_v32 = vmul.f32 -0.5, %v4400_v38  ;;  %v5540_v28 = vld [vmem:[#allocation75_spill] sm:$0xff]  ;;  %v5541_v19 = vld [vmem:[#allocation14_spill] sm:$0xff] }
 0x32f   :  { %2120 = vadd.xlane.f32.xlu1 %v2086_v52  ;;  %v2928_v52 = vpop.eup %2927  ;;  %2939 = vpow2.f32 %v1130_v48  ;;  %v1618_v50 = vmul.f32 1.442695, %v1579_v14  ;;  %v1548_v54 = vand.u32 2147483647, %v4422_v40  ;;  %v4440_v30 = vmul.f32 %v2922_v23, %v5539_v58  ;;  %v5542_v39 = vld [vmem:[#allocation36_spill] sm:$0xff] }
 0x330   :  { %5538 = vst [vmem:[#allocation32_spill] sm:$0xff] %v4433_v13  ;;  %v4437_v51 = vpop.eup %2929  ;;  %2941 = vpow2.f32 %v1150_v56  ;;  %v4443_v53 = vmul.f32 -2.0, %v4426_v31  ;;  %v4447_v25 = vadd.f32 %v5541_v19, %v5540_v28  ;;  %v4450_v48 = vmul.f32 %v2924_v12, %v5542_v39 }
 0x331   :  { %v1154_v14 = vmul.f32 1.442695, %v4419_v7  ;;  %v1704_v22 = vadd.f32 1.0, %v4437_v51  ;;  %2943 = vpow2.f32 %v1618_v50  ;;  %v2932_v26 = vpop.eup %2931  ;;  %v1580_v56 = vsub.f32 0.0, %v1548_v54 }
 0x332   :  { %5543 = vst [vmem:[#allocation68_spill] sm:$0xff] %v4450_v48  ;;  %2945 = vpow2.f32 %v1152_v27  ;;  %v1549_v58 = vand.u32 2147483647, %v4443_v53  ;;  %v1699_v28 = vadd.f32 1.0, %v1698_v32  ;;  %v1701_v19 = vand.u32 2147483647, %v4400_v38 }
 0x333   :  { %2947 = vlog2.f32 %v1704_v22  ;;  %v1707_v12 = vmul.f32 -0.5, %v4437_v51  ;;  %v1620_v39 = vmul.f32 1.442695, %v1580_v56  ;;  %v4461_v50 = vmul.f32 -2.0, %v4447_v25  ;;  %v5544_v27 = vld [vmem:[#allocation79_spill] sm:$0xff]  ;;  %v5549_v22 = vld [vmem:[#allocation76_spill] sm:$0xff] }
 0x334   :  { %v1581_v7 = vsub.f32 0.0, %v1549_v58  ;;  %v4465_v23 = vadd.f32 %v4228_v55, %v5544_v27  ;;  %v4470_v13 = vmul.f32 %v2928_v52, %v5545_v33  ;;  %v5547_v32 = vld [vmem:[#allocation47_spill] sm:$0xff]  ;;  %2949 = vpow2.f32 %v1154_v14 }
 0x335   :  { %v4467_v54 = vpop.eup %2933  ;;  %v4473_v21 = vmul.f32 %v2932_v26, %v5547_v32  ;;  %v4477_v56 = vadd.f32 %v4181_v2, %v5549_v22  ;;  %v1448_v60 = vmax.f32 %v4337_v20, 0.0  ;;  %2951 = vpow2.f32 %v1620_v39  ;;  %v5550_v52 = vld [vmem:[#allocation19_spill] sm:$0xff]  ;;  %v5554_v39 = vld [vmem:[#allocation53_spill] sm:$0xff] }
 0x336   :  { %5546 = vst [vmem:[#allocation33_spill] sm:$0xff] %v4470_v13  ;;  %v2936_v58 = vpop.eup %2935  ;;  %v1713_v55 = vadd.f32 1.0, %v4467_v54  ;;  %v1700_v33 = vmul.f32 %v4400_v38, %v1699_v28  ;;  %v5552_v26 = vsub.f32 %v5550_v52, %v5551_v24  ;;  %v1622_v14 = vmul.f32 1.442695, %v1581_v7 }
 0x337   :  { %5548 = vst [vmem:[#allocation62_spill] sm:$0xff] %v4473_v21  ;;  %v1697_v27 = vmul.f32 0.6931472, %v2936_v58  ;;  %vm1702_vm8 = vcmp.lt.f32.partialorder %v1701_v19, 0.0004427343  ;;  %v1708_v2 = vadd.f32 1.0, %v1707_v12  ;;  %vm1480_vm9 = vcmp.ne.f32.partialorder %v4337_v20, %v4337_v20 }
 0x338   :  { %v4486_v32 = vadd.f32 -0.9189385, %v5552_v26  ;;  %v4488_v45 = vpop.eup %2937  ;;  %2953 = vlog2.f32 %v1713_v55  ;;  %v1550_v22 = vand.u32 2147483647, %v4461_v50  ;;  %v5553_v7 = vmax.f32 %v4025_v6, 0.0 }
 0x339   :  { %v4491_v10 = vpop.eup %2939  ;;  %v1703_v18 = vsel %vm1702_vm8, %v1700_v33, %v1697_v27  ;;  %v1722_v28 = vadd.f32 1.0, %v4488_v45  ;;  %v1716_v19 = vmul.f32 -0.5, %v4467_v54  ;;  %2955 = vpow2.f32 %v1622_v14 }
 0x33a   :  { %v4496_v24 = vpop.eup %2941  ;;  %v1959_v58 = vadd.f32 %v1703_v18, %v5553_v7  ;;  %v1582_v12 = vsub.f32 0.0, %v1550_v22  ;;  %v1710_v27 = vand.u32 2147483647, %v4437_v51  ;;  %v1709_v7 = vmul.f32 %v4437_v51, %v1708_v2 }
 0x33b   :  { %v4503_v55 = vpop.eup %2943  ;;  %2957 = vlog2.f32 %v1722_v28  ;;  %v5555_v21 = vsub.f32 0.6931472, %v5554_v39  ;;  %v1725_v28 = vmul.f32 -0.5, %v4488_v45  ;;  %v4521_v44 = vmul.f32 -2.0, %v4465_v23 }
 0x33c   :  { %v4508_v26 = vpop.eup %2945  ;;  %v1991_v18 = vsel %vm1479_vm7, %v4025_v6, %v1959_v58  ;;  %v1731_v22 = vadd.f32 1.0, %v4503_v55  ;;  %v1624_v52 = vmul.f32 1.442695, %v1582_v12  ;;  %v1717_v4 = vadd.f32 1.0, %v1716_v19  ;;  %v5556_v58 = vld [vmem:[#allocation21_spill] sm:$0xff] }
 0x33d   :  { %v2948_v38 = vpop.eup %2947  ;;  %v2023_v33 = vsub.f32 %v5555_v21, %v1991_v18  ;;  %v1734_v6 = vmul.f32 -0.5, %v4503_v55  ;;  %vm1711_vm10 = vcmp.lt.f32.partialorder %v1710_v27, 0.0004427343  ;;  %vm1481_vm11 = vcmp.ne.f32.partialorder %v4356_v15, %v4356_v15  ;;  %v5557_v21 = vld [vmem:[#allocation65_spill] sm:$0xff] }
 0x33e   :  { %v1706_v3 = vmul.f32 0.6931472, %v2948_v38  ;;  %2959 = vlog2.f32 %v1731_v22  ;;  %v4524_v51 = vpop.eup %2949  ;;  %v5558_v18 = vsub.f32 %v5556_v58, %v5557_v21  ;;  %v1719_v19 = vand.u32 2147483647, %v4467_v54 }
 0x33f   :  { %v2055_v2 = vmul.f32 2.0, %v2023_v33  ;;  %2961 = vpow2.f32 %v1624_v52  ;;  %v4533_v12 = vpop.eup %2951  ;;  %v1728_v22 = vand.u32 2147483647, %v4488_v45  ;;  %v1551_v39 = vand.u32 2147483647, %v4521_v44  ;;  %v5559_v33 = vld [vmem:[#allocation63_spill] sm:$0xff] }
 0x340   :  { %v4531_v14 = vadd.f32 -0.9189385, %v5558_v18  ;;  %v1712_v38 = vsel %vm1711_vm10, %v1709_v7, %v1706_v3  ;;  %v1726_v62 = vadd.f32 1.0, %v1725_v28  ;;  %v1740_v48 = vadd.f32 1.0, %v4533_v12  ;;  %v5560_v7 = vld [vmem:[#allocation81_spill] sm:$0xff] }
 0x341   :  { %v2087_v27 = vsub.f32 %v5559_v33, %v2055_v2  ;;  %v1960_v13 = vadd.f32 %v1712_v38, %v1448_v60  ;;  %v1718_v58 = vmul.f32 %v4467_v54, %v1717_v4  ;;  %vm1482_vm12 = vcmp.ne.f32.partialorder %v4376_v57, %v4376_v57 }
 0x342   :  { %v2954_v46 = vpop.eup %2953  ;;  %v1735_v52 = vadd.f32 1.0, %v1734_v6  ;;  %v1583_v3 = vsub.f32 0.0, %v1551_v39  ;;  %v4545_v21 = vadd.f32 %v4231_v37, %v5560_v7  ;;  %2963 = vlog2.f32 %v1740_v48 }
 0x343   :  { %2122 = vadd.xlane.f32.xlu1 %v2087_v27  ;;  %v1992_v60 = vsel %vm1480_vm9, %v4337_v20, %v1960_v13  ;;  %v1715_v28 = vmul.f32 0.6931472, %v2954_v46  ;;  %v4552_v2 = vmul.f32 -2.0, %v4477_v56  ;;  %v4554_v4 = vpop.eup %2955  ;;  %v5562_v54 = vsub.f32 0.6931472, %v3931_v35 }
 0x344   :  { %5561 = vst [vmem:[#allocation34_spill] sm:$0xff] %v4545_v21  ;;  %vm1720_vm13 = vcmp.lt.f32.partialorder %v1719_v19, 0.0004427343  ;;  %v1737_v37 = vand.u32 2147483647, %v4503_v55  ;;  %v1452_v6 = vmax.f32 %v4422_v40, 0.0  ;;  %v1727_v33 = vmul.f32 %v4488_v45, %v1726_v62 }
 0x345   :  { %v2024_v39 = vsub.f32 %v5562_v54, %v1992_v60  ;;  %v2958_v18 = vpop.eup %2957  ;;  %v1721_v38 = vsel %vm1720_vm13, %v1718_v58, %v1715_v28  ;;  %vm1483_vm14 = vcmp.ne.f32.partialorder %v4391_v8, %v4391_v8  ;;  %v1743_v46 = vmul.f32 -0.5, %v4533_v12  ;;  %v5564_v45 = vld [vmem:[#allocation66_spill] sm:$0xff] }
 0x346   :  { %v1749_v20 = vadd.f32 1.0, %v4554_v4  ;;  %v5563_v48 = vmax.f32 %v4356_v15, 0.0  ;;  %v1724_v19 = vmul.f32 0.6931472, %v2958_v18  ;;  %v1626_v7 = vmul.f32 1.442695, %v1583_v3 }
 0x347   :  { %v2056_v13 = vmul.f32 2.0, %v2024_v39  ;;  %vm1729_vm15 = vcmp.lt.f32.partialorder %v1728_v22, 0.0004427343  ;;  %v1736_v60 = vmul.f32 %v4503_v55, %v1735_v52  ;;  %v1560_v58 = vand.u32 2147483647, %v4552_v2 }
 0x348   :  { %v1961_v27 = vadd.f32 %v1721_v38, %v5563_v48  ;;  %2965 = vlog2.f32 %v1749_v20  ;;  %v2960_v62 = vpop.eup %2959  ;;  %v1730_v39 = vsel %vm1729_vm15, %v1727_v33, %v1724_v19  ;;  %v1746_v35 = vand.u32 2147483647, %v4533_v12 }
 0x349   :  { %v2088_v28 = vsub.f32 %v5564_v45, %v2056_v13  ;;  %v4575_v38 = vpop.eup %2961  ;;  %v5565_v22 = vsub.f32 0.6931472, %v4344_v16  ;;  %v5566_v55 = vmax.f32 %v4376_v57, 0.0  ;;  %v1733_v18 = vmul.f32 0.6931472, %v2960_v62 }
 0x34a   :  { %v1993_v54 = vsel %vm1481_vm11, %v4356_v15, %v1961_v27  ;;  %v1744_v20 = vadd.f32 1.0, %v1743_v46  ;;  %vm1738_vm0 = vcmp.lt.f32.partialorder %v1737_v37, 0.0004427343  ;;  %v1752_v13 = vmul.f32 -0.5, %v4554_v4  ;;  %v5575_v37 = vld [vmem:[#allocation87_spill] sm:$0xff] }
 0x34b   :  { %v2025_v3 = vsub.f32 %v5565_v22, %v1993_v54  ;;  %v1962_v52 = vadd.f32 %v1730_v39, %v5566_v55  ;;  %2124 = vadd.xlane.f32.xlu0 %v2088_v28  ;;  %v1758_v48 = vadd.f32 1.0, %v4575_v38  ;;  %2967 = vpow2.f32 %v1626_v7  ;;  %v5571_v28 = vld [vmem:[#allocation70_spill] sm:$0xff] }
 0x34c   :  { %v1739_v27 = vsel %vm1738_vm0, %v1736_v60, %v1733_v18  ;;  %v1592_v19 = vsub.f32 0.0, %v1560_v58  ;;  %v5567_v45 = vsub.f32 0.6931472, %v4360_v34  ;;  %v5568_v46 = vmax.f32 %v4391_v8, 0.0  ;;  %v2964_v7 = vpop.eup %2963 }
 0x34d   :  { %v2057_v15 = vmul.f32 2.0, %v2025_v3  ;;  %v1994_v33 = vsel %vm1482_vm12, %v4376_v57, %v1962_v52  ;;  %vm4591_vm1 = vcmp.lt.f32.partialorder %v1746_v35, 0.0004427343  ;;  %2969 = vlog2.f32 %v1758_v48 }
 0x34e   :  { %v2026_v54 = vsub.f32 %v5567_v45, %v1994_v33  ;;  %v1963_v62 = vadd.f32 %v1739_v27, %v5568_v46  ;;  %v1745_v22 = vmul.f32 %v4533_v12, %v1744_v20  ;;  %v1755_v57 = vand.u32 2147483647, %v4554_v4  ;;  %v5573_v20 = vld [vmem:[#allocation71_spill] sm:$0xff] }
 0x34f   :  { %v2089_v39 = vsub.f32 %v5571_v28, %v2057_v15  ;;  %v1644_v60 = vmul.f32 1.442695, %v1592_v19  ;;  %v1742_v55 = vmul.f32 0.6931472, %v2964_v7  ;;  %v1753_v35 = vadd.f32 1.0, %v1752_v13 }
 0x350   :  { %v2058_v58 = vmul.f32 2.0, %v2026_v54  ;;  %v1995_v3 = vsel %vm1483_vm14, %v4391_v8, %v1963_v62  ;;  %v5572_v52 = vsub.f32 0.6931472, %v4365_v43  ;;  %v1761_v48 = vmul.f32 -0.5, %v4575_v38  ;;  %v5574_v8 = vld [vmem:[#allocation84_spill] sm:$0xff] }
 0x351   :  { %2126 = vadd.xlane.f32.xlu1 %v2089_v39  ;;  %2971 = vpow2.f32 %v1644_v60  ;;  %v4606_v12 = vmul.f32 -2.0, %v4545_v21  ;;  %v1388_v33 = vsub.f32 0.6931472, %v4384_v36  ;;  %v1748_v27 = vsel %vm4591_vm1, %v1745_v22, %v1742_v55 }
 0x352   :  { %v2027_v18 = vsub.f32 %v5572_v52, %v1995_v3  ;;  %v2090_v15 = vsub.f32 %v5573_v20, %v2058_v58  ;;  %v4614_v13 = vadd.f32 %v4238_v63, %v5574_v8  ;;  %v2966_v19 = vpop.eup %2965  ;;  %vm1484_vm2 = vcmp.ne.f32.partialorder %v4422_v40, %v4422_v40 }
 0x353   :  { %v1964_v54 = vadd.f32 %v1748_v27, %v1452_v6  ;;  %v1453_v46 = vmax.f32 %v4443_v53, 0.0  ;;  %v1751_v62 = vmul.f32 0.6931472, %v2966_v19  ;;  %v1754_v7 = vmul.f32 %v4554_v4, %v1753_v35 }
 0x354   :  { %v2059_v45 = vmul.f32 2.0, %v2027_v18  ;;  %2128 = vadd.xlane.f32.xlu0 %v2090_v15  ;;  %v1561_v28 = vand.u32 2147483647, %v4606_v12  ;;  %v4623_v39 = vadd.f32 %v4286_v17, %v5575_v37  ;;  %vm1756_vm3 = vcmp.lt.f32.partialorder %v1755_v57, 0.0004427343 }
 0x355   :  { %v1996_v22 = vsel %vm1484_vm2, %v4422_v40, %v1964_v54  ;;  %v1762_v60 = vadd.f32 1.0, %v1761_v48  ;;  %v4627_v58 = vpop.eup %2967  ;;  %v1757_v3 = vsel %vm1756_vm3, %v1754_v7, %v1751_v62  ;;  %v1764_v55 = vand.u32 2147483647, %v4575_v38  ;;  %v5577_v54 = vld [vmem:[#allocation69_spill] sm:$0xff] }
 0x356   :  { %v2091_v63 = vsub.f32 %v4486_v32, %v2059_v45  ;;  %v2028_v6 = vsub.f32 %v1388_v33, %v1996_v22  ;;  %v1593_v52 = vsub.f32 0.0, %v1561_v28  ;;  %v1389_v4 = vsub.f32 0.6931472, %v4426_v31  ;;  %v5576_v45 = vld [vmem:[#allocation23_spill] sm:$0xff]  ;;  %v3117_v22 = vld [vmem:[%s5309_s1 + $0x98] sm:$0xff] }
 0x357   :  { %v1965_v35 = vadd.f32 %v1757_v3, %v1453_v46  ;;  %v1767_v17 = vadd.f32 1.0, %v4627_v58  ;;  %v4633_v18 = vmul.f32 -2.0, %v4614_v13  ;;  %v2970_v32 = vpop.eup %2969  ;;  %vm1485_vm4 = vcmp.ne.f32.partialorder %v4443_v53, %v4443_v53 }
 0x358   :  { %2130 = vadd.xlane.f32.xlu1 %v2091_v63  ;;  %v2060_v40 = vmul.f32 2.0, %v2028_v6  ;;  %v1454_v57 = vmax.f32 %v4461_v50, 0.0  ;;  %v1646_v48 = vmul.f32 1.442695, %v1593_v52  ;;  %v1760_v15 = vmul.f32 0.6931472, %v2970_v32 }
 0x359   :  { %v1997_v20 = vsel %vm1485_vm4, %v4443_v53, %v1965_v35  ;;  %v1763_v33 = vmul.f32 %v4575_v38, %v1762_v60  ;;  %2973 = vlog2.f32 %v1767_v17  ;;  %vm1765_vm5 = vcmp.lt.f32.partialorder %v1764_v55, 0.0004427343  ;;  %v4664_v55 = vld [vmem:[%s5309_s1 + $0xe8] sm:$0xff] }
 0x35a   :  { %v2092_v27 = vsub.f32 %v4531_v14, %v2060_v40  ;;  %v2029_v8 = vsub.f32 %v1389_v4, %v1997_v20  ;;  %2975 = vpow2.f32 %v1646_v48  ;;  %v5578_v46 = vsub.f32 %v5576_v45, %v5577_v54  ;;  %v5580_v17 = vld [vmem:[#allocation72_spill] sm:$0xff] }
 0x35b   :  { %v4641_v19 = vpop.eup %2971  ;;  %v1766_v7 = vsel %vm1765_vm5, %v1763_v33, %v1760_v15  ;;  %v1552_v28 = vand.u32 2147483647, %v4633_v18  ;;  %v4648_v53 = vmul.f32 -2.0, %v4623_v39  ;;  %v1770_v14 = vmul.f32 -0.5, %v4627_v58 }
 0x35c   :  { %v2404_v62 = vadd.f32 -0.9189385, %v5578_v46  ;;  %2132 = vadd.xlane.f32.xlu0 %v2092_v27  ;;  %v2061_v38 = vmul.f32 2.0, %v2029_v8  ;;  %v1966_v37 = vadd.f32 %v1766_v7, %v1454_v57  ;;  %v1848_v63 = vadd.f32 1.0, %v4641_v19  ;;  %v5582_v27 = vld [vmem:[#allocation85_spill] sm:$0xff]  ;;  %v5583_v8 = vld [vmem:[#allocation88_spill] sm:$0xff] }
 0x35d   :  { %v4656_v60 = vmul.f32 %v3117_v22, %v4491_v10  ;;  %v1390_v6 = vsub.f32 0.6931472, %v4447_v25  ;;  %vm1486_vm6 = vcmp.ne.f32.partialorder %v4461_v50, %v4461_v50  ;;  %v1584_v3 = vsub.f32 0.0, %v1552_v28  ;;  %v5579_v10 = vld [vmem:[#allocation24_spill] sm:$0xff]  ;;  %v5585_v28 = vld [vmem:[#allocation77_spill] sm:$0xff] }
 0x35e   :  { %v4668_v52 = vmul.f32 %v4664_v55, %v4496_v24  ;;  %v2093_v4 = vsub.f32 %v2404_v62, %v2061_v38  ;;  %v1998_v35 = vsel %vm1486_vm6, %v4461_v50, %v1966_v37  ;;  %2977 = vlog2.f32 %v1848_v63  ;;  %v4688_v62 = vld [vmem:[%s5309_s1 + $0xf0] sm:$0xff] }
 0x35f   :  { %v5581_v32 = vsub.f32 %v5579_v10, %v5580_v17  ;;  %v2030_v57 = vsub.f32 %v1390_v6, %v1998_v35  ;;  %v1628_v48 = vmul.f32 1.442695, %v1584_v3  ;;  %v1553_v20 = vand.u32 2147483647, %v4648_v53 }
 0x360   :  { %2134 = vadd.xlane.f32.xlu1 %v2093_v4  ;;  %v1771_v15 = vadd.f32 1.0, %v1770_v14  ;;  %v1773_v33 = vand.u32 2147483647, %v4627_v58  ;;  %v4678_v24 = vadd.f32 %v4250_v11, %v5582_v27  ;;  %v4682_v50 = vadd.f32 %v4292_v9, %v5583_v8  ;;  %v5584_v11 = vld [vmem:[#allocation26_spill] sm:$0xff]  ;;  %v5588_v27 = vld [vmem:[#allocation25_spill] sm:$0xff] }
 0x361   :  { %v2405_v40 = vadd.f32 -0.9189385, %v5581_v32  ;;  %v2062_v45 = vmul.f32 2.0, %v2030_v57  ;;  %v1851_v54 = vmul.f32 -0.5, %v4641_v19  ;;  %2979 = vpow2.f32 %v1628_v48  ;;  %v5587_v4 = vld [vmem:[#allocation90_spill] sm:$0xff] }
 0x362   :  { %v1585_v46 = vsub.f32 0.0, %v1553_v20  ;;  %v4692_v7 = vmul.f32 %v4688_v62, %v4508_v26  ;;  %v5586_v38 = vsub.f32 %v5584_v11, %v5585_v28  ;;  %v1455_v9 = vmax.f32 %v4521_v44, 0.0  ;;  %v5589_v8 = vld [vmem:[#allocation74_spill] sm:$0xff] }
 0x363   :  { %v4699_v14 = vmul.f32 -2.0, %v4678_v24  ;;  %v2974_v63 = vpop.eup %2973  ;;  %v2094_v22 = vsub.f32 %v2405_v40, %v2062_v45  ;;  %v1854_v6 = vand.u32 2147483647, %v4641_v19  ;;  %v4704_v35 = vadd.f32 %v4304_v59, %v5587_v4 }
 0x364   :  { %v2406_v37 = vadd.f32 -0.9189385, %v5586_v38  ;;  %v1630_v3 = vmul.f32 1.442695, %v1585_v46  ;;  %v4706_v26 = vpop.eup %2975  ;;  %v1769_v10 = vmul.f32 0.6931472, %v2974_v63  ;;  %v1772_v17 = vmul.f32 %v4627_v58, %v1771_v15 }
 0x365   :  { %v1562_v32 = vand.u32 2147483647, %v4699_v14  ;;  %v4711_v57 = vmul.f32 -2.0, %v4682_v50  ;;  %2136 = vadd.xlane.f32.xlu0 %v2094_v22  ;;  %vm1774_vm7 = vcmp.lt.f32.partialorder %v1773_v33, 0.0004427343  ;;  %v1852_v40 = vadd.f32 1.0, %v1851_v54 }
 0x366   :  { %v1857_v48 = vadd.f32 1.0, %v4706_v26  ;;  %2981 = vpow2.f32 %v1630_v3  ;;  %v1391_v20 = vsub.f32 0.6931472, %v4465_v23  ;;  %v1775_v59 = vsel %vm1774_vm7, %v1772_v17, %v1769_v10 }
 0x367   :  { %v5590_v45 = vsub.f32 %v5588_v27, %v5589_v8  ;;  %v1594_v58 = vsub.f32 0.0, %v1562_v32  ;;  %vm1487_vm8 = vcmp.ne.f32.partialorder %v4521_v44, %v4521_v44  ;;  %v1967_v15 = vadd.f32 %v1775_v59, %v1455_v9 }
 0x368   :  { %v1464_v11 = vmax.f32 %v4552_v2, 0.0  ;;  %2983 = vlog2.f32 %v1857_v48  ;;  %v2978_v33 = vpop.eup %2977  ;;  %vm4723_vm9 = vcmp.lt.f32.partialorder %v1854_v6, 0.0004427343  ;;  %v1563_v38 = vand.u32 2147483647, %v4711_v57 }
 0x369   :  { %v4718_v46 = vadd.f32 -0.9189385, %v5590_v45  ;;  %v1648_v28 = vmul.f32 1.442695, %v1594_v58  ;;  %v4730_v63 = vadd.f32 %v4332_v41, %v4194_v29  ;;  %v1999_v22 = vsel %vm1487_vm8, %v4521_v44, %v1967_v15  ;;  %v5593_v41 = vld [vmem:[#allocation30_spill] sm:$0xff]  ;;  %v5594_v44 = vld [vmem:[#allocation80_spill] sm:$0xff] }
 0x36a   :  { %v1850_v3 = vmul.f32 0.6931472, %v2978_v33  ;;  %v1853_v9 = vmul.f32 %v4641_v19, %v1852_v40  ;;  %v4735_v4 = vmul.f32 -2.0, %v4704_v35  ;;  %v2031_v10 = vsub.f32 %v1391_v20, %v1999_v22 }
 0x36b   :  { %v1860_v6 = vmul.f32 -0.5, %v4706_v26  ;;  %2985 = vpow2.f32 %v1648_v28  ;;  %v1595_v17 = vsub.f32 0.0, %v1563_v38  ;;  %v4738_v32 = vpop.eup %2979  ;;  %v1400_v48 = vsub.f32 0.6931472, %v4477_v56 }
 0x36c   :  { %v1856_v29 = vsel %vm4723_vm9, %v1853_v9, %v1850_v3  ;;  %v5595_v59 = vsub.f32 %v5593_v41, %v5594_v44  ;;  %v1554_v19 = vand.u32 2147483647, %v4735_v4  ;;  %v2063_v40 = vmul.f32 2.0, %v2031_v10 }
 0x36d   :  { %v1976_v20 = vadd.f32 %v1856_v29, %v1464_v11  ;;  %v1401_v8 = vsub.f32 0.6931472, %v4545_v21  ;;  %v1776_v45 = vadd.f32 1.0, %v4738_v32  ;;  %vm1496_vm10 = vcmp.ne.f32.partialorder %v4552_v2, %v4552_v2 }
 0x36e   :  { %v4746_v27 = vadd.f32 -0.9189385, %v5595_v59  ;;  %v1863_v58 = vand.u32 2147483647, %v4706_v26  ;;  %v1650_v15 = vmul.f32 1.442695, %v1595_v17  ;;  %v2095_v54 = vsub.f32 %v2406_v37, %v2063_v40 }
 0x36f   :  { %v1586_v33 = vsub.f32 0.0, %v1554_v19  ;;  %v2008_v28 = vsel %vm1496_vm10, %v4552_v2, %v1976_v20  ;;  %v1861_v38 = vadd.f32 1.0, %v1860_v6  ;;  %2987 = vlog2.f32 %v1776_v45  ;;  %v5596_v17 = vld [vmem:[#allocation31_spill] sm:$0xff]  ;;  %v5597_v37 = vld [vmem:[#allocation82_spill] sm:$0xff] }
 0x370   :  { %v4755_v22 = vpop.eup %2981  ;;  %v2040_v3 = vsub.f32 %v1400_v48, %v2008_v28  ;;  %2989 = vpow2.f32 %v1650_v15  ;;  %v4758_v9 = vmul.f32 -2.0, %v4730_v63  ;;  %2138 = vadd.xlane.f32.xlu1 %v2095_v54  ;;  %v1465_v10 = vmax.f32 %v4606_v12, 0.0 }
 0x371   :  { %v1632_v11 = vmul.f32 1.442695, %v1586_v33  ;;  %vm1497_vm11 = vcmp.ne.f32.partialorder %v4606_v12, %v4606_v12  ;;  %v5598_v29 = vsub.f32 %v5596_v17, %v5597_v37  ;;  %v1785_v6 = vadd.f32 1.0, %v4755_v22  ;;  %v5599_v33 = vld [vmem:[#allocation91_spill] sm:$0xff] }
 0x372   :  { %v2984_v41 = vpop.eup %2983  ;;  %v2072_v48 = vmul.f32 2.0, %v2040_v3  ;;  %v1779_v59 = vmul.f32 -0.5, %v4738_v32  ;;  %v1862_v40 = vmul.f32 %v4706_v26, %v1861_v38  ;;  %vm1864_vm12 = vcmp.lt.f32.partialorder %v1863_v58, 0.0004427343  ;;  %v5602_v58 = vld [vmem:[#allocation15_spill] sm:$0xff] }
 0x373   :  { %v4766_v2 = vadd.f32 -0.9189385, %v5598_v29  ;;  %2991 = vpow2.f32 %v1632_v11  ;;  %v1859_v19 = vmul.f32 0.6931472, %v2984_v41  ;;  %v1788_v45 = vmul.f32 -0.5, %v4755_v22  ;;  %v5600_v11 = vld [vmem:[#allocation12_spill] sm:$0xff] }
 0x374   :  { %2993 = vlog2.f32 %v1785_v6  ;;  %v2104_v20 = vsub.f32 %v4718_v46, %v2072_v48  ;;  %v1555_v15 = vand.u32 2147483647, %v4758_v9  ;;  %v4777_v54 = vadd.f32 %v4308_v5, %v5599_v33  ;;  %v5605_v33 = vld [vmem:[#allocation83_spill] sm:$0xff] }
 0x375   :  { %v4779_v28 = vpop.eup %2985  ;;  %v1865_v3 = vsel %vm1864_vm12, %v1862_v40, %v1859_v19  ;;  %v5601_v17 = vsub.f32 %v5489_v1, %v5600_v11  ;;  %v4789_v46 = vadd.f32 %v4368_v49, %v5602_v58  ;;  %v1456_v29 = vmax.f32 %v4633_v18, 0.0 }
 0x376   :  { %2156 = vadd.xlane.f32.xlu0 %v2104_v20  ;;  %v1977_v38 = vadd.f32 %v1865_v3, %v1465_v10  ;;  %v1780_v5 = vadd.f32 1.0, %v1779_v59  ;;  %v1866_v6 = vadd.f32 1.0, %v4779_v28  ;;  %vm1488_vm13 = vcmp.ne.f32.partialorder %v4633_v18, %v4633_v18  ;;  %v5604_v20 = vld [vmem:[#allocation38_spill] sm:$0xff] }
 0x377   :  { %v4784_v37 = vadd.f32 -0.9189385, %v5601_v17  ;;  %5603 = vst [vmem:[#allocation73_spill] sm:$0xff] %v4789_v46  ;;  %v1782_v1 = vand.u32 2147483647, %v4738_v32  ;;  %v1587_v41 = vsub.f32 0.0, %v1555_v15  ;;  %v5606_v3 = vsub.f32 %v5604_v20, %v5605_v33 }
 0x378   :  { %v4797_v48 = vmul.f32 -2.0, %v4777_v54  ;;  %v2009_v49 = vsel %vm1497_vm11, %v4606_v12, %v1977_v38  ;;  %v1457_v10 = vmax.f32 %v4648_v53, 0.0  ;;  %v1789_v19 = vadd.f32 1.0, %v1788_v45 }
 0x379   :  { %2995 = vlog2.f32 %v1866_v6  ;;  %v2988_v59 = vpop.eup %2987  ;;  %v2041_v40 = vsub.f32 %v1401_v8, %v2009_v49  ;;  %v4807_v11 = vadd.f32 -0.9189385, %v5606_v3  ;;  %v1634_v17 = vmul.f32 1.442695, %v1587_v41 }
 0x37a   :  { %v4810_v58 = vpop.eup %2989  ;;  %v1778_v26 = vmul.f32 0.6931472, %v2988_v59  ;;  %v1781_v44 = vmul.f32 %v4738_v32, %v1780_v5  ;;  %vm1489_vm14 = vcmp.ne.f32.partialorder %v4648_v53, %v4648_v53  ;;  %v1869_v12 = vmul.f32 -0.5, %v4779_v28 }
 0x37b   :  { %v1564_v8 = vand.u32 2147483647, %v4797_v48  ;;  %v2073_v45 = vmul.f32 2.0, %v2041_v40  ;;  %vm1783_vm15 = vcmp.lt.f32.partialorder %v1782_v1, 0.0004427343  ;;  %v1875_v6 = vadd.f32 1.0, %v4810_v58 }
 0x37c   :  { %v1791_v38 = vand.u32 2147483647, %v4755_v22  ;;  %v1784_v41 = vsel %vm1783_vm15, %v1781_v44, %v1778_v26  ;;  %v1790_v59 = vmul.f32 %v4755_v22, %v1789_v19  ;;  %2997 = vpow2.f32 %v1634_v17 }
 0x37d   :  { %v4819_v49 = vpop.eup %2991  ;;  %v1596_v32 = vsub.f32 0.0, %v1564_v8  ;;  %v2105_v20 = vsub.f32 %v4746_v27, %v2073_v45  ;;  %v1968_v33 = vadd.f32 %v1784_v41, %v1456_v29  ;;  %v1872_v3 = vand.u32 2147483647, %v4779_v28 }
 0x37e   :  { %v2994_v5 = vpop.eup %2993  ;;  %2999 = vlog2.f32 %v1875_v6  ;;  %v1870_v1 = vadd.f32 1.0, %v1869_v12  ;;  %v1794_v15 = vadd.f32 1.0, %v4819_v49  ;;  %v4826_v21 = vmul.f32 -2.0, %v4789_v46 }
 0x37f   :  { %v1787_v40 = vmul.f32 0.6931472, %v2994_v5  ;;  %2158 = vadd.xlane.f32.xlu1 %v2105_v20  ;;  %v2000_v22 = vsel %vm1488_vm13, %v4633_v18, %v1968_v33  ;;  %vm1792_vm0 = vcmp.lt.f32.partialorder %v1791_v38, 0.0004427343  ;;  %v1878_v27 = vmul.f32 -0.5, %v4810_v58  ;;  %v5610_v5 = vld [vmem:[#allocation93_spill] sm:$0xff] }
 0x380   :  { %v1652_v44 = vmul.f32 1.442695, %v1596_v32  ;;  %v5607_v26 = vsub.f32 0.6931472, %v4614_v13  ;;  %v1403_v17 = vsub.f32 0.6931472, %v4682_v50  ;;  %3001 = vlog2.f32 %v1794_v15 }
 0x381   :  { %v1793_v19 = vsel %vm1792_vm0, %v1790_v59, %v1787_v40  ;;  %v1466_v8 = vmax.f32 %v4699_v14, 0.0  ;;  %v1797_v45 = vmul.f32 -0.5, %v4819_v49  ;;  %v1871_v18 = vmul.f32 %v4779_v28, %v1870_v1 }
 0x382   :  { %v2032_v29 = vsub.f32 %v5607_v26, %v2000_v22  ;;  %v1969_v12 = vadd.f32 %v1793_v19, %v1457_v10  ;;  %3003 = vpow2.f32 %v1652_v44  ;;  %vm4839_vm1 = vcmp.lt.f32.partialorder %v1872_v3, 0.0004427343 }
 0x383   :  { %v2996_v6 = vpop.eup %2995  ;;  %v1565_v32 = vand.u32 2147483647, %v4826_v21  ;;  %v1879_v59 = vadd.f32 1.0, %v1878_v27  ;;  %v4850_v20 = vadd.f32 %v4407_v47, %v5610_v5  ;;  %v5612_v28 = vsub.f32 0.6931472, %v4623_v39 }
 0x384   :  { %v2064_v41 = vmul.f32 2.0, %v2032_v29  ;;  %v2001_v10 = vsel %vm1489_vm14, %v4648_v53, %v1969_v12  ;;  %v1868_v15 = vmul.f32 0.6931472, %v2996_v6  ;;  %v4857_v1 = vadd.f32 %v4440_v30, %v4256_v42 }
 0x385   :  { %5611 = vst [vmem:[#allocation35_spill] sm:$0xff] %v4850_v20  ;;  %v2033_v3 = vsub.f32 %v5612_v28, %v2001_v10  ;;  %v1597_v40 = vsub.f32 0.0, %v1565_v32  ;;  %vm1498_vm2 = vcmp.ne.f32.partialorder %v4699_v14, %v4699_v14  ;;  %v1881_v22 = vand.u32 2147483647, %v4810_v58 }
 0x386   :  { %v2096_v33 = vsub.f32 %v4766_v2, %v2064_v41  ;;  %5613 = vst [vmem:[#allocation75_spill] sm:$0xff] %v4857_v1  ;;  %v1874_v53 = vsel %vm4839_vm1, %v1871_v18, %v1868_v15  ;;  %v1798_v47 = vadd.f32 1.0, %v1797_v45  ;;  %v4864_v27 = vpop.eup %2997  ;;  %v4867_v29 = vmul.f32 -2.0, %v4850_v20 }
 0x387   :  { %v2065_v2 = vmul.f32 2.0, %v2033_v3  ;;  %v1978_v44 = vadd.f32 %v1874_v53, %v1466_v8  ;;  %v1654_v26 = vmul.f32 1.442695, %v1597_v40  ;;  %v1467_v30 = vmax.f32 %v4711_v57, 0.0 }
 0x388   :  { %2140 = vadd.xlane.f32.xlu0 %v2096_v33  ;;  %v3000_v42 = vpop.eup %2999  ;;  %v1880_v19 = vmul.f32 %v4810_v58, %v1879_v59  ;;  %v1800_v12 = vand.u32 2147483647, %v4819_v49  ;;  %v1803_v6 = vadd.f32 1.0, %v4864_v27  ;;  %v5614_v18 = vsub.f32 0.6931472, %v4678_v24 }
 0x389   :  { %v2097_v45 = vsub.f32 %v4784_v37, %v2065_v2  ;;  %v2010_v8 = vsel %vm1498_vm2, %v4699_v14, %v1978_v44  ;;  %v1877_v41 = vmul.f32 0.6931472, %v3000_v42  ;;  %3005 = vpow2.f32 %v1654_v26  ;;  %v5615_v2 = vld [vmem:[#allocation40_spill] sm:$0xff] }
 0x38a   :  { %v2042_v38 = vsub.f32 %v5614_v18, %v2010_v8  ;;  %vm1499_vm3 = vcmp.ne.f32.partialorder %v4711_v57, %v4711_v57  ;;  %vm1882_vm4 = vcmp.lt.f32.partialorder %v1881_v22, 0.0004427343  ;;  %3007 = vlog2.f32 %v1803_v6  ;;  %v3002_v58 = vpop.eup %3001 }
 0x38b   :  { %2142 = vadd.xlane.f32.xlu1 %v2097_v45  ;;  %v1883_v32 = vsel %vm1882_vm4, %v1880_v19, %v1877_v41  ;;  %v1458_v37 = vmax.f32 %v4735_v4, 0.0  ;;  %v1799_v10 = vmul.f32 %v4819_v49, %v1798_v47  ;;  %v1556_v15 = vand.u32 2147483647, %v4867_v29  ;;  %v5616_v49 = vld [vmem:[#allocation86_spill] sm:$0xff] }
 0x38c   :  { %v4885_v14 = vpop.eup %3003  ;;  %v2074_v59 = vmul.f32 2.0, %v2042_v38  ;;  %v1979_v5 = vadd.f32 %v1883_v32, %v1467_v30  ;;  %v1796_v33 = vmul.f32 0.6931472, %v3002_v58  ;;  %v4888_v28 = vmul.f32 -2.0, %v4857_v1 }
 0x38d   :  { %vm1801_vm5 = vcmp.lt.f32.partialorder %v1800_v12, 0.0004427343  ;;  %v1806_v3 = vmul.f32 -0.5, %v4864_v27  ;;  %v1884_v40 = vadd.f32 1.0, %v4885_v14  ;;  %v1588_v53 = vsub.f32 0.0, %v1556_v15  ;;  %v5619_v15 = vld [vmem:[#allocation68_spill] sm:$0xff] }
 0x38e   :  { %v2106_v22 = vsub.f32 %v4807_v11, %v2074_v59  ;;  %v5617_v47 = vsub.f32 %v5615_v2, %v5616_v49  ;;  %v2011_v26 = vsel %vm1499_vm3, %v4711_v57, %v1979_v5  ;;  %v1802_v42 = vsel %vm1801_vm5, %v1799_v10, %v1796_v33  ;;  %v5620_v33 = vld [vmem:[#allocation41_spill] sm:$0xff]  ;;  %v5623_v2 = vld [vmem:[#allocation43_spill] sm:$0xff] }
 0x38f   :  { %v2043_v30 = vsub.f32 %v1403_v17, %v2011_v26  ;;  %v1394_v19 = vsub.f32 0.6931472, %v4704_v35  ;;  %v1970_v12 = vadd.f32 %v1802_v42, %v1458_v37  ;;  %3009 = vlog2.f32 %v1884_v40  ;;  %v4913_v17 = vld [vmem:[%s5309_s1 + $0xf8] sm:$0xff]  ;;  %v5624_v49 = vld [vmem:[#allocation39_spill] sm:$0xff]  ;;  %s3199_s1 = smov [#allocation7]  }
 0x390   :  { %v2418_v44 = vadd.f32 -0.9189385, %v5617_v47  ;;  %2160 = vadd.xlane.f32.xlu0 %v2106_v22  ;;  %vm1490_vm6 = vcmp.ne.f32.partialorder %v4735_v4, %v4735_v4  ;;  %v1809_v11 = vand.u32 2147483647, %v4864_v27  ;;  %v1636_v6 = vmul.f32 1.442695, %v1588_v53 }
 0x391   :  { %v1557_v45 = vand.u32 2147483647, %v4888_v28  ;;  %v2075_v8 = vmul.f32 2.0, %v2043_v30  ;;  %v2002_v41 = vsel %vm1490_vm6, %v4735_v4, %v1970_v12  ;;  %v1807_v18 = vadd.f32 1.0, %v1806_v3  ;;  %v5621_v3 = vld [vmem:[#allocation89_spill] sm:$0xff]  ;;  %s2348_s13 = sshll.u32 %s3199_s1, 4  ;;  %s2349_s13 = int_to_ptr.vmem [resolvable:$true] %s2348_s13 }
 0x392   :  { %v4908_v57 = vadd.f32 %v4416_v61, %v4224_v0  ;;  %v2034_v38 = vsub.f32 %v1394_v19, %v2002_v41  ;;  %v1887_v58 = vmul.f32 -0.5, %v4885_v14  ;;  %3011 = vpow2.f32 %v1636_v6  ;;  %v5618_v61 = vld [vmem:[#allocation18_spill] sm:$0xff]  ;;  %s3164_s14 = scalar_lea.vmem %s2349_s13, 4096  ;;  %p3169_p3 = scmp.lt.s32.totalorder %s2349_s13, %s2349_s13 }
 0x393   :  { %v1589_v32 = vsub.f32 0.0, %v1557_v45  ;;  %v4916_v37 = vpop.eup %3005  ;;  %v4920_v4 = vmul.f32 %v4524_v51, %v4913_v17  ;;  %v2107_v10 = vsub.f32 %v2418_v44, %v2075_v8  ;;  %v4927_v59 = vadd.f32 %v5619_v15, %v5618_v61  ;;  %p3165_p2 = scmp.ne.s32.totalorder %s2349_s13, %s3164_s14  ;;  %p3170_p4 = scmp.lt.s32.totalorder %s3164_s14, %s3164_s14 }
 0x394   :  { %v4923_v0 = vmul.f32 -2.0, %v4908_v57  ;;  %v3008_v5 = vpop.eup %3007  ;;  %v5622_v40 = vsub.f32 %v5620_v33, %v5621_v3  ;;  %v2066_v22 = vmul.f32 2.0, %v2034_v38  ;;  %v5625_v47 = vsub.f32 %v5623_v2, %v5624_v49 }
 0x395   :  { %v1893_v51 = vadd.f32 1.0, %v4916_v37  ;;  %2162 = vadd.xlane.f32.xlu1 %v2107_v10  ;;  %v1459_v44 = vmax.f32 %v4758_v9, 0.0  ;;  %v1805_v42 = vmul.f32 0.6931472, %v3008_v5  ;;  %v1808_v30 = vmul.f32 %v4864_v27, %v1807_v18  ;;  %v5626_v18 = vld [vmem:[#allocation94_spill] sm:$0xff]  ;;  %v5628_v5 = vld [vmem:[#allocation97_spill] sm:$0xff]  ;;  %p3171_p5 = por %p3170_p4, %p3169_p3 }
 0x396   :  { %v2409_v53 = vadd.f32 -0.9189385, %v5622_v40  ;;  %v2410_v26 = vadd.f32 -0.9189385, %v5625_v47  ;;  %v1638_v19 = vmul.f32 1.442695, %v1589_v32  ;;  %vm1491_vm8 = vcmp.ne.f32.partialorder %v4758_v9, %v4758_v9 }
 0x397   :  { %vm1810_vm7 = vcmp.lt.f32.partialorder %v1809_v11, 0.0004427343  ;;  %v1888_v6 = vadd.f32 1.0, %v1887_v58  ;;  %3013 = vlog2.f32 %v1893_v51  ;;  %v1890_v8 = vand.u32 2147483647, %v4885_v14  ;;  %v5627_v58 = vld [vmem:[#allocation33_spill] sm:$0xff]  ;;  %p3172_p6 = pnand %p3171_p5, %p3165_p2 }
 0x398   :  { %v2098_v12 = vsub.f32 %v2409_v53, %v2066_v22  ;;  %v1811_v45 = vsel %vm1810_vm7, %v1808_v30, %v1805_v42  ;;  %3015 = vpow2.f32 %v1638_v19  ;;  %v1566_v41 = vand.u32 2147483647, %v4923_v0  ;;  %v5630_v42 = vld [vmem:[#allocation13_spill] sm:$0xff] }
 0x399   :  { %v1395_v38 = vsub.f32 0.6931472, %v4730_v63  ;;  %v1971_v10 = vadd.f32 %v1811_v45, %v1459_v44  ;;  %v1896_v61 = vmul.f32 -0.5, %v4916_v37  ;;  %v4943_v15 = vmul.f32 -2.0, %v4927_v59  ;;  %v3010_v27 = vpop.eup %3009  ;;  %v5629_v44 = vld [vmem:[#allocation42_spill] sm:$0xff] }
 0x39a   :  { %2144 = vadd.xlane.f32.xlu0 %v2098_v12  ;;  %v1598_v11 = vsub.f32 0.0, %v1566_v41  ;;  %v4949_v32 = vadd.f32 %v5627_v58, %v5626_v18  ;;  %v4953_v33 = vadd.f32 %v4656_v60, %v5628_v5  ;;  %v1468_v40 = vmax.f32 %v4797_v48, 0.0  ;;  %v5633_v18 = vld [vmem:[#allocation92_spill] sm:$0xff] }
 0x39b   :  { %v2003_v3 = vsel %vm1491_vm8, %v4758_v9, %v1971_v10  ;;  %v1886_v53 = vmul.f32 0.6931472, %v3010_v27  ;;  %v1889_v22 = vmul.f32 %v4885_v14, %v1888_v6  ;;  %vm1891_vm9 = vcmp.lt.f32.partialorder %v1890_v8, 0.0004427343 }
 0x39c   :  { %v2035_v2 = vsub.f32 %v1395_v38, %v2003_v3  ;;  %v1656_v49 = vmul.f32 1.442695, %v1598_v11  ;;  %v1567_v47 = vand.u32 2147483647, %v4943_v15  ;;  %v4959_v51 = vpop.eup %3011  ;;  %v5631_v30 = vsub.f32 %v5629_v44, %v5630_v42  ;;  %v5632_v11 = vld [vmem:[#allocation44_spill] sm:$0xff] }
 0x39d   :  { %v1404_v60 = vsub.f32 0.6931472, %v4777_v54  ;;  %v1892_v12 = vsel %vm1891_vm9, %v1889_v22, %v1886_v53  ;;  %v1897_v9 = vadd.f32 1.0, %v1896_v61  ;;  %v1812_v10 = vadd.f32 1.0, %v4959_v51 }
 0x39e   :  { %v2419_v19 = vadd.f32 -0.9189385, %v5631_v30  ;;  %v2067_v45 = vmul.f32 2.0, %v2035_v2  ;;  %v1980_v41 = vadd.f32 %v1892_v12, %v1468_v40  ;;  %v4967_v14 = vmul.f32 -2.0, %v4949_v32  ;;  %v5635_v12 = vld [vmem:[#allocation45_spill] sm:$0xff] }
 0x39f   :  { %vm1500_vm10 = vcmp.ne.f32.partialorder %v4797_v48, %v4797_v48  ;;  %v1899_v6 = vand.u32 2147483647, %v4916_v37  ;;  %3017 = vpow2.f32 %v1656_v49  ;;  %v1599_v8 = vsub.f32 0.0, %v1567_v47 }
 0x3a0   :  { %v2099_v38 = vsub.f32 %v2410_v26, %v2067_v45  ;;  %v2012_v27 = vsel %vm1500_vm10, %v4797_v48, %v1980_v41  ;;  %v5634_v61 = vsub.f32 %v5632_v11, %v5633_v18  ;;  %3019 = vlog2.f32 %v1812_v10  ;;  %v5636_v45 = vld [vmem:[#allocation16_spill] sm:$0xff] }
 0x3a1   :  { %v3014_v5 = vpop.eup %3013  ;;  %v2044_v3 = vsub.f32 %v1404_v60, %v2012_v27  ;;  %v1405_v40 = vsub.f32 0.6931472, %v4789_v46  ;;  %v1469_v53 = vmax.f32 %v4826_v21, 0.0  ;;  %v1658_v22 = vmul.f32 1.442695, %v1599_v8 }
 0x3a2   :  { %v2420_v58 = vadd.f32 -0.9189385, %v5634_v61  ;;  %v4978_v2 = vpop.eup %3015  ;;  %2146 = vadd.xlane.f32.xlu1 %v2099_v38  ;;  %v1895_v49 = vmul.f32 0.6931472, %v3014_v5  ;;  %v1898_v26 = vmul.f32 %v4916_v37, %v1897_v9  ;;  %v1558_v48 = vand.u32 2147483647, %v4967_v14 }
 0x3a3   :  { %v4983_v47 = vmul.f32 -2.0, %v4953_v33  ;;  %v2076_v44 = vmul.f32 2.0, %v2044_v3  ;;  %vm1900_vm11 = vcmp.lt.f32.partialorder %v1899_v6, 0.0004427343  ;;  %v1815_v42 = vmul.f32 -0.5, %v4959_v51  ;;  %v5638_v3 = vld [vmem:[#allocation95_spill] sm:$0xff] }
 0x3a4   :  { %v1821_v30 = vadd.f32 1.0, %v4978_v2  ;;  %v1901_v60 = vsel %vm1900_vm11, %v1898_v26, %v1895_v49  ;;  %v5637_v41 = vsub.f32 %v5635_v12, %v5636_v45  ;;  %3021 = vpow2.f32 %v1658_v22  ;;  %v5640_v26 = vld [vmem:[#allocation57_spill] sm:$0xff] }
 0x3a5   :  { %v1590_v8 = vsub.f32 0.0, %v1558_v48  ;;  %v2108_v37 = vsub.f32 %v2419_v19, %v2076_v44  ;;  %v1981_v9 = vadd.f32 %v1901_v60, %v1469_v53  ;;  %v1396_v38 = vsub.f32 0.6931472, %v4850_v20  ;;  %v5639_v19 = vld [vmem:[#allocation62_spill] sm:$0xff]  ;;  %v5642_v60 = vld [vmem:[#allocation20_spill] sm:$0xff] }
 0x3a6   :  { %v4990_v10 = vadd.f32 -0.9189385, %v5637_v41  ;;  %3023 = vlog2.f32 %v1821_v30  ;;  %vm1501_vm12 = vcmp.ne.f32.partialorder %v4826_v21, %v4826_v21  ;;  %v1818_v6 = vand.u32 2147483647, %v4959_v51  ;;  %v5641_v30 = vld [vmem:[#allocation49_spill] sm:$0xff]  ;;  %v5644_v41 = vld [vmem:[#allocation78_spill] sm:$0xff] }
 0x3a7   :  { %v1640_v27 = vmul.f32 1.442695, %v1590_v8  ;;  %v1559_v11 = vand.u32 2147483647, %v4983_v47  ;;  %2164 = vadd.xlane.f32.xlu0 %v2108_v37  ;;  %v2013_v18 = vsel %vm1501_vm12, %v4826_v21, %v1981_v9  ;;  %v1816_v61 = vadd.f32 1.0, %v1815_v42 }
 0x3a8   :  { %v1824_v5 = vmul.f32 -0.5, %v4978_v2  ;;  %v5001_v53 = vadd.f32 %v5639_v19, %v5638_v3  ;;  %v2045_v22 = vsub.f32 %v1405_v40, %v2013_v18  ;;  %v5005_v48 = vadd.f32 %v4668_v52, %v5640_v26 }
 0x3a9   :  { %3025 = vpow2.f32 %v1640_v27  ;;  %v1591_v49 = vsub.f32 0.0, %v1559_v11  ;;  %v5007_v44 = vpop.eup %3017  ;;  %v5643_v12 = vsub.f32 %v5641_v30, %v5642_v60  ;;  %v1397_v42 = vsub.f32 0.6931472, %v4857_v1 }
 0x3aa   :  { %v5016_v45 = vmul.f32 -2.0, %v5001_v53  ;;  %v5020_v40 = vadd.f32 %v4692_v7, %v5644_v41  ;;  %v3020_v8 = vpop.eup %3019  ;;  %v2077_v37 = vmul.f32 2.0, %v2045_v22  ;;  %v1460_v52 = vmax.f32 %v4867_v29, 0.0 }
 0x3ab   :  { %v5012_v21 = vadd.f32 -0.9189385, %v5643_v12  ;;  %vm1492_vm13 = vcmp.ne.f32.partialorder %v4867_v29, %v4867_v29  ;;  %v1902_v9 = vadd.f32 1.0, %v5007_v44  ;;  %v1814_v27 = vmul.f32 0.6931472, %v3020_v8  ;;  %v5646_v12 = vld [vmem:[#allocation17_spill] sm:$0xff] }
 0x3ac   :  { %v1817_v11 = vmul.f32 %v4959_v51, %v1816_v61  ;;  %v1461_v18 = vmax.f32 %v4888_v28, 0.0  ;;  %v1642_v3 = vmul.f32 1.442695, %v1591_v49  ;;  %v2109_v19 = vsub.f32 %v2420_v58, %v2077_v37  ;;  %v5645_v61 = vld [vmem:[#allocation48_spill] sm:$0xff] }
 0x3ad   :  { %vm1819_vm14 = vcmp.lt.f32.partialorder %v1818_v6, 0.0004427343  ;;  %vm1493_vm15 = vcmp.ne.f32.partialorder %v4888_v28, %v4888_v28  ;;  %v1825_v7 = vadd.f32 1.0, %v1824_v5  ;;  %3027 = vlog2.f32 %v1902_v9 }
 0x3ae   :  { %v1820_v22 = vsel %vm1819_vm14, %v1817_v11, %v1814_v27  ;;  %v1827_v26 = vand.u32 2147483647, %v4978_v2  ;;  %3029 = vpow2.f32 %v1642_v3  ;;  %v1568_v30 = vand.u32 2147483647, %v5016_v45  ;;  %v5032_v60 = vpop.eup %3021  ;;  %2166 = vadd.xlane.f32.xlu1 %v2109_v19  ;;  %v5648_v19 = vld [vmem:[#allocation51_spill] sm:$0xff] }
 0x3af   :  { %v1972_v51 = vadd.f32 %v1820_v22, %v1460_v52  ;;  %v5647_v49 = vsub.f32 %v5645_v61, %v5646_v12  ;;  %v1905_v6 = vmul.f32 -0.5, %v5007_v44  ;;  %v5041_v5 = vmul.f32 -2.0, %v5005_v48  ;;  %v5649_v22 = vld [vmem:[#allocation22_spill] sm:$0xff] }
 0x3b0   :  { %v3024_v41 = vpop.eup %3023  ;;  %v1470_v37 = vmax.f32 %v4923_v0, 0.0  ;;  %v1911_v9 = vadd.f32 1.0, %v5032_v60  ;;  %v1600_v27 = vsub.f32 0.0, %v1568_v30  ;;  %v1826_v3 = vmul.f32 %v4978_v2, %v1825_v7 }
 0x3b1   :  { %v5037_v58 = vadd.f32 -0.9189385, %v5647_v49  ;;  %v2004_v52 = vsel %vm1492_vm13, %v4867_v29, %v1972_v51  ;;  %v1823_v11 = vmul.f32 0.6931472, %v3024_v41  ;;  %v5650_v61 = vsub.f32 %v5648_v19, %v5649_v22 }
 0x3b2   :  { %v2036_v49 = vsub.f32 %v1396_v38, %v2004_v52  ;;  %vm1828_vm0 = vcmp.lt.f32.partialorder %v1827_v26, 0.0004427343  ;;  %v1407_v8 = vsub.f32 0.6931472, %v4927_v59  ;;  %3031 = vlog2.f32 %v1911_v9  ;;  %v5651_v26 = vld [vmem:[#allocation54_spill] sm:$0xff]  ;;  %v5652_v9 = vld [vmem:[#allocation27_spill] sm:$0xff] }
 0x3b3   :  { %v5054_v12 = vadd.f32 -0.9189385, %v5650_v61  ;;  %v5057_v1 = vpop.eup %3025  ;;  %v1829_v30 = vsel %vm1828_vm0, %v1826_v3, %v1823_v11  ;;  %v1906_v20 = vadd.f32 1.0, %v1905_v6  ;;  %v1660_v46 = vmul.f32 1.442695, %v1600_v27 }
 0x3b4   :  { %v1569_v29 = vand.u32 2147483647, %v5041_v5  ;;  %v2068_v51 = vmul.f32 2.0, %v2036_v49  ;;  %v1973_v41 = vadd.f32 %v1829_v30, %v1461_v18  ;;  %vm1502_vm1 = vcmp.ne.f32.partialorder %v4923_v0, %v4923_v0 }
 0x3b5   :  { %v1914_v2 = vmul.f32 -0.5, %v5032_v60  ;;  %v1830_v38 = vadd.f32 1.0, %v5057_v1  ;;  %v1908_v7 = vand.u32 2147483647, %v5007_v44  ;;  %v5653_v52 = vsub.f32 %v5651_v26, %v5652_v9 }
 0x3b6   :  { %3033 = vpow2.f32 %v1660_v46  ;;  %v1601_v6 = vsub.f32 0.0, %v1569_v29  ;;  %v2100_v27 = vsub.f32 %v4990_v10, %v2068_v51  ;;  %v2005_v18 = vsel %vm1493_vm15, %v4888_v28, %v1973_v41 }
 0x3b7   :  { %v5068_v19 = vadd.f32 -0.9189385, %v5653_v52  ;;  %3035 = vlog2.f32 %v1830_v38  ;;  %v5076_v11 = vmul.f32 -2.0, %v5020_v40  ;;  %v3028_v3 = vpop.eup %3027  ;;  %v2037_v22 = vsub.f32 %v1397_v42, %v2005_v18 }
 0x3b8   :  { %v1907_v61 = vmul.f32 %v5007_v44, %v1906_v20  ;;  %v1471_v49 = vmax.f32 %v4943_v15, 0.0  ;;  %v1662_v30 = vmul.f32 1.442695, %v1601_v6  ;;  %v5080_v46 = vpop.eup %3029  ;;  %2148 = vadd.xlane.f32.xlu0 %v2100_v27  ;;  %v1904_v10 = vmul.f32 0.6931472, %v3028_v3  ;;  %v5654_v3 = vld [vmem:[#allocation32_spill] sm:$0xff] }
 0x3b9   :  { %v1915_v29 = vadd.f32 1.0, %v1914_v2  ;;  %v1833_v51 = vmul.f32 -0.5, %v5057_v1  ;;  %v1570_v28 = vand.u32 2147483647, %v5076_v11  ;;  %v2069_v41 = vmul.f32 2.0, %v2037_v22 }
 0x3ba   :  { %vm1909_vm2 = vcmp.lt.f32.partialorder %v1908_v7, 0.0004427343  ;;  %vm1503_vm3 = vcmp.ne.f32.partialorder %v4943_v15, %v4943_v15  ;;  %v1398_v42 = vsub.f32 0.6931472, %v4949_v32  ;;  %v1839_v20 = vadd.f32 1.0, %v5080_v46 }
 0x3bb   :  { %v1910_v44 = vsel %vm1909_vm2, %v1907_v61, %v1904_v10  ;;  %v1917_v38 = vand.u32 2147483647, %v5032_v60  ;;  %3037 = vpow2.f32 %v1662_v30  ;;  %v1602_v26 = vsub.f32 0.0, %v1570_v28  ;;  %v5655_v30 = vld [vmem:[#allocation29_spill] sm:$0xff] }
 0x3bc   :  { %v2101_v2 = vsub.f32 %v5012_v21, %v2069_v41  ;;  %v1982_v9 = vadd.f32 %v1910_v44, %v1470_v37  ;;  %v1399_v52 = vsub.f32 0.6931472, %v4953_v33  ;;  %3039 = vlog2.f32 %v1839_v20  ;;  %v3032_v6 = vpop.eup %3031 }
 0x3bd   :  { %v1916_v7 = vmul.f32 %v5032_v60, %v1915_v29  ;;  %v1834_v27 = vadd.f32 1.0, %v1833_v51  ;;  %v1664_v18 = vmul.f32 1.442695, %v1602_v26  ;;  %v5094_v22 = vadd.f32 %v4920_v4, %v5654_v3 }
 0x3be   :  { %2150 = vadd.xlane.f32.xlu1 %v2101_v2  ;;  %v2014_v61 = vsel %vm1502_vm1, %v4923_v0, %v1982_v9  ;;  %v1913_v21 = vmul.f32 0.6931472, %v3032_v6  ;;  %v1842_v37 = vmul.f32 -0.5, %v5080_v46  ;;  %3041 = vtanh.f32 %v5655_v30  ;;  %v5657_v0 = vld [vmem:[#allocation37_spill] sm:$0xff]  ;;  %v2117_v2 = vpop.xlane.xlu0 %2116 }
 0x3bf   :  { %v5656_v10 = vsub.f32 0.6931472, %v4908_v57  ;;  %vm1918_vm4 = vcmp.lt.f32.partialorder %v1917_v38, 0.0004427343  ;;  %v1836_v29 = vand.u32 2147483647, %v5057_v1  ;;  %3043 = vpow2.f32 %v1664_v18 }
 0x3c0   :  { %v5105_v4 = vpop.eup %3033  ;;  %v1919_v51 = vsel %vm1918_vm4, %v1916_v7, %v1913_v21  ;;  %v1462_v28 = vmax.f32 %v4967_v14, 0.0  ;;  %v5109_v41 = vmul.f32 -2.0, %v5094_v22  ;;  %3045 = vtanh.f32 %v5657_v0 }
 0x3c1   :  { %v2046_v60 = vsub.f32 %v5656_v10, %v2014_v61  ;;  %v3036_v20 = vpop.eup %3035  ;;  %v1983_v26 = vadd.f32 %v1919_v51, %v1471_v49  ;;  %vm1494_vm5 = vcmp.ne.f32.partialorder %v4967_v14, %v4967_v14  ;;  %v1920_v38 = vadd.f32 1.0, %v5105_v4 }
 0x3c2   :  { %v1832_v9 = vmul.f32 0.6931472, %v3036_v20  ;;  %v1835_v6 = vmul.f32 %v5057_v1, %v1834_v27  ;;  %v1843_v7 = vadd.f32 1.0, %v1842_v37  ;;  %v1845_v18 = vand.u32 2147483647, %v5080_v46 }
 0x3c3   :  { %v2078_v44 = vmul.f32 2.0, %v2046_v60  ;;  %v2015_v61 = vsel %vm1503_vm3, %v4943_v15, %v1983_v26  ;;  %vm1837_vm6 = vcmp.lt.f32.partialorder %v1836_v29, 0.0004427343  ;;  %3047 = vlog2.f32 %v1920_v38  ;;  %v5658_v15 = vld [vmem:[#allocation50_spill] sm:$0xff]  ;;  %v2119_v26 = vpop.xlane.xlu0 %2118  ;;  %v5662_v29 = vld [vmem:[#allocation60_spill] sm:$0xff] }
 0x3c4   :  { %v2047_v49 = vsub.f32 %v1407_v8, %v2015_v61  ;;  %v1838_v21 = vsel %vm1837_vm6, %v1835_v6, %v1832_v9  ;;  %v1463_v30 = vmax.f32 %v4983_v47, 0.0  ;;  %v1571_v1 = vand.u32 2147483647, %v5109_v41  ;;  %v5661_v6 = vld [vmem:[#allocation52_spill] sm:$0xff] }
 0x3c5   :  { %v2110_v3 = vsub.f32 %v5037_v58, %v2078_v44  ;;  %v5126_v27 = vpop.eup %3037  ;;  %v1974_v37 = vadd.f32 %v1838_v21, %v1462_v28  ;;  %vm1495_vm7 = vcmp.ne.f32.partialorder %v4983_v47, %v4983_v47  ;;  %v1923_v58 = vmul.f32 -0.5, %v5105_v4 }
 0x3c6   :  { %3049 = vtanh.f32 %v5658_v15  ;;  %v3040_v10 = vpop.eup %3039  ;;  %v2079_v60 = vmul.f32 2.0, %v2047_v49  ;;  %v1844_v8 = vmul.f32 %v5080_v46, %v1843_v7  ;;  %vm5133_vm8 = vcmp.lt.f32.partialorder %v1845_v18, 0.0004427343 }
 0x3c7   :  { %2168 = vadd.xlane.f32.xlu0 %v2110_v3  ;;  %v1929_v51 = vadd.f32 1.0, %v5126_v27  ;;  %v2006_v28 = vsel %vm1494_vm5, %v4967_v14, %v1974_v37  ;;  %v1841_v0 = vmul.f32 0.6931472, %v3040_v10  ;;  %v1603_v20 = vsub.f32 0.0, %v1571_v1  ;;  %v2121_v10 = vpop.xlane.xlu1 %2120 }
 0x3c8   :  { %v2180_v44 = vadd.f32 110.27262, %v2117_v2  ;;  %v3042_v38 = vpop.eup %3041  ;;  %v2111_v9 = vsub.f32 %v5054_v12, %v2079_v60  ;;  %v2038_v46 = vsub.f32 %v1398_v42, %v2006_v28  ;;  %vm2278_vm9 = vcmp.eq.s32.totalorder %v5661_v6, 8 }
 0x3c9   :  { %3051 = vlog2.f32 %v1929_v51  ;;  %v5146_v7 = vpop.eup %3043  ;;  %v1847_v18 = vsel %vm5133_vm8, %v1844_v8, %v1841_v0  ;;  %v1924_v3 = vadd.f32 1.0, %v1923_v58  ;;  %v1666_v14 = vmul.f32 1.442695, %v1603_v20  ;;  %v5663_v51 = vld [vmem:[#allocation28_spill] sm:$0xff] }
 0x3ca   :  { %v2244_v61 = vmul.f32 2.0, %v3042_v38  ;;  %v3046_v49 = vpop.eup %3045  ;;  %2170 = vadd.xlane.f32.xlu1 %v2111_v9  ;;  %v2070_v2 = vmul.f32 2.0, %v2038_v46  ;;  %v1975_v21 = vadd.f32 %v1847_v18, %v1463_v30  ;;  %v1938_v12 = vadd.f32 1.0, %v5146_v7 }
 0x3cb   :  { %v2181_v1 = vadd.f32 110.27262, %v2119_v26  ;;  %v1926_v42 = vand.u32 2147483647, %v5105_v4  ;;  %v1932_v37 = vmul.f32 -0.5, %v5126_v27  ;;  %3053 = vpow2.f32 %v1666_v14  ;;  %v5665_v26 = vld [vmem:[#allocation53_spill] sm:$0xff] }
 0x3cc   :  { %v2279_v15 = vsel %vm2278_vm9, %v2180_v44, %v2244_v61  ;;  %v2102_v58 = vsub.f32 %v5068_v19, %v2070_v2  ;;  %v2007_v60 = vsel %vm1495_vm7, %v4983_v47, %v1975_v21  ;;  %3055 = vlog2.f32 %v1938_v12 }
 0x3cd   :  { %2311 = vst [vmem:[#allocation7] sm:$0xff] %v2279_v15  ;;  %v2245_v30 = vmul.f32 2.0, %v3046_v49  ;;  %v3048_v8 = vpop.eup %3047  ;;  %v5664_v28 = vsub.f32 %v5662_v29, %v5663_v51  ;;  %v2039_v20 = vsub.f32 %v1399_v52, %v2007_v60  ;;  %v1472_v44 = vmax.f32 %v5016_v45, 0.0  ;;  %v5666_v52 = vld [vmem:[#allocation58_spill] sm:$0xff]  ;;  %v5667_v15 = vld [vmem:[#allocation96_spill] sm:$0xff] }
 0x3ce   :  { %3057 = vtanh.f32 %v5665_v26  ;;  %2152 = vadd.xlane.f32.xlu0 %v2102_v58  ;;  %v1922_v19 = vmul.f32 0.6931472, %v3048_v8  ;;  %v1925_v38 = vmul.f32 %v5105_v4, %v1924_v3  ;;  %v2182_v9 = vadd.f32 110.27262, %v2121_v10  ;;  %v5668_v4 = vld [vmem:[#allocation55_spill] sm:$0xff]  ;;  %v5669_v58 = vld [vmem:[#allocation61_spill] sm:$0xff] }
 0x3cf   :  { %v2414_v0 = vadd.f32 -0.9189385, %v5664_v28  ;;  %v2280_v47 = vsel %vm2278_vm9, %v2181_v1, %v2245_v30  ;;  %v2071_v18 = vmul.f32 2.0, %v2039_v20  ;;  %vm1927_vm10 = vcmp.lt.f32.partialorder %v1926_v42, 0.0004427343  ;;  %v5670_v30 = vld [vmem:[#allocation56_spill] sm:$0xff] }
 0x3d0   :  { %v3050_v46 = vpop.eup %3049  ;;  %v1933_v14 = vadd.f32 1.0, %v1932_v37  ;;  %v1941_v61 = vmul.f32 -0.5, %v5146_v7  ;;  %2312 = vst [vmem:[#allocation7 + $0x8] sm:$0xff] %v2280_v47  ;;  %v1313_v49 = vmul.f32 %v4664_v55, %v5666_v52  ;;  %v1928_v2 = vsel %vm1927_vm10, %v1925_v38, %v1922_v19  ;;  %v5671_v26 = vld [vmem:[#allocation64_spill] sm:$0xff] }
 0x3d1   :  { %v1935_v21 = vand.u32 2147483647, %v5126_v27  ;;  %v2246_v12 = vmul.f32 2.0, %v3050_v46  ;;  %v1344_v3 = vsub.f32 %v5668_v4, %v5667_v15  ;;  %v1314_v1 = vmul.f32 %v4688_v62, %v5669_v58  ;;  %v5672_v15 = vld [vmem:[#allocation67_spill] sm:$0xff] }
 0x3d2   :  { %v2103_v10 = vsub.f32 %v2414_v0, %v2071_v18  ;;  %v1984_v60 = vadd.f32 %v1928_v2, %v1472_v44  ;;  %v1408_v37 = vsub.f32 0.6931472, %v5001_v53  ;;  %vm1504_vm11 = vcmp.ne.f32.partialorder %v5016_v45, %v5016_v45 }
 0x3d3   :  { %v3052_v42 = vpop.eup %3051  ;;  %v2281_v55 = vsel %vm2278_vm9, %v2182_v9, %v2246_v12  ;;  %3059 = vtanh.f32 %v5670_v30  ;;  %v1934_v51 = vmul.f32 %v5126_v27, %v1933_v14  ;;  %v1942_v62 = vadd.f32 1.0, %v1941_v61 }
 0x3d4   :  { %2154 = vadd.xlane.f32.xlu1 %v2103_v10  ;;  %v2016_v8 = vsel %vm1504_vm11, %v5016_v45, %v1984_v60  ;;  %v1931_v29 = vmul.f32 0.6931472, %v3052_v42  ;;  %2313 = vst [vmem:[#allocation7 + $0x10] sm:$0xff] %v2281_v55  ;;  %v1473_v0 = vmax.f32 %v5041_v5, 0.0  ;;  %vm1936_vm12 = vcmp.lt.f32.partialorder %v1935_v21, 0.0004427343  ;;  %v2123_v21 = vpop.xlane.xlu1 %2122 }
 0x3d5   :  { %v2048_v28 = vsub.f32 %v1408_v37, %v2016_v8  ;;  %v1944_v20 = vand.u32 2147483647, %v5146_v7  ;;  %v3054_v44 = vpop.eup %3053  ;;  %v1345_v19 = vsub.f32 %v1313_v49, %v5671_v26  ;;  %v2423_v38 = vadd.f32 -0.9189385, %v1344_v3 }
 0x3d6   :  { %v1409_v47 = vsub.f32 0.6931472, %v5005_v48  ;;  %v1937_v9 = vsel %vm1936_vm12, %v1934_v51, %v1931_v29  ;;  %v3056_v46 = vpop.eup %3055  ;;  %vm1505_vm13 = vcmp.ne.f32.partialorder %v5041_v5, %v5041_v5  ;;  %v1947_v18 = vadd.f32 1.0, %v3054_v44 }
 0x3d7   :  { %v2080_v45 = vmul.f32 2.0, %v2048_v28  ;;  %v1985_v27 = vadd.f32 %v1937_v9, %v1473_v0  ;;  %v1474_v61 = vmax.f32 %v5076_v11, 0.0  ;;  %v1940_v52 = vmul.f32 0.6931472, %v3056_v46 }
 0x3d8   :  { %v3058_v14 = vpop.eup %3057  ;;  %v1943_v2 = vmul.f32 %v5146_v7, %v1942_v62  ;;  %3061 = vtanh.f32 %v4344_v16  ;;  %vm1945_vm14 = vcmp.lt.f32.partialorder %v1944_v20, 0.0004427343  ;;  %v1346_v4 = vsub.f32 %v1314_v1, %v5672_v15  ;;  %v2125_v62 = vpop.xlane.xlu0 %2124 }
 0x3d9   :  { %v2112_v49 = vsub.f32 %v2423_v38, %v2080_v45  ;;  %v2017_v12 = vsel %vm1505_vm13, %v5041_v5, %v1985_v27  ;;  %3063 = vlog2.f32 %v1947_v18  ;;  %v2424_v3 = vadd.f32 -0.9189385, %v1345_v19 }
 0x3da   :  { %v2049_v58 = vsub.f32 %v1409_v47, %v2017_v12  ;;  %v1946_v10 = vsel %vm1945_vm14, %v1943_v2, %v1940_v52  ;;  %v2247_v42 = vmul.f32 2.0, %v3058_v14  ;;  %v2183_v37 = vadd.f32 110.27262, %v2123_v21  ;;  %v5673_v21 = vld [vmem:[#allocation11_spill] sm:$0xff] }
 0x3db   :  { %2172 = vadd.xlane.f32.xlu0 %v2112_v49  ;;  %v1986_v60 = vadd.f32 %v1946_v10, %v1474_v61  ;;  %3065 = vtanh.f32 %v4360_v34  ;;  %v1410_v55 = vsub.f32 0.6931472, %v5020_v40  ;;  %vm1506_vm15 = vcmp.ne.f32.partialorder %v5076_v11, %v5076_v11 }
 0x3dc   :  { %v2081_v7 = vmul.f32 2.0, %v2049_v58  ;;  %v1950_v16 = vmul.f32 -0.5, %v3054_v44  ;;  %v2282_v1 = vsel %vm2278_vm9, %v2183_v37, %v2247_v42  ;;  %3067 = vtanh.f32 %v4365_v43 }
 0x3dd   :  { %v3060_v5 = vpop.eup %3059  ;;  %v2018_v30 = vsel %vm1506_vm15, %v5076_v11, %v1986_v60  ;;  %2314 = vst [vmem:[#allocation7 + $0x18] sm:$0xff] %v2282_v1  ;;  %v1283_v34 = vmul.f32 -0.5, %v4913_v17  ;;  %v2425_v51 = vadd.f32 -0.9189385, %v1346_v4  ;;  %v2184_v26 = vadd.f32 110.27262, %v2125_v62 }
 0x3de   :  { %v2113_v8 = vsub.f32 %v2424_v3, %v2081_v7  ;;  %v2050_v29 = vsub.f32 %v1410_v55, %v2018_v30  ;;  %v1951_v0 = vadd.f32 1.0, %v1950_v16  ;;  %v2248_v20 = vmul.f32 2.0, %v3060_v5  ;;  %v2127_v27 = vpop.xlane.xlu1 %2126 }
 0x3df   :  { %v1953_v19 = vand.u32 2147483647, %v3054_v44  ;;  %v1315_v46 = vmul.f32 %v1283_v34, %v4913_v17  ;;  %3069 = vtanh.f32 %v4384_v36  ;;  %v1475_v14 = vmax.f32 %v5109_v41, 0.0 }
 0x3e0   :  { %2174 = vadd.xlane.f32.xlu1 %v2113_v8  ;;  %v2082_v28 = vmul.f32 2.0, %v2050_v29  ;;  %v2283_v47 = vsel %vm2278_vm9, %v2184_v26, %v2248_v20  ;;  %v1952_v45 = vmul.f32 %v3054_v44, %v1951_v0  ;;  %v2185_v52 = vadd.f32 110.27262, %v2127_v27 }
 0x3e1   :  { %2315 = vst [vmem:[#allocation7 + $0x20] sm:$0xff] %v2283_v47  ;;  %vm1954_vm0 = vcmp.lt.f32.partialorder %v1953_v19, 0.0004427343  ;;  %v1347_v49 = vsub.f32 %v1315_v46, %v5673_v21  ;;  %v2129_v15 = vpop.xlane.xlu0 %2128  ;;  %3071 = vtanh.f32 %v4426_v31  ;;  %v1411_v44 = vsub.f32 0.6931472, %v5094_v22 }
 0x3e2   :  { %v3062_v38 = vpop.eup %3061  ;;  %v2114_v11 = vsub.f32 %v2425_v51, %v2082_v28  ;;  %vm1507_vm1 = vcmp.ne.f32.partialorder %v5109_v41, %v5109_v41  ;;  %v2186_v3 = vadd.f32 110.27262, %v2129_v15  ;;  %3073 = vtanh.f32 %v4447_v25 }
 0x3e3   :  { %v3064_v9 = vpop.eup %3063  ;;  %v2249_v61 = vmul.f32 2.0, %v3062_v38  ;;  %v2426_v31 = vadd.f32 -0.9189385, %v1347_v49  ;;  %3075 = vtanh.f32 %v4465_v23 }
 0x3e4   :  { %2176 = vadd.xlane.f32.xlu0 %v2114_v11  ;;  %v1949_v43 = vmul.f32 0.6931472, %v3064_v9  ;;  %3077 = vtanh.f32 %v4477_v56 }
 0x3e5   :  { %v3066_v18 = vpop.eup %3065  ;;  %v2284_v17 = vsel %vm2278_vm9, %v2185_v52, %v2249_v61  ;;  %v2131_v42 = vpop.xlane.xlu1 %2130 }
 0x3e6   :  { %v1955_v2 = vsel %vm1954_vm0, %v1952_v45, %v1949_v43  ;;  %v3068_v36 = vpop.eup %3067  ;;  %2316 = vst [vmem:[#allocation7 + $0x28] sm:$0xff] %v2284_v17  ;;  %v2250_v4 = vmul.f32 2.0, %v3066_v18  ;;  %v2187_v7 = vadd.f32 110.27262, %v2131_v42  ;;  %v5674_v43 = vld [vmem:[#allocation34_spill] sm:$0xff] }
 0x3e7   :  { %v1987_v12 = vadd.f32 %v1955_v2, %v1475_v14  ;;  %v2251_v37 = vmul.f32 2.0, %v3068_v36  ;;  %3079 = vtanh.f32 %v5674_v43 }
 0x3e8   :  { %v2285_v60 = vsel %vm2278_vm9, %v2186_v3, %v2250_v4  ;;  %3081 = vtanh.f32 %v4614_v13 }
 0x3e9   :  { %v2019_v58 = vsel %vm1507_vm1, %v5109_v41, %v1987_v12  ;;  %2317 = vst [vmem:[#allocation7 + $0x30] sm:$0xff] %v2285_v60  ;;  %v3070_v16 = vpop.eup %3069  ;;  %v2286_v5 = vsel %vm2278_vm9, %v2187_v7, %v2251_v37  ;;  %v2133_v1 = vpop.xlane.xlu0 %2132  ;;  %3083 = vtanh.f32 %v4623_v39 }
 0x3ea   :  { %v2051_v10 = vsub.f32 %v1411_v44, %v2019_v58  ;;  %2318 = vst [vmem:[#allocation7 + $0x38] sm:$0xff] %v2286_v5  ;;  %v2252_v41 = vmul.f32 2.0, %v3070_v16  ;;  %v2188_v8 = vadd.f32 110.27262, %v2133_v1  ;;  %3085 = vtanh.f32 %v4678_v24 }
 0x3eb   :  { %v3072_v29 = vpop.eup %3071  ;;  %3087 = vtanh.f32 %v4682_v50 }
 0x3ec   :  { %v2083_v55 = vmul.f32 2.0, %v2051_v10  ;;  %v2287_v34 = vsel %vm2278_vm9, %v2188_v8, %v2252_v41  ;;  %v2253_v62 = vmul.f32 2.0, %v3072_v29  ;;  %v3074_v0 = vpop.eup %3073  ;;  %3089 = vtanh.f32 %v4704_v35 }
 0x3ed   :  { %2319 = vst [vmem:[#allocation7 + $0x40] sm:$0xff] %v2287_v34  ;;  %v2135_v51 = vpop.xlane.xlu1 %2134  ;;  %v2254_v26 = vmul.f32 2.0, %v3074_v0  ;;  %v3076_v11 = vpop.eup %3075  ;;  %3091 = vtanh.f32 %v4730_v63  ;;  %v5675_v34 = vld [vmem:[#allocation73_spill] sm:$0xff] }
 0x3ee   :  { %v2115_v30 = vsub.f32 %v2426_v31, %v2083_v55  ;;  %v2189_v28 = vadd.f32 110.27262, %v2135_v51  ;;  %v2255_v9 = vmul.f32 2.0, %v3076_v11  ;;  %v3078_v45 = vpop.eup %3077  ;;  %3093 = vtanh.f32 %v4777_v54 }
 0x3ef   :  { %v2264_v18 = vmul.f32 2.0, %v3078_v45  ;;  %3095 = vtanh.f32 %v5675_v34 }
 0x3f0   :  { %2178 = vadd.xlane.f32.xlu1 %v2115_v30  ;;  %v2288_v25 = vsel %vm2278_vm9, %v2189_v28, %v2253_v62 }
 0x3f1   :  { %2320 = vst [vmem:[#allocation7 + $0x48] sm:$0xff] %v2288_v25  ;;  %v3080_v56 = vpop.eup %3079 }
 0x3f2   :  { %v2137_v20 = vpop.xlane.xlu0 %2136  ;;  %v2265_v2 = vmul.f32 2.0, %v3080_v56  ;;  %v3082_v12 = vpop.eup %3081 }
 0x3f3   :  { %v2190_v19 = vadd.f32 110.27262, %v2137_v20  ;;  %v2256_v15 = vmul.f32 2.0, %v3082_v12  ;;  %v3084_v44 = vpop.eup %3083 }
 0x3f4   :  { %v2257_v4 = vmul.f32 2.0, %v3084_v44  ;;  %v3086_v58 = vpop.eup %3085 }
 0x3f5   :  { %v2289_v38 = vsel %vm2278_vm9, %v2190_v19, %v2254_v26  ;;  %v2266_v60 = vmul.f32 2.0, %v3086_v58  ;;  %v3088_v37 = vpop.eup %3087  ;;  %v5676_v26 = vld [vmem:[#allocation35_spill] sm:$0xff] }
 0x3f6   :  { %2321 = vst [vmem:[#allocation7 + $0x50] sm:$0xff] %v2289_v38  ;;  %v3090_v31 = vpop.eup %3089  ;;  %v2267_v55 = vmul.f32 2.0, %v3088_v37  ;;  %3097 = vtanh.f32 %v5676_v26 }
 0x3f7   :  { %v2258_v30 = vmul.f32 2.0, %v3090_v31  ;;  %v3092_v8 = vpop.eup %3091 }
 0x3f8   :  { %v2259_v63 = vmul.f32 2.0, %v3092_v8  ;;  %v3094_v62 = vpop.eup %3093 }
 0x3f9   :  { %v2268_v25 = vmul.f32 2.0, %v3094_v62  ;;  %v3096_v19 = vpop.eup %3095 }
 0x3fa   :  { %v2269_v11 = vmul.f32 2.0, %v3096_v19 }
 0x3fd   :  { %v2139_v47 = vpop.xlane.xlu1 %2138 }
 0x3fe   :  { %v2191_v46 = vadd.f32 110.27262, %v2139_v47 }
 0x400   :  { %v2290_v27 = vsel %vm2278_vm9, %v2191_v46, %v2255_v9  ;;  %v5677_v9 = vld [vmem:[#allocation75_spill] sm:$0xff]  ;;  %v3098_v43 = vpop.eup %3097 }
 0x401   :  { %2322 = vst [vmem:[#allocation7 + $0x58] sm:$0xff] %v2290_v27  ;;  %3099 = vtanh.f32 %v5677_v9  ;;  %v2260_v27 = vmul.f32 2.0, %v3098_v43 }
 0x402   :  { %3101 = vtanh.f32 %v4908_v57 }
 0x403   :  { %v2157_v23 = vpop.xlane.xlu0 %2156  ;;  %3103 = vtanh.f32 %v4927_v59 }
 0x404   :  { %v2200_v14 = vadd.f32 110.27262, %v2157_v23  ;;  %3105 = vtanh.f32 %v4949_v32 }
 0x405   :  { %3107 = vtanh.f32 %v4953_v33 }
 0x406   :  { %v2299_v61 = vsel %vm2278_vm9, %v2200_v14, %v2264_v18  ;;  %3109 = vtanh.f32 %v5001_v53 }
 0x407   :  { %2331 = vst [vmem:[#allocation7 + $0xa0] sm:$0xff] %v2299_v61  ;;  %3111 = vtanh.f32 %v5005_v48 }
 0x408   :  { %3113 = vtanh.f32 %v5020_v40 }
 0x409   :  { %3115 = vtanh.f32 %v5094_v22 }
 0x40b   :  { %v3100_v18 = vpop.eup %3099 }
 0x40c   :  { %v2159_v52 = vpop.xlane.xlu1 %2158  ;;  %v2261_v56 = vmul.f32 2.0, %v3100_v18 }
 0x40d   :  { %v2201_v21 = vadd.f32 110.27262, %v2159_v52 }
 0x40f   :  { %v2300_v49 = vsel %vm2278_vm9, %v2201_v21, %v2265_v2  ;;  %v3102_v21 = vpop.eup %3101 }
 0x410   :  { %2332 = vst [vmem:[#allocation7 + $0xa8] sm:$0xff] %v2300_v49  ;;  %v2270_v49 = vmul.f32 2.0, %v3102_v21 }
 0x415   :  { %v2141_v17 = vpop.xlane.xlu0 %2140 }
 0x416   :  { %v2192_v36 = vadd.f32 110.27262, %v2141_v17  ;;  %v3104_v17 = vpop.eup %3103 }
 0x418   :  { %v2291_v13 = vsel %vm2278_vm9, %v2192_v36, %v2256_v15  ;;  %v2143_v39 = vpop.xlane.xlu1 %2142  ;;  %v2271_v36 = vmul.f32 2.0, %v3104_v17 }
 0x419   :  { %2323 = vst [vmem:[#allocation7 + $0x60] sm:$0xff] %v2291_v13  ;;  %v2193_v3 = vadd.f32 110.27262, %v2143_v39  ;;  %v3106_v13 = vpop.eup %3105 }
 0x41a   :  { %v3108_v58 = vpop.eup %3107 }
 0x41b   :  { %v2292_v24 = vsel %vm2278_vm9, %v2193_v3, %v2257_v4  ;;  %v2262_v4 = vmul.f32 2.0, %v3106_v13  ;;  %v3110_v37 = vpop.eup %3109 }
 0x41c   :  { %2324 = vst [vmem:[#allocation7 + $0x68] sm:$0xff] %v2292_v24  ;;  %v3112_v31 = vpop.eup %3111 }
 0x41d   :  { %v2161_v10 = vpop.xlane.xlu0 %2160 }
 0x41e   :  { %v2202_v42 = vadd.f32 110.27262, %v2161_v10  ;;  %v2263_v10 = vmul.f32 2.0, %v3108_v58 }
 0x420   :  { %v2301_v50 = vsel %vm2278_vm9, %v2202_v42, %v2266_v60 }
 0x421   :  { %2333 = vst [vmem:[#allocation7 + $0xb0] sm:$0xff] %v2301_v50  ;;  %v2272_v50 = vmul.f32 2.0, %v3110_v37 }
 0x422   :  { %v2163_v7 = vpop.xlane.xlu1 %2162 }
 0x423   :  { %v2203_v16 = vadd.f32 110.27262, %v2163_v7 }
 0x425   :  { %v2302_v35 = vsel %vm2278_vm9, %v2203_v16, %v2267_v55 }
 0x426   :  { %2334 = vst [vmem:[#allocation7 + $0xb8] sm:$0xff] %v2302_v35  ;;  %v2273_v35 = vmul.f32 2.0, %v3112_v31 }
 0x427   :  { %v2145_v5 = vpop.xlane.xlu0 %2144 }
 0x428   :  { %v2194_v1 = vadd.f32 110.27262, %v2145_v5  ;;  %v3114_v5 = vpop.eup %3113 }
 0x429   :  { %v2274_v40 = vmul.f32 2.0, %v3114_v5 }
 0x42a   :  { %v2293_v41 = vsel %vm2278_vm9, %v2194_v1, %v2258_v30 }
 0x42b   :  { %2325 = vst [vmem:[#allocation7 + $0x70] sm:$0xff] %v2293_v41 }
 0x42f   :  { %v2147_v29 = vpop.xlane.xlu1 %2146 }
 0x430   :  { %v2195_v51 = vadd.f32 110.27262, %v2147_v29  ;;  %v3116_v29 = vpop.eup %3115 }
 0x432   :  { %v2294_v28 = vsel %vm2278_vm9, %v2195_v51, %v2259_v63  ;;  %v2275_v63 = vmul.f32 2.0, %v3116_v29 }
 0x433   :  { %2326 = vst [vmem:[#allocation7 + $0x78] sm:$0xff] %v2294_v28 }
 0x434   :  { %v2165_v0 = vpop.xlane.xlu0 %2164 }
 0x435   :  { %v2204_v20 = vadd.f32 110.27262, %v2165_v0 }
 0x437   :  { %v2303_v54 = vsel %vm2278_vm9, %v2204_v20, %v2268_v25 }
 0x438   :  { %2335 = vst [vmem:[#allocation7 + $0xc0] sm:$0xff] %v2303_v54 }
 0x43b   :  { %v2167_v38 = vpop.xlane.xlu1 %2166 }
 0x43c   :  { %v2205_v47 = vadd.f32 110.27262, %v2167_v38 }
 0x43e   :  { %v2304_v46 = vsel %vm2278_vm9, %v2205_v47, %v2269_v11 }
 0x43f   :  { %2336 = vst [vmem:[#allocation7 + $0xc8] sm:$0xff] %v2304_v46 }
 0x445   :  { %v2149_v45 = vpop.xlane.xlu0 %2148 }
 0x446   :  { %v2196_v23 = vadd.f32 110.27262, %v2149_v45 }
 0x448   :  { %v2295_v14 = vsel %vm2278_vm9, %v2196_v23, %v2260_v27 }
 0x449   :  { %2327 = vst [vmem:[#allocation7 + $0x80] sm:$0xff] %v2295_v14 }
 0x44b   :  { %v2151_v61 = vpop.xlane.xlu1 %2150 }
 0x44c   :  { %v2197_v52 = vadd.f32 110.27262, %v2151_v61 }
 0x44e   :  { %v2296_v2 = vsel %vm2278_vm9, %v2197_v52, %v2261_v56 }
 0x44f   :  { %2328 = vst [vmem:[#allocation7 + $0x88] sm:$0xff] %v2296_v2 }
 0x454   :  { %v2169_v57 = vpop.xlane.xlu0 %2168 }
 0x455   :  { %v2206_v12 = vadd.f32 110.27262, %v2169_v57 }
 0x457   :  { %v2305_v15 = vsel %vm2278_vm9, %v2206_v12, %v2270_v49  ;;  %v2171_v59 = vpop.xlane.xlu1 %2170 }
 0x458   :  { %2337 = vst [vmem:[#allocation7 + $0xd0] sm:$0xff] %v2305_v15  ;;  %v2207_v44 = vadd.f32 110.27262, %v2171_v59 }
 0x45a   :  { %v2306_v39 = vsel %vm2278_vm9, %v2207_v44, %v2271_v36 }
 0x45b   :  { %2338 = vst [vmem:[#allocation7 + $0xd8] sm:$0xff] %v2306_v39  ;;  %v2153_v32 = vpop.xlane.xlu0 %2152 }
 0x45c   :  { %v2198_v3 = vadd.f32 110.27262, %v2153_v32 }
 0x45e   :  { %v2297_v33 = vsel %vm2278_vm9, %v2198_v3, %v2262_v4 }
 0x45f   :  { %2329 = vst [vmem:[#allocation7 + $0x90] sm:$0xff] %v2297_v33 }
 0x461   :  { %v2155_v24 = vpop.xlane.xlu1 %2154 }
 0x462   :  { %v2199_v60 = vadd.f32 110.27262, %v2155_v24 }
 0x464   :  { %v2298_v42 = vsel %vm2278_vm9, %v2199_v60, %v2263_v10 }
 0x465   :  { %2330 = vst [vmem:[#allocation7 + $0x98] sm:$0xff] %v2298_v42 }
 0x468   :  { %v2173_v53 = vpop.xlane.xlu0 %2172 }
 0x469   :  { %v2208_v7 = vadd.f32 110.27262, %v2173_v53 }
 0x46b   :  { %v2307_v55 = vsel %vm2278_vm9, %v2208_v7, %v2272_v50 }
 0x46c   :  { %2339 = vst [vmem:[#allocation7 + $0xe0] sm:$0xff] %v2307_v55 }
 0x46d   :  { %v2175_v16 = vpop.xlane.xlu1 %2174 }
 0x46e   :  { %v2209_v48 = vadd.f32 110.27262, %v2175_v16 }
 0x470   :  { %v2308_v30 = vsel %vm2278_vm9, %v2209_v48, %v2273_v35 }
 0x471   :  { %2340 = vst [vmem:[#allocation7 + $0xe8] sm:$0xff] %v2308_v30  ;;  %v2177_v1 = vpop.xlane.xlu0 %2176 }
 0x472   :  { %v2210_v41 = vadd.f32 110.27262, %v2177_v1 }
 0x474   :  { %v2309_v8 = vsel %vm2278_vm9, %v2210_v41, %v2274_v40 }
 0x475   :  { %2341 = vst [vmem:[#allocation7 + $0xf0] sm:$0xff] %v2309_v8 }
 0x47d   :  { %v2179_v34 = vpop.xlane.xlu1 %2178 }
 0x47e   :  { %v2211_v51 = vadd.f32 110.27262, %v2179_v34 }
 0x480   :  { %v2310_v62 = vsel %vm2278_vm9, %v2211_v51, %v2275_v63 }
 0x481   :  { %2342 = vst [vmem:[#allocation7 + $0xf8] sm:$0xff] %v2310_v62 }
 0x482   :  { %3175 = shalt.err (!%p3172_p6)
}
 0x483   :  { %s3176_s17 = scalar_lea.hbm %s5314_s6, 4096 }
 0x484   :  { %p3177_p7 = scmp.ne.s32.totalorder %s5314_s6, %s3176_s17  ;;  %p3180_p8 = scmp.lt.u32.totalorder %s3176_s17, %s5314_s6 }
 0x486   :  { %p3182_p9 = pnand %p3180_p8, %p3177_p7 }
 0x488   :  { %3185 = shalt.err (!%p3182_p9)
}
 0x489   :  { %2354 = dma.vmem_to_hbm [thread:$0]  %s2349_s13, 4096, %s5314_s6, [#allocation4], %s3193_s7, %s3193_s7, %s3194_s8  }
 0x48a   :  { %3190 = dma.done.wait [#allocation4], 4096  }
 0x48b   :  { %3191 = vsyncadd [#allocation4], 4294963200 }
 0x48c   :  { %2358 = vsyncpa [#allocation3], 1 }
 0x48d   :  { %2359 = vsyncpa [#allocation6], 1 }
 0x48e   :  { %2360 = vsyncpa [#allocation4], 1 }

</bundles_post_ra>
